<compile_context>
chip_gen: v7x
topology: tpu7x:2x2x1
jax: 0.10.0
libtpu: 0.0.40
codegen_flags: <defaults>
</compile_context>

<pallas_src>
import jax
import jax.numpy as jnp
from jax.experimental import pallas as pl
from jax.experimental.pallas import tpu as pltpu

KH = KW = 3   # kernel_size
OC = 32       # Conv2d out_channels
TC = 2        # ConvTranspose2d out_channels


def _make_edge_kernel(H, W):
    """Build the fused kernel for a fixed image size (H, W)."""

    def kernel(u_ref, mask_ref, w1_ref, b1_ref, wd_ref, bd_ref, o_ref, pat_ref):
        # u_ref   : (1, 1, L)  9 unfolded HxW sub-images of one batch element,
        #                      flattened tap-major onto the lane axis (L = 9*H*W).
        # mask_ref: (1, 1, L)  1.0 inside the valid (H-2, W-2) conv-output region.
        # w1_ref  : (32, 9)    Conv2d(1,32,3) weight, taps on the K axis.
        # b1_ref  : (32, 1)    Conv2d bias.
        # wd_ref  : (9, 32)    per-tap (out-ch-1 minus out-ch-0) ConvTranspose weight.
        # bd_ref  : (1, 1)     b_convt[1] - b_convt[0].
        # o_ref   : (1, 1, L)  sigmoid(dec1 - dec0), lane-dense.
        # pat_ref : (9, L)     VMEM scratch for the 9-tap patch matrix.
        u = u_ref[0]                                    # (1, L)
        mask = mask_ref[0]                              # (1, L)
        L = u.shape[-1]

        # ---- stage 1: valid 3x3 conv (1 -> 32) as a (32,9) @ (9,L) MXU matmul.
        # Tap (ky,kx) of output pixel p reads input pixel p + ky*W + kx.  The
        # roll wrap-around only ever lands on positions that are masked away
        # before stage 2, so a plain lane rotation is exact for all valid pixels.
        t = 0
        for ky in range(KH):
            for kx in range(KW):
                s = ky * W + kx
                pat_ref[pl.ds(t, 1), :] = u if s == 0 else pltpu.roll(u, L - s, axis=1)
                t += 1
        logits = jnp.dot(w1_ref[...], pat_ref[...],
                         preferred_element_type=jnp.float32) + b1_ref[...]   # (32, L)

        # ---- softmax over the 32 channels (sublane axis), per pixel.
        m = jnp.max(logits, axis=0, keepdims=True)
        e = jnp.exp(logits - m)
        den = jnp.sum(e, axis=0, keepdims=True)
        enc = e * pl.reciprocal(den)                    # (32, L)

        # ---- stage 2: ConvTranspose2d(32,2,3) folded into a 1-wide "diff" conv:
        #   dec(q) = bd + sum_t proj_t(q - ky*W - kx),  proj_t = sum_c wd[t,c] * enc_c
        # Reads outside the encoder's (H-2, W-2) domain must contribute zero,
        # which the mask enforces at the source positions before the shifts.
        proj = jnp.dot(wd_ref[...], enc,
                       preferred_element_type=jnp.float32)                   # (9, L)
        proj = proj * mask
        dec = jnp.zeros_like(u)                         # (1, L)
        t = 0
        for ky in range(KH):
            for kx in range(KW):
                k = ky * W + kx
                row = proj[t:t + 1, :]
                dec = dec + (row if k == 0 else pltpu.roll(row, k, axis=1))
                t += 1
        dec = dec + bd_ref[...]

        # ---- softmax over 2 channels + pick channel 1  ==  sigmoid(d1 - d0)
        o_ref[0] = pl.reciprocal(1.0 + jnp.exp(-dec))

    return kernel


def edge_kernel_2d(x, w_conv, b_conv, w_convt, b_convt):
    """Fused Pallas EdgeKernel2d.forward (defaults: in_ch=1, k=3, stride=1, pad=1)."""
    bs, ch, H, W = x.shape
    assert ch == 1, "this implementation supports in_channels=1 (module default)"
    # TODO(synk): the module also allows in_channels==2; that branch is not implemented.
    HW = H * W
    L = KH * KW * HW

    # ---- glue: F.unfold(x, 3, pad=1) -> 9 sub-images, flattened tap-major onto lanes.
    xp = jnp.pad(x[:, 0], ((0, 0), (1, 1), (1, 1)))
    cols = jnp.stack([xp[:, a:a + H, b:b + W]
                      for a in range(KH) for b in range(KW)], axis=1)      # (bs, 9, H, W)
    cols = cols.reshape(bs, 1, L)

    # validity mask of the (H-2, W-2) valid-conv region, tiled over the 9 taps.
    m2d = ((jnp.arange(H)[:, None] < H - 2) &
           (jnp.arange(W)[None, :] < W - 2)).astype(jnp.float32)           # (H, W)
    mask = jnp.tile(m2d.reshape(1, HW), (1, KH * KW)).reshape(1, 1, L)

    # weight prep (tiny; constant-folds under jit).
    w1 = w_conv.reshape(OC, KH * KW)                                       # (32, 9)
    b1 = b_conv.reshape(OC, 1)                                             # (32, 1)
    wd = (w_convt[:, 1] - w_convt[:, 0]).reshape(OC, KH * KW).T            # (9, 32)
    bd = (b_convt[1] - b_convt[0]).reshape(1, 1)                           # (1, 1)

    kernel = _make_edge_kernel(H, W)
    y = pl.pallas_call(
        kernel,
        out_shape=jax.ShapeDtypeStruct((bs, 1, L), jnp.float32),
        grid=(bs,),
        in_specs=[
            pl.BlockSpec((1, 1, L), lambda b: (b, 0, 0)),      # unfolded sub-images
            pl.BlockSpec((1, 1, L), lambda b: (0, 0, 0)),      # validity mask
            pl.BlockSpec((OC, KH * KW), lambda b: (0, 0)),     # conv weight
            pl.BlockSpec((OC, 1), lambda b: (0, 0)),           # conv bias
            pl.BlockSpec((KH * KW, OC), lambda b: (0, 0)),     # folded convT weight
            pl.BlockSpec((1, 1), lambda b: (0, 0)),            # folded convT bias
        ],
        out_specs=pl.BlockSpec((1, 1, L), lambda b: (b, 0, 0)),
        scratch_shapes=[pltpu.VMEM((KH * KW, L), jnp.float32)],
        compiler_params=pltpu.CompilerParams(dimension_semantics=("parallel",)),
    )(cols, mask, w1, b1, wd, bd)
    # TODO(synk): for very large images (32*9*H*W*4B approaching the scoped VMEM
    # limit) the lane axis needs a second, pixel-tile grid dimension.

    # ---- glue: y.view(bs, 1, 3, 3, out_h, out_w)
    return y.reshape(bs, 1, KH, KW, H, W)


def edge_kernel_2d_reference(x, w_conv, b_conv, w_convt, b_convt):
    """Pure-JAX (lax.conv) reference of the PyTorch forward, for validation."""
    bs, ch, H, W = x.shape
    xp = jnp.pad(x, ((0, 0), (0, 0), (1, 1), (1, 1)))
    cols = jnp.stack([xp[:, :, a:a + H, b:b + W]
                      for a in range(3) for b in range(3)], axis=2)        # (bs, ch, 9, H, W)
    cols = cols.reshape(bs, ch * 9, H * W).reshape(bs * 9, ch, H, W)
    enc = jax.lax.conv_general_dilated(
        cols, w_conv, (1, 1), 'VALID',
        dimension_numbers=('NCHW', 'OIHW', 'NCHW')) + b_conv[None, :, None, None]
    enc = jax.nn.softmax(enc, axis=1)
    wt = jnp.transpose(w_convt[:, :, ::-1, ::-1], (1, 0, 2, 3))            # (2, 32, 3, 3)
    dec = jax.lax.conv_general_dilated(
        enc, wt, (1, 1), ((2, 2), (2, 2)),
        dimension_numbers=('NCHW', 'OIHW', 'NCHW')) + b_convt[None, :, None, None]
    yy = jax.nn.softmax(dec, axis=1)[:, 1:2]                               # [0,1] conv pick
    return yy.reshape(bs, 1, 3, 3, H, W)


if __name__ == "__main__":
    key = jax.random.PRNGKey(0)
    k1, k2, k3, k4, k5 = jax.random.split(key, 5)
    bs, ch, H, W = 2, 1, 16, 16
    x = jax.random.normal(k1, (bs, ch, H, W), jnp.float32)
    # deterministic synthetic parameters (shapes from the module __init__)
    w_conv = jax.random.normal(k2, (OC, 1, KH, KW), jnp.float32) * 0.3     # Conv2d weight
    b_conv = jax.random.normal(k3, (OC,), jnp.float32) * 0.1               # Conv2d bias
    w_convt = jax.random.normal(k4, (OC, TC, KH, KW), jnp.float32) * 0.3   # ConvTranspose2d weight
    b_convt = jax.random.normal(k5, (TC,), jnp.float32) * 0.1              # ConvTranspose2d bias

    out = jax.jit(edge_kernel_2d)(x, w_conv, b_conv, w_convt, b_convt)
    out = jax.block_until_ready(out)

    ref = edge_kernel_2d_reference(x, w_conv, b_conv, w_convt, b_convt)
    assert out.shape == (bs, 1, KH, KW, H, W), out.shape
    # sigmoid-fold and re-ordered f32 accumulation are exact math; only rounding
    # order differs from the reference, hence the tight tolerance.
    if not jnp.allclose(out, ref, atol=1e-5, rtol=1e-4):
        raise AssertionError(f"mismatch, max abs err = {jnp.max(jnp.abs(out - ref))}")
    print("KERNEL_OK")
</pallas_src>

<mosaic_0001>
module attributes {stable_mosaic.version = 11 : i64} {
  func.func @kernel(%arg0: i32, %arg1: memref<1x1x2304xf32, #tpu.memory_space<vmem>>, %arg2: memref<1x1x2304xf32, #tpu.memory_space<vmem>>, %arg3: memref<32x9xf32, #tpu.memory_space<vmem>>, %arg4: memref<32x1xf32, #tpu.memory_space<vmem>>, %arg5: memref<9x32xf32, #tpu.memory_space<vmem>>, %arg6: memref<1x1xf32, #tpu.memory_space<vmem>>, %arg7: memref<1x1x2304xf32, #tpu.memory_space<vmem>>, %arg8: memref<9x2304xf32, #tpu.memory_space<vmem>>) attributes {dimension_semantics = [#tpu.dimension_semantics<parallel>], iteration_bounds = array<i64: 2>, scalar_prefetch = 0 : i64, scratch_operands = 1 : i64, tpu.core_type = #tpu.core_type<tc>, window_params = [{transform_indices = @transform_0, window_bounds = array<i64: 1, 1, 2304>}, {pipeline_mode = #tpu.pipeline_mode<synchronous>, transform_indices = @transform_1, window_bounds = array<i64: 1, 1, 2304>}, {pipeline_mode = #tpu.pipeline_mode<synchronous>, transform_indices = @transform_2, window_bounds = array<i64: 32, 9>}, {pipeline_mode = #tpu.pipeline_mode<synchronous>, transform_indices = @transform_3, window_bounds = array<i64: 32, 1>}, {pipeline_mode = #tpu.pipeline_mode<synchronous>, transform_indices = @transform_4, window_bounds = array<i64: 9, 32>}, {pipeline_mode = #tpu.pipeline_mode<synchronous>, transform_indices = @transform_5, window_bounds = array<i64: 1, 1>}, {transform_indices = @transform_6, window_bounds = array<i64: 1, 1, 2304>}]} {
    %c0 = arith.constant 0 : index
    %c0_0 = arith.constant 0 : index
    %c0_1 = arith.constant 0 : index
    %0 = vector.load %arg1[%c0, %c0_0, %c0_1] : memref<1x1x2304xf32, #tpu.memory_space<vmem>>, vector<1x1x2304xf32>
    %1 = vector.shape_cast %0 : vector<1x1x2304xf32> to vector<1x2304xf32>
    %c0_2 = arith.constant 0 : index
    %c0_3 = arith.constant 0 : index
    %c0_4 = arith.constant 0 : index
    %2 = vector.load %arg2[%c0_2, %c0_3, %c0_4] : memref<1x1x2304xf32, #tpu.memory_space<vmem>>, vector<1x1x2304xf32>
    %3 = vector.shape_cast %2 : vector<1x1x2304xf32> to vector<1x2304xf32>
    %c0_5 = arith.constant 0 : index
    %c0_6 = arith.constant 0 : index
    %4 = vector.load %arg8[%c0_5, %c0_6] : memref<9x2304xf32, #tpu.memory_space<vmem>>, vector<1x2304xf32>
    tpu.vector_store %arg8[%c0_5, %c0_6], %1 {strides = array<i32>} : memref<9x2304xf32, #tpu.memory_space<vmem>>, vector<1x2304xf32>,
    %c2303_i32 = arith.constant 2303 : i32
    %5 = tpu.dynamic_rotate %1 by %c2303_i32 dim 1 : vector<1x2304xf32>, i32 -> vector<1x2304xf32>
    %c1 = arith.constant 1 : index
    %c0_7 = arith.constant 0 : index
    %6 = vector.load %arg8[%c1, %c0_7] : memref<9x2304xf32, #tpu.memory_space<vmem>>, vector<1x2304xf32>
    tpu.vector_store %arg8[%c1, %c0_7], %5 {strides = array<i32>} : memref<9x2304xf32, #tpu.memory_space<vmem>>, vector<1x2304xf32>,
    %c2302_i32 = arith.constant 2302 : i32
    %7 = tpu.dynamic_rotate %1 by %c2302_i32 dim 1 : vector<1x2304xf32>, i32 -> vector<1x2304xf32>
    %c2 = arith.constant 2 : index
    %c0_8 = arith.constant 0 : index
    %8 = vector.load %arg8[%c2, %c0_8] : memref<9x2304xf32, #tpu.memory_space<vmem>>, vector<1x2304xf32>
    tpu.vector_store %arg8[%c2, %c0_8], %7 {strides = array<i32>} : memref<9x2304xf32, #tpu.memory_space<vmem>>, vector<1x2304xf32>,
    %c2288_i32 = arith.constant 2288 : i32
    %9 = tpu.dynamic_rotate %1 by %c2288_i32 dim 1 : vector<1x2304xf32>, i32 -> vector<1x2304xf32>
    %c3 = arith.constant 3 : index
    %c0_9 = arith.constant 0 : index
    %10 = vector.load %arg8[%c3, %c0_9] : memref<9x2304xf32, #tpu.memory_space<vmem>>, vector<1x2304xf32>
    tpu.vector_store %arg8[%c3, %c0_9], %9 {strides = array<i32>} : memref<9x2304xf32, #tpu.memory_space<vmem>>, vector<1x2304xf32>,
    %c2287_i32 = arith.constant 2287 : i32
    %11 = tpu.dynamic_rotate %1 by %c2287_i32 dim 1 : vector<1x2304xf32>, i32 -> vector<1x2304xf32>
    %c4 = arith.constant 4 : index
    %c0_10 = arith.constant 0 : index
    %12 = vector.load %arg8[%c4, %c0_10] : memref<9x2304xf32, #tpu.memory_space<vmem>>, vector<1x2304xf32>
    tpu.vector_store %arg8[%c4, %c0_10], %11 {strides = array<i32>} : memref<9x2304xf32, #tpu.memory_space<vmem>>, vector<1x2304xf32>,
    %c2286_i32 = arith.constant 2286 : i32
    %13 = tpu.dynamic_rotate %1 by %c2286_i32 dim 1 : vector<1x2304xf32>, i32 -> vector<1x2304xf32>
    %c5 = arith.constant 5 : index
    %c0_11 = arith.constant 0 : index
    %14 = vector.load %arg8[%c5, %c0_11] : memref<9x2304xf32, #tpu.memory_space<vmem>>, vector<1x2304xf32>
    tpu.vector_store %arg8[%c5, %c0_11], %13 {strides = array<i32>} : memref<9x2304xf32, #tpu.memory_space<vmem>>, vector<1x2304xf32>,
    %c2272_i32 = arith.constant 2272 : i32
    %15 = tpu.dynamic_rotate %1 by %c2272_i32 dim 1 : vector<1x2304xf32>, i32 -> vector<1x2304xf32>
    %c6 = arith.constant 6 : index
    %c0_12 = arith.constant 0 : index
    %16 = vector.load %arg8[%c6, %c0_12] : memref<9x2304xf32, #tpu.memory_space<vmem>>, vector<1x2304xf32>
    tpu.vector_store %arg8[%c6, %c0_12], %15 {strides = array<i32>} : memref<9x2304xf32, #tpu.memory_space<vmem>>, vector<1x2304xf32>,
    %c2271_i32 = arith.constant 2271 : i32
    %17 = tpu.dynamic_rotate %1 by %c2271_i32 dim 1 : vector<1x2304xf32>, i32 -> vector<1x2304xf32>
    %c7 = arith.constant 7 : index
    %c0_13 = arith.constant 0 : index
    %18 = vector.load %arg8[%c7, %c0_13] : memref<9x2304xf32, #tpu.memory_space<vmem>>, vector<1x2304xf32>
    tpu.vector_store %arg8[%c7, %c0_13], %17 {strides = array<i32>} : memref<9x2304xf32, #tpu.memory_space<vmem>>, vector<1x2304xf32>,
    %c2270_i32 = arith.constant 2270 : i32
    %19 = tpu.dynamic_rotate %1 by %c2270_i32 dim 1 : vector<1x2304xf32>, i32 -> vector<1x2304xf32>
    %c8 = arith.constant 8 : index
    %c0_14 = arith.constant 0 : index
    %20 = vector.load %arg8[%c8, %c0_14] : memref<9x2304xf32, #tpu.memory_space<vmem>>, vector<1x2304xf32>
    tpu.vector_store %arg8[%c8, %c0_14], %19 {strides = array<i32>} : memref<9x2304xf32, #tpu.memory_space<vmem>>, vector<1x2304xf32>,
    %c0_15 = arith.constant 0 : index
    %c0_16 = arith.constant 0 : index
    %21 = vector.load %arg3[%c0_15, %c0_16] : memref<32x9xf32, #tpu.memory_space<vmem>>, vector<32x9xf32>
    %c0_17 = arith.constant 0 : index
    %c0_18 = arith.constant 0 : index
    %22 = vector.load %arg8[%c0_17, %c0_18] : memref<9x2304xf32, #tpu.memory_space<vmem>>, vector<9x2304xf32>
    %cst = arith.constant dense<0.000000e+00> : vector<32x2304xf32>
    %23 = tpu.matmul %21, %22, %cst {dimension_numbers = #tpu.dot_dimension_numbers<[1], [0], [0], [1], [0, 0, 1, 1], [], []>} : vector<32x9xf32>, vector<9x2304xf32>, vector<32x2304xf32> -> vector<32x2304xf32>
    %c0_19 = arith.constant 0 : index
    %c0_20 = arith.constant 0 : index
    %24 = vector.load %arg4[%c0_19, %c0_20] : memref<32x1xf32, #tpu.memory_space<vmem>>, vector<32x1xf32>
    %25 = vector.broadcast %24 : vector<32x1xf32> to vector<32x2304xf32>
    %26 = arith.addf %23, %25 : vector<32x2304xf32>
    %cst_21 = arith.constant dense<0xFF800000> : vector<2304xf32>
    %27 = vector.multi_reduction <maximumf>, %26, %cst_21 [0] : vector<32x2304xf32> to vector<2304xf32>
    %28 = vector.shape_cast %27 : vector<2304xf32> to vector<1x2304xf32>
    %29 = vector.broadcast %28 : vector<1x2304xf32> to vector<32x2304xf32>
    %30 = arith.subf %26, %29 : vector<32x2304xf32>
    %31 = math.exp %30 : vector<32x2304xf32>
    %cst_22 = arith.constant dense<0.000000e+00> : vector<2304xf32>
    %32 = vector.multi_reduction <add>, %31, %cst_22 [0] : vector<32x2304xf32> to vector<2304xf32>
    %33 = vector.shape_cast %32 : vector<2304xf32> to vector<1x2304xf32>
    %34 = tpu.reciprocal %33 : vector<1x2304xf32> -> vector<1x2304xf32>
    %35 = vector.broadcast %34 : vector<1x2304xf32> to vector<32x2304xf32>
    %36 = arith.mulf %31, %35 : vector<32x2304xf32>
    %c0_23 = arith.constant 0 : index
    %c0_24 = arith.constant 0 : index
    %37 = vector.load %arg5[%c0_23, %c0_24] : memref<9x32xf32, #tpu.memory_space<vmem>>, vector<9x32xf32>
    %cst_25 = arith.constant dense<0.000000e+00> : vector<9x2304xf32>
    %38 = tpu.matmul %37, %36, %cst_25 {dimension_numbers = #tpu.dot_dimension_numbers<[1], [0], [0], [1], [0, 0, 1, 1], [], []>} : vector<9x32xf32>, vector<32x2304xf32>, vector<9x2304xf32> -> vector<9x2304xf32>
    %39 = vector.broadcast %3 : vector<1x2304xf32> to vector<9x2304xf32>
    %40 = arith.mulf %38, %39 : vector<9x2304xf32>
    %cst_26 = arith.constant 0.000000e+00 : f32
    %41 = vector.broadcast %cst_26 : f32 to vector<1x2304xf32>
    %42 = vector.extract_strided_slice %40 {offsets = [0, 0], sizes = [1, 2304], strides = [1, 1]} : vector<9x2304xf32> to vector<1x2304xf32>
    %43 = arith.addf %41, %42 : vector<1x2304xf32>
    %44 = vector.extract_strided_slice %40 {offsets = [1, 0], sizes = [1, 2304], strides = [1, 1]} : vector<9x2304xf32> to vector<1x2304xf32>
    %c1_i32 = arith.constant 1 : i32
    %45 = tpu.dynamic_rotate %44 by %c1_i32 dim 1 : vector<1x2304xf32>, i32 -> vector<1x2304xf32>
    %46 = arith.addf %43, %45 : vector<1x2304xf32>
    %47 = vector.extract_strided_slice %40 {offsets = [2, 0], sizes = [1, 2304], strides = [1, 1]} : vector<9x2304xf32> to vector<1x2304xf32>
    %c2_i32 = arith.constant 2 : i32
    %48 = tpu.dynamic_rotate %47 by %c2_i32 dim 1 : vector<1x2304xf32>, i32 -> vector<1x2304xf32>
    %49 = arith.addf %46, %48 : vector<1x2304xf32>
    %50 = vector.extract_strided_slice %40 {offsets = [3, 0], sizes = [1, 2304], strides = [1, 1]} : vector<9x2304xf32> to vector<1x2304xf32>
    %c16_i32 = arith.constant 16 : i32
    %51 = tpu.dynamic_rotate %50 by %c16_i32 dim 1 : vector<1x2304xf32>, i32 -> vector<1x2304xf32>
    %52 = arith.addf %49, %51 : vector<1x2304xf32>
    %53 = vector.extract_strided_slice %40 {offsets = [4, 0], sizes = [1, 2304], strides = [1, 1]} : vector<9x2304xf32> to vector<1x2304xf32>
    %c17_i32 = arith.constant 17 : i32
    %54 = tpu.dynamic_rotate %53 by %c17_i32 dim 1 : vector<1x2304xf32>, i32 -> vector<1x2304xf32>
    %55 = arith.addf %52, %54 : vector<1x2304xf32>
    %56 = vector.extract_strided_slice %40 {offsets = [5, 0], sizes = [1, 2304], strides = [1, 1]} : vector<9x2304xf32> to vector<1x2304xf32>
    %c18_i32 = arith.constant 18 : i32
    %57 = tpu.dynamic_rotate %56 by %c18_i32 dim 1 : vector<1x2304xf32>, i32 -> vector<1x2304xf32>
    %58 = arith.addf %55, %57 : vector<1x2304xf32>
    %59 = vector.extract_strided_slice %40 {offsets = [6, 0], sizes = [1, 2304], strides = [1, 1]} : vector<9x2304xf32> to vector<1x2304xf32>
    %c32_i32 = arith.constant 32 : i32
    %60 = tpu.dynamic_rotate %59 by %c32_i32 dim 1 : vector<1x2304xf32>, i32 -> vector<1x2304xf32>
    %61 = arith.addf %58, %60 : vector<1x2304xf32>
    %62 = vector.extract_strided_slice %40 {offsets = [7, 0], sizes = [1, 2304], strides = [1, 1]} : vector<9x2304xf32> to vector<1x2304xf32>
    %c33_i32 = arith.constant 33 : i32
    %63 = tpu.dynamic_rotate %62 by %c33_i32 dim 1 : vector<1x2304xf32>, i32 -> vector<1x2304xf32>
    %64 = arith.addf %61, %63 : vector<1x2304xf32>
    %65 = vector.extract_strided_slice %40 {offsets = [8, 0], sizes = [1, 2304], strides = [1, 1]} : vector<9x2304xf32> to vector<1x2304xf32>
    %c34_i32 = arith.constant 34 : i32
    %66 = tpu.dynamic_rotate %65 by %c34_i32 dim 1 : vector<1x2304xf32>, i32 -> vector<1x2304xf32>
    %67 = arith.addf %64, %66 : vector<1x2304xf32>
    %c0_27 = arith.constant 0 : index
    %c0_28 = arith.constant 0 : index
    %68 = vector.load %arg6[%c0_27, %c0_28] : memref<1x1xf32, #tpu.memory_space<vmem>>, vector<1x1xf32>
    %69 = vector.broadcast %68 : vector<1x1xf32> to vector<1x2304xf32>
    %70 = arith.addf %67, %69 : vector<1x2304xf32>
    %cst_29 = arith.constant 0.000000e+00 : f32
    %71 = vector.broadcast %cst_29 : f32 to vector<1x2304xf32>
    %72 = arith.subf %71, %70 : vector<1x2304xf32>
    %73 = math.exp %72 : vector<1x2304xf32>
    %cst_30 = arith.constant 1.000000e+00 : f32
    %74 = vector.broadcast %cst_30 : f32 to vector<1x2304xf32>
    %75 = arith.addf %74, %73 : vector<1x2304xf32>
    %76 = tpu.reciprocal %75 : vector<1x2304xf32> -> vector<1x2304xf32>
    %c0_31 = arith.constant 0 : index
    %c0_32 = arith.constant 0 : index
    %c0_33 = arith.constant 0 : index
    %77 = vector.load %arg7[%c0_31, %c0_32, %c0_33] : memref<1x1x2304xf32, #tpu.memory_space<vmem>>, vector<1x1x2304xf32>
    %78 = vector.shape_cast %77 : vector<1x1x2304xf32> to vector<1x2304xf32>
    %79 = vector.shape_cast %76 : vector<1x2304xf32> to vector<1x1x2304xf32>
    tpu.vector_store %arg7[%c0_31, %c0_32, %c0_33], %79 {strides = array<i32>} : memref<1x1x2304xf32, #tpu.memory_space<vmem>>, vector<1x1x2304xf32>,
    return
  }
  func.func @transform_0(%arg0: i32) -> (i32, i32, i32) {
    %c0_i32 = arith.constant 0 : i32
    %c0_i32_0 = arith.constant 0 : i32
    %c0_i32_1 = arith.constant 0 : i32
    return %arg0, %c0_i32, %c0_i32_0 : i32, i32, i32
  }
  func.func @transform_1(%arg0: i32) -> (i32, i32, i32) {
    %c0_i32 = arith.constant 0 : i32
    %c0_i32_0 = arith.constant 0 : i32
    %c0_i32_1 = arith.constant 0 : i32
    %c0_i32_2 = arith.constant 0 : i32
    return %c0_i32, %c0_i32_0, %c0_i32_1 : i32, i32, i32
  }
  func.func @transform_2(%arg0: i32) -> (i32, i32) {
    %c0_i32 = arith.constant 0 : i32
    %c0_i32_0 = arith.constant 0 : i32
    %c0_i32_1 = arith.constant 0 : i32
    return %c0_i32, %c0_i32_0 : i32, i32
  }
  func.func @transform_3(%arg0: i32) -> (i32, i32) {
    %c0_i32 = arith.constant 0 : i32
    %c0_i32_0 = arith.constant 0 : i32
    %c0_i32_1 = arith.constant 0 : i32
    return %c0_i32, %c0_i32_0 : i32, i32
  }
  func.func @transform_4(%arg0: i32) -> (i32, i32) {
    %c0_i32 = arith.constant 0 : i32
    %c0_i32_0 = arith.constant 0 : i32
    %c0_i32_1 = arith.constant 0 : i32
    return %c0_i32, %c0_i32_0 : i32, i32
  }
  func.func @transform_5(%arg0: i32) -> (i32, i32) {
    %c0_i32 = arith.constant 0 : i32
    %c0_i32_0 = arith.constant 0 : i32
    %c0_i32_1 = arith.constant 0 : i32
    return %c0_i32, %c0_i32_0 : i32, i32
  }
  func.func @transform_6(%arg0: i32) -> (i32, i32, i32) {
    %c0_i32 = arith.constant 0 : i32
    %c0_i32_0 = arith.constant 0 : i32
    %c0_i32_1 = arith.constant 0 : i32
    return %arg0, %c0_i32, %c0_i32_0 : i32, i32, i32
  }
}

</mosaic_0001>

<bundles_post_ra>
// kernel: edge_kernel_2d.1
= control target key start
LH: loop header
LB: loop body
LE: loop exit
PB: predicated region body
PF: predicated region fallthrough
CT: control target
= control target key end

     0   :  { %s6078_s23 = smov 0   ;;  %s9163_s0 = inlined_call_operand.vmem [shape: f32[2,1,2304], index: 0, kind: input, shape index: {}]   ;;  %s9164_s1 = inlined_call_operand.vmem [shape: f32[1,1,2304], index: 1, kind: input, shape index: {}]   ;;  %s9165_s2 = inlined_call_operand.vmem [shape: f32[32,9], index: 2, kind: input, shape index: {}]   ;;  %s9166_s3 = inlined_call_operand.vmem [shape: f32[32,1], index: 3, kind: input, shape index: {}]   ;;  %s9167_s4 = inlined_call_operand.vmem [shape: f32[9,32], index: 4, kind: input, shape index: {}]   ;;  %s9168_s5 = inlined_call_operand.<no memory space> [shape: f32[1,1], index: 5, kind: input, shape index: {}]   ;;  %s9169_s6 = inlined_call_operand.vmem [shape: f32[2,1,2304], index: 6, kind: output, shape index: {}]  }
   0x1   :  { %v11_v0 = vstv %s9168_s5 }
   0x2   :  { %12 = vst [vmem:[#allocation3] sm:$0x1] %v11_v0 }
   0x3 LB: > { %s5520_s24 = sadd.s32 4294967295, %s6018_s23   ;;  %p5524_p0 = scmp.ge.s32.totalorder %s6018_s23, 1  ;;  %s6018_s23 = sphi %s6078_s23, %s18_s23  }
   0x4   : > { %p213_p1 = scmp.lt.s32.totalorder %s6018_s23, 3 }
   0x6   : > { %p214_p2 = pnand %p5524_p0, %p213_p1 }
   0x8   : > { %217 = sbr.rel (%p214_p2) target bundleno = 1275 (0x4fb), region = 44 }
   0xf   : > { %p241_p3 = scmp.lt.s32.totalorder %s5520_s24, 1  ;;  %v260_v1 = vlaneseq  ;;  %s6020_s28 = smov 127   ;;  %v6027_v27 = vmov 1966171168   ;;  %vm2023_vm9 = vcmask 1040384   ;;  %vm6031_vm10 = vmmov 1  }
  0x10   : > { %s6021_s29 = smov 126   ;;  %s6022_s30 = smov 112   ;;  %v440_v28 = vunpack.c.l.s4 %v6027_v27  ;;  %vm6745_vm11 = vmpackc.low %vm2023_vm9, %vm6031_vm10  ;;  %vm2010_vm12 = vcmask 72704   ;;  %vm3511_vm13 = vcmask 261120  }
  0x11   : > { %s9311_s24 = smov (!%p241_p3, %s5520_s24), 1  ;;  %v6089_v2 = vshrl.u32 %v260_v1, 7  ;;  %s6023_s7 = smov 111   ;;  %v6280_v24 = vand.u32 127, %v260_v1  ;;  %vm6710_vm8 = vcmp.lt.s32.totalorder %v260_v1, 256 }
  0x12   : > { %s5727_s5 = smul.u32 18, %s9311_s24  ;;  %s6024_s8 = smov 110   ;;  %v441_v32 = vunpack.c.0.s8 %v440_v28 }
  0x13   : > { %v6093_v3 = vsub.s32 2, %v6089_v2  ;;  %v6096_v4 = vsub.s32 0, %v6089_v2  ;;  %v6106_v5 = vsub.s32 3, %v6089_v2  ;;  %v6109_v6 = vsub.s32 1, %v6089_v2  ;;  %s6025_s9 = smov 96   ;;  %s6026_s10 = smov 95  }
  0x14   : > { %s6103_s27 = scalar_lea.vmem %s9163_s0, %s5727_s5  ;;  %v6134_v13 = vsub.s32 5, %v6089_v2  ;;  %v6137_v14 = vsub.s32 4, %v6089_v2  ;;  %v6150_v17 = vsub.s32 7, %v6089_v2  ;;  %v6153_v18 = vsub.s32 6, %v6089_v2  ;;  %9231 = vst [vmem:[#allocation12_spill] sm:$0xff] %v6280_v24  ;;  %s6028_s11 = smov 94  }
  0x15   : > { %9223 = vst [vmem:[#allocation4_spill] sm:$0xff] %v6093_v3  ;;  %9224 = vst [vmem:[#allocation5_spill] sm:$0xff] %v6096_v4  ;;  %v249_v7 = vld [vmem:[%s6103_s27] sm:$0xff]  ;;  %v6113_v8 = vld [vmem:[%s6103_s27 + $0x8] sm:$0xff]  ;;  %vm398_vm0 = vcmp.lt.s32.totalorder %v6280_v24, 127  ;;  %v6303_v40 = vsub.s32 %v441_v32, %v6089_v2  ;;  %vm596_vm1 = vcmp.lt.s32.totalorder %v6280_v24, 126 }
  0x16   : > { %9225 = vst [vmem:[#allocation6_spill] sm:$0xff] %v6106_v5  ;;  %9226 = vst [vmem:[#allocation7_spill] sm:$0xff] %v6109_v6  ;;  %v6116_v9 = vrot.slane %v249_v7, %v6093_v3  ;;  %v6119_v10 = vrot.slane %v249_v7, %v6096_v4  ;;  %v6128_v11 = vrot.slane %v249_v7, %v6106_v5  ;;  %vm794_vm2 = vcmp.lt.s32.totalorder %v6280_v24, 112  ;;  %s6032_s16 = smov 1   ;;  %s6033_s17 = smov 2  }
  0x17   : > { %255 = vst [vmem:[#allocation2] ss:$8 sm:$0xf] %v249_v7  ;;  %256 = vst [vmem:[#allocation2] ss:$8 sm:$0xf0] %v249_v7  ;;  %v6131_v12 = vrot.slane %v249_v7, %v6109_v6  ;;  %v6144_v15 = vrot.slane %v249_v7, %v6134_v13  ;;  %v6147_v16 = vrot.slane %v249_v7, %v6137_v14 }
  0x18   : > { %258 = vst [vmem:[#allocation2 + $0x40] ss:$8 sm:$0xf] %v6113_v8  ;;  %259 = vst [vmem:[#allocation2 + $0x40] ss:$8 sm:$0xf0] %v6113_v8  ;;  %364 = vrot.lane.b32.xlu1 %v6116_v9, %s6020_s28  ;;  %360 = vrot.lane.b32.xlu0 %v6119_v10, %s6020_s28  ;;  %v6160_v19 = vrot.slane %v249_v7, %v6150_v17  ;;  %v6163_v20 = vrot.slane %v249_v7, %v6153_v18 }
  0x19   : > { %9227 = vst [vmem:[#allocation8_spill] sm:$0xff] %v6134_v13  ;;  %9228 = vst [vmem:[#allocation9_spill] sm:$0xff] %v6137_v14  ;;  %v6171_v21 = vrot.slane %v6113_v8, %v6096_v4  ;;  %v6345_v0 = vrot.slane %v6113_v8, %v6093_v3  ;;  %v6349_v2 = vrot.slane %v6113_v8, %v6109_v6  ;;  %vm992_vm3 = vcmp.lt.s32.totalorder %v6280_v24, 111  ;;  %s6034_s18 = smov 16   ;;  %s6035_s19 = smov 17  }
  0x1a   : > { %9229 = vst [vmem:[#allocation10_spill] sm:$0xff] %v6150_v17  ;;  %9230 = vst [vmem:[#allocation11_spill] sm:$0xff] %v6153_v18  ;;  %vm1190_vm4 = vcmp.lt.s32.totalorder %v6280_v24, 110  ;;  %vm1388_vm5 = vcmp.lt.s32.totalorder %v6280_v24, 96  ;;  %vm1586_vm6 = vcmp.lt.s32.totalorder %v6280_v24, 95  ;;  %vm1784_vm7 = vcmp.lt.s32.totalorder %v6280_v24, 94 }
  0x1b   : > { %9232 = vst [vmem:[#allocation13_spill] sm:$0xff] %v6303_v40  ;;  %s6036_s20 = smov 18   ;;  %s6037_s21 = smov 32  }
  0x1c   : > { %366 = vrot.lane.b32.xlu1 %v6128_v11, %s6020_s28  ;;  %362 = vrot.lane.b32.xlu0 %v6131_v12, %s6020_s28  ;;  %s6038_s22 = smov 33   ;;  %s6039_s25 = smov 34  }
  0x20   : > { %370 = vrot.lane.b32.xlu1 %v6144_v15, %s6020_s28  ;;  %368 = vrot.lane.b32.xlu0 %v6147_v16, %s6020_s28 }
  0x24   : > { %374 = vrot.lane.b32.xlu1 %v6160_v19, %s6020_s28  ;;  %372 = vrot.lane.b32.xlu0 %v6163_v20, %s6020_s28 }
  0x28   : > { %560 = vrot.lane.b32.xlu1 %v6119_v10, %s6021_s29  ;;  %376 = vrot.lane.b32.xlu0 %v6171_v21, %s6020_s28 }
  0x2c   : > { %564 = vrot.lane.b32.xlu1 %v6116_v9, %s6021_s29  ;;  %562 = vrot.lane.b32.xlu0 %v6131_v12, %s6021_s29 }
  0x30   : > { %568 = vrot.lane.b32.xlu1 %v6147_v16, %s6021_s29  ;;  %566 = vrot.lane.b32.xlu0 %v6128_v11, %s6021_s29 }
  0x34   : > { %572 = vrot.lane.b32.xlu1 %v6163_v20, %s6021_s29  ;;  %570 = vrot.lane.b32.xlu0 %v6144_v15, %s6021_s29 }
  0x38   : > { %576 = vrot.lane.b32.xlu1 %v6171_v21, %s6021_s29  ;;  %574 = vrot.lane.b32.xlu0 %v6160_v19, %s6021_s29 }
  0x3c   : > { %760 = vrot.lane.b32.xlu1 %v6131_v12, %s6022_s30  ;;  %758 = vrot.lane.b32.xlu0 %v6119_v10, %s6022_s30 }
  0x40   : > { %764 = vrot.lane.b32.xlu1 %v6128_v11, %s6022_s30  ;;  %762 = vrot.lane.b32.xlu0 %v6116_v9, %s6022_s30 }
  0x44   : > { %768 = vrot.lane.b32.xlu1 %v6144_v15, %s6022_s30  ;;  %766 = vrot.lane.b32.xlu0 %v6147_v16, %s6022_s30 }
  0x48   : > { %772 = vrot.lane.b32.xlu1 %v6160_v19, %s6022_s30  ;;  %770 = vrot.lane.b32.xlu0 %v6163_v20, %s6022_s30 }
  0x4c   : > { %956 = vrot.lane.b32.xlu1 %v6119_v10, %s6023_s7  ;;  %774 = vrot.lane.b32.xlu0 %v6171_v21, %s6022_s30 }
  0x50   : > { %960 = vrot.lane.b32.xlu1 %v6116_v9, %s6023_s7  ;;  %958 = vrot.lane.b32.xlu0 %v6131_v12, %s6023_s7 }
  0x54   : > { %964 = vrot.lane.b32.xlu1 %v6147_v16, %s6023_s7  ;;  %962 = vrot.lane.b32.xlu0 %v6128_v11, %s6023_s7 }
  0x58   : > { %968 = vrot.lane.b32.xlu1 %v6163_v20, %s6023_s7  ;;  %966 = vrot.lane.b32.xlu0 %v6144_v15, %s6023_s7 }
  0x5c   : > { %972 = vrot.lane.b32.xlu1 %v6171_v21, %s6023_s7  ;;  %970 = vrot.lane.b32.xlu0 %v6160_v19, %s6023_s7 }
  0x60   : > { %1156 = vrot.lane.b32.xlu1 %v6131_v12, %s6024_s8  ;;  %1154 = vrot.lane.b32.xlu0 %v6119_v10, %s6024_s8 }
  0x64   : > { %1160 = vrot.lane.b32.xlu1 %v6128_v11, %s6024_s8  ;;  %1158 = vrot.lane.b32.xlu0 %v6116_v9, %s6024_s8 }
  0x68   : > { %1164 = vrot.lane.b32.xlu1 %v6144_v15, %s6024_s8  ;;  %1162 = vrot.lane.b32.xlu0 %v6147_v16, %s6024_s8 }
  0x6c   : > { %1168 = vrot.lane.b32.xlu1 %v6160_v19, %s6024_s8  ;;  %1166 = vrot.lane.b32.xlu0 %v6163_v20, %s6024_s8 }
  0x70   : > { %1352 = vrot.lane.b32.xlu1 %v6119_v10, %s6025_s9  ;;  %1170 = vrot.lane.b32.xlu0 %v6171_v21, %s6024_s8 }
  0x74   : > { %1356 = vrot.lane.b32.xlu1 %v6116_v9, %s6025_s9  ;;  %1354 = vrot.lane.b32.xlu0 %v6131_v12, %s6025_s9 }
  0x78   : > { %1360 = vrot.lane.b32.xlu1 %v6147_v16, %s6025_s9  ;;  %1358 = vrot.lane.b32.xlu0 %v6128_v11, %s6025_s9 }
  0x7c   : > { %1364 = vrot.lane.b32.xlu1 %v6163_v20, %s6025_s9  ;;  %1362 = vrot.lane.b32.xlu0 %v6144_v15, %s6025_s9 }
  0x80   : > { %1368 = vrot.lane.b32.xlu1 %v6171_v21, %s6025_s9  ;;  %1366 = vrot.lane.b32.xlu0 %v6160_v19, %s6025_s9 }
  0x84   : > { %1552 = vrot.lane.b32.xlu1 %v6131_v12, %s6026_s10  ;;  %1550 = vrot.lane.b32.xlu0 %v6119_v10, %s6026_s10 }
  0x88   : > { %1556 = vrot.lane.b32.xlu1 %v6128_v11, %s6026_s10  ;;  %1554 = vrot.lane.b32.xlu0 %v6116_v9, %s6026_s10 }
  0x8a   : > { %v365_v22 = vpop.permute.xlu1 %364  ;;  %v6273_v23 = vpop.permute.xlu0 %360 }
  0x8c   : > { %1560 = vrot.lane.b32.xlu1 %v6144_v15, %s6026_s10  ;;  %1558 = vrot.lane.b32.xlu0 %v6147_v16, %s6026_s10 }
  0x8e   : > { %v367_v25 = vpop.permute.xlu1 %366  ;;  %v363_v26 = vpop.permute.xlu0 %362 }
  0x8f   : > { %v413_v33 = vsel %vm398_vm0, %v365_v22, %v367_v25  ;;  %v414_v34 = vsel %vm398_vm0, %v363_v26, %v365_v22  ;;  %v415_v35 = vsel %vm398_vm0, %v6273_v23, %v363_v26 }
  0x90   : > { %1564 = vrot.lane.b32.xlu1 %v6160_v19, %s6026_s10  ;;  %1562 = vrot.lane.b32.xlu0 %v6163_v20, %s6026_s10  ;;  %v435_v41 = vcombine.low %v415_v35, %v414_v34  ;;  %v6394_v34 = vld [vmem:[%s6103_s27 + $0x10] sm:$0x3] }
  0x91   : > { %265 = vst.msk [vmem:[#allocation2 + $0x80] ss:$8 sm:$0x3] %vm6710_vm8, %v6394_v34  ;;  %v6727_v1 = vrot.slane %v6394_v34, %v6109_v6 }
  0x92   : > { %v371_v29 = vpop.permute.xlu1 %370  ;;  %v369_v30 = vpop.permute.xlu0 %368  ;;  %v445_v49 = vrot.slane %v435_v41, %v6303_v40 }
  0x93   : > { %v412_v31 = vsel %vm398_vm0, %v367_v25, %v369_v30  ;;  %v411_v42 = vsel %vm398_vm0, %v369_v30, %v371_v29  ;;  %v6382_v30 = vrot.slane %v6113_v8, %v6153_v18 }
  0x94   : > { %1748 = vrot.lane.b32.xlu1 %v6119_v10, %s6028_s11  ;;  %1566 = vrot.lane.b32.xlu0 %v6171_v21, %s6026_s10  ;;  %v436_v36 = vcombine.low %v413_v33, %v412_v31  ;;  %v6391_v33 = vrot.slane %v6113_v8, %v6134_v13 }
  0x96   : > { %v375_v37 = vpop.permute.xlu1 %374  ;;  %v373_v38 = vpop.permute.xlu0 %372  ;;  %v452_v43 = vrot.slane %v436_v36, %v6303_v40 }
  0x97   : > { %v410_v39 = vsel %vm398_vm0, %v371_v29, %v373_v38  ;;  %v409_v47 = vsel %vm398_vm0, %v373_v38, %v375_v37 }
  0x98   : > { %1752 = vrot.lane.b32.xlu1 %v6116_v9, %s6028_s11  ;;  %1750 = vrot.lane.b32.xlu0 %v6131_v12, %s6028_s11  ;;  %v437_v44 = vcombine.low %v411_v42, %v410_v39  ;;  %v467_v51 = vcombine.low %v445_v49, %v452_v43  ;;  %v6406_v42 = vrot.slane %v6394_v34, %v6096_v4 }
  0x99   : > { %v6410_v43 = vrot.slane %v6113_v8, %v6150_v17 }
  0x9a   : > { %v6312_v45 = vpop.permute.xlu1 %560  ;;  %v6314_v46 = vpop.permute.xlu0 %376  ;;  %v459_v52 = vrot.slane %v437_v44, %v6303_v40  ;;  %v475_v57 = vrot.slane %v467_v51, %v6303_v40  ;;  %v9170_v44 = vmov 0.0  }
  0x9b   : > { %v408_v48 = vsel %vm398_vm0, %v375_v37, %v6314_v46  ;;  %2142 = vmatprep.mubr.f32.mxu0 %v9170_v44  ;;  %2160 = vmatprep.mubr.f32.mxu1 %v9170_v44 }
  0x9c   : > { %v438_v50 = vcombine.low %v409_v47, %v408_v48  ;;  %1756 = vrot.lane.b32.xlu1 %v6147_v16, %s6028_s11  ;;  %1754 = vrot.lane.b32.xlu0 %v6128_v11, %s6028_s11 }
  0x9e   : > { %v466_v53 = vrot.slane %v438_v50, %v6303_v40  ;;  %v565_v54 = vpop.permute.xlu1 %564  ;;  %v563_v55 = vpop.permute.xlu0 %562 }
  0x9f   : > { %v612_v7 = vsel %vm596_vm1, %v563_v55, %v565_v54  ;;  %v613_v9 = vsel %vm596_vm1, %v6312_v45, %v563_v55 }
  0xa0   : > { %v468_v56 = vcombine.low %v459_v52, %v466_v53  ;;  %1760 = vrot.lane.b32.xlu1 %v6163_v20, %s6028_s11  ;;  %1758 = vrot.lane.b32.xlu0 %v6144_v15, %s6028_s11  ;;  %v6366_v20 = vrot.slane %v6113_v8, %v6137_v14 }
  0xa2   : > { %v482_v58 = vrot.slane %v468_v56, %v6303_v40  ;;  %v569_v59 = vpop.permute.xlu1 %568  ;;  %v567_v60 = vpop.permute.xlu0 %566 }
  0xa3   : > { %v610_v61 = vsel %vm596_vm1, %v567_v60, %v569_v59  ;;  %v611_v62 = vsel %vm596_vm1, %v565_v54, %v567_v60 }
  0xa4   : > { %v483_v63 = vcombine.low %v475_v57, %v482_v58  ;;  %1764 = vrot.lane.b32.xlu1 %v6171_v21, %s6028_s11  ;;  %1762 = vrot.lane.b32.xlu0 %v6160_v19, %s6028_s11  ;;  %v634_v10 = vcombine.low %v611_v62, %v610_v61  ;;  %v633_v19 = vcombine.low %v613_v9, %v612_v7 }
  0xa5   : > { %v6370_v21 = vrot.slane %v6113_v8, %v6106_v5 }
  0xa6   : > { %552 = vst [vmem:[#allocation2 + $0x1] ss:$8 sm:$0xf] %v483_v63  ;;  %553 = vst [vmem:[#allocation2 + $0x1] ss:$8 sm:$0xf0] %v483_v63  ;;  %v573_v11 = vpop.permute.xlu1 %572  ;;  %v571_v12 = vpop.permute.xlu0 %570  ;;  %v650_v22 = vrot.slane %v634_v10, %v6303_v40  ;;  %v643_v31 = vrot.slane %v633_v19, %v6303_v40 }
  0xa7   : > { %v608_v15 = vsel %vm596_vm1, %v571_v12, %v573_v11  ;;  %v609_v16 = vsel %vm596_vm1, %v569_v59, %v571_v12 }
  0xa8   : > { %380 = vrot.lane.b32.xlu1 %v6345_v0, %s6020_s28  ;;  %378 = vrot.lane.b32.xlu0 %v6349_v2, %s6020_s28  ;;  %v635_v25 = vcombine.low %v609_v16, %v608_v15  ;;  %v665_v35 = vcombine.low %v643_v31, %v650_v22 }
  0xaa   : > { %v6373_v26 = vpop.permute.xlu1 %576  ;;  %v575_v27 = vpop.permute.xlu0 %574  ;;  %v657_v36 = vrot.slane %v635_v25, %v6303_v40  ;;  %v673_v47 = vrot.slane %v665_v35, %v6303_v40 }
  0xab   : > { %v606_v28 = vsel %vm596_vm1, %v575_v27, %v6373_v26  ;;  %v607_v29 = vsel %vm596_vm1, %v573_v11, %v575_v27 }
  0xac   : > { %v636_v32 = vcombine.low %v607_v29, %v606_v28  ;;  %384 = vrot.lane.b32.xlu1 %v6366_v20, %s6020_s28  ;;  %382 = vrot.lane.b32.xlu0 %v6370_v21, %s6020_s28 }
  0xae   : > { %v664_v37 = vrot.slane %v636_v32, %v6303_v40  ;;  %v761_v38 = vpop.permute.xlu1 %760  ;;  %v6398_v39 = vpop.permute.xlu0 %758 }
  0xaf   : > { %v811_v59 = vsel %vm794_vm2, %v6398_v39, %v761_v38 }
  0xb0   : > { %v666_v41 = vcombine.low %v657_v36, %v664_v37  ;;  %388 = vrot.lane.b32.xlu1 %v6382_v30, %s6020_s28  ;;  %386 = vrot.lane.b32.xlu0 %v6391_v33, %s6020_s28 }
  0xb2   : > { %v680_v48 = vrot.slane %v666_v41, %v6303_v40  ;;  %v765_v49 = vpop.permute.xlu1 %764  ;;  %v763_v50 = vpop.permute.xlu0 %762 }
  0xb3   : > { %v809_v54 = vsel %vm794_vm2, %v763_v50, %v765_v49  ;;  %v810_v55 = vsel %vm794_vm2, %v761_v38, %v763_v50 }
  0xb4   : > { %v681_v51 = vcombine.low %v673_v47, %v680_v48  ;;  %392 = vrot.lane.b32.xlu1 %v6406_v42, %s6020_s28  ;;  %390 = vrot.lane.b32.xlu0 %v6410_v43, %s6020_s28  ;;  %v831_v61 = vcombine.low %v811_v59, %v810_v55 }
  0xb6   : > { %750 = vst [vmem:[#allocation2 + $0x2] ss:$8 sm:$0xf] %v681_v51  ;;  %751 = vst [vmem:[#allocation2 + $0x2] ss:$8 sm:$0xf0] %v681_v51  ;;  %v769_v8 = vpop.permute.xlu1 %768  ;;  %v767_v52 = vpop.permute.xlu0 %766  ;;  %v841_v15 = vrot.slane %v831_v61, %v6303_v40 }
  0xb7   : > { %v808_v53 = vsel %vm794_vm2, %v765_v49, %v767_v52  ;;  %v807_v62 = vsel %vm794_vm2, %v767_v52, %v769_v8 }
  0xb8   : > { %580 = vrot.lane.b32.xlu1 %v6345_v0, %s6021_s29  ;;  %578 = vrot.lane.b32.xlu0 %v6349_v2, %s6021_s29  ;;  %v832_v56 = vcombine.low %v809_v54, %v808_v53 }
  0xba   : > { %v773_v57 = vpop.permute.xlu1 %772  ;;  %v771_v58 = vpop.permute.xlu0 %770  ;;  %v848_v63 = vrot.slane %v832_v56, %v6303_v40 }
  0xbb   : > { %v806_v60 = vsel %vm794_vm2, %v769_v8, %v771_v58  ;;  %v805_v11 = vsel %vm794_vm2, %v771_v58, %v773_v57 }
  0xbc   : > { %584 = vrot.lane.b32.xlu1 %v6366_v20, %s6021_s29  ;;  %582 = vrot.lane.b32.xlu0 %v6370_v21, %s6021_s29  ;;  %v833_v7 = vcombine.low %v807_v62, %v806_v60  ;;  %v863_v19 = vcombine.low %v841_v15, %v848_v63 }
  0xbe   : > { %v6443_v9 = vpop.permute.xlu1 %956  ;;  %v6445_v10 = vpop.permute.xlu0 %774  ;;  %v855_v22 = vrot.slane %v833_v7, %v6303_v40  ;;  %v871_v31 = vrot.slane %v863_v19, %v6303_v40 }
  0xbf   : > { %v804_v12 = vsel %vm794_vm2, %v773_v57, %v6445_v10 }
  0xc0   : > { %v834_v16 = vcombine.low %v805_v11, %v804_v12  ;;  %588 = vrot.lane.b32.xlu1 %v6382_v30, %s6021_s29  ;;  %586 = vrot.lane.b32.xlu0 %v6391_v33, %s6021_s29 }
  0xc2   : > { %v862_v25 = vrot.slane %v834_v16, %v6303_v40  ;;  %v961_v27 = vpop.permute.xlu1 %960  ;;  %v959_v28 = vpop.permute.xlu0 %958 }
  0xc3   : > { %v1008_v47 = vsel %vm992_vm3, %v959_v28, %v961_v27  ;;  %v1009_v48 = vsel %vm992_vm3, %v6443_v9, %v959_v28 }
  0xc4   : > { %v864_v29 = vcombine.low %v855_v22, %v862_v25  ;;  %592 = vrot.lane.b32.xlu1 %v6406_v42, %s6021_s29  ;;  %590 = vrot.lane.b32.xlu0 %v6410_v43, %s6021_s29  ;;  %v1029_v53 = vcombine.low %v1009_v48, %v1008_v47 }
  0xc6   : > { %v878_v32 = vrot.slane %v864_v29, %v6303_v40  ;;  %v965_v35 = vpop.permute.xlu1 %964  ;;  %v963_v36 = vpop.permute.xlu0 %962  ;;  %v1039_v60 = vrot.slane %v1029_v53, %v6303_v40 }
  0xc7   : > { %v1006_v37 = vsel %vm992_vm3, %v963_v36, %v965_v35  ;;  %v1007_v38 = vsel %vm992_vm3, %v961_v27, %v963_v36 }
  0xc8   : > { %v879_v41 = vcombine.low %v871_v31, %v878_v32  ;;  %778 = vrot.lane.b32.xlu1 %v6345_v0, %s6022_s30  ;;  %776 = vrot.lane.b32.xlu0 %v6349_v2, %s6022_s30  ;;  %v1030_v49 = vcombine.low %v1007_v38, %v1006_v37 }
  0xca   : > { %948 = vst [vmem:[#allocation2 + $0x3] ss:$8 sm:$0xf] %v879_v41  ;;  %949 = vst [vmem:[#allocation2 + $0x3] ss:$8 sm:$0xf0] %v879_v41  ;;  %v969_v50 = vpop.permute.xlu1 %968  ;;  %v967_v51 = vpop.permute.xlu0 %966  ;;  %v1046_v54 = vrot.slane %v1030_v49, %v6303_v40 }
  0xcb   : > { %v1004_v8 = vsel %vm992_vm3, %v967_v51, %v969_v50  ;;  %v1005_v52 = vsel %vm992_vm3, %v965_v35, %v967_v51 }
  0xcc   : > { %782 = vrot.lane.b32.xlu1 %v6366_v20, %s6022_s30  ;;  %780 = vrot.lane.b32.xlu0 %v6370_v21, %s6022_s30  ;;  %v1031_v55 = vcombine.low %v1005_v52, %v1004_v8  ;;  %v1061_v62 = vcombine.low %v1039_v60, %v1046_v54 }
  0xce   : > { %v6488_v56 = vpop.permute.xlu1 %972  ;;  %v971_v57 = vpop.permute.xlu0 %970  ;;  %v1053_v63 = vrot.slane %v1031_v55, %v6303_v40  ;;  %v1069_v16 = vrot.slane %v1061_v62, %v6303_v40 }
  0xcf   : > { %v1002_v58 = vsel %vm992_vm3, %v971_v57, %v6488_v56  ;;  %v1003_v59 = vsel %vm992_vm3, %v969_v50, %v971_v57 }
  0xd0   : > { %v1032_v61 = vcombine.low %v1003_v59, %v1002_v58  ;;  %786 = vrot.lane.b32.xlu1 %v6382_v30, %s6022_s30  ;;  %784 = vrot.lane.b32.xlu0 %v6391_v33, %s6022_s30 }
  0xd2   : > { %v1060_v7 = vrot.slane %v1032_v61, %v6303_v40  ;;  %v1157_v11 = vpop.permute.xlu1 %1156  ;;  %v6502_v12 = vpop.permute.xlu0 %1154 }
  0xd3   : > { %v1207_v41 = vsel %vm1190_vm4, %v6502_v12, %v1157_v11 }
  0xd4   : > { %v1062_v15 = vcombine.low %v1053_v63, %v1060_v7  ;;  %790 = vrot.lane.b32.xlu1 %v6406_v42, %s6022_s30  ;;  %788 = vrot.lane.b32.xlu0 %v6410_v43, %s6022_s30 }
  0xd6   : > { %v1076_v19 = vrot.slane %v1062_v15, %v6303_v40  ;;  %v1161_v22 = vpop.permute.xlu1 %1160  ;;  %v1159_v25 = vpop.permute.xlu0 %1158 }
  0xd7   : > { %v1205_v32 = vsel %vm1190_vm4, %v1159_v25, %v1161_v22  ;;  %v1206_v35 = vsel %vm1190_vm4, %v1157_v11, %v1159_v25 }
  0xd8   : > { %v1077_v27 = vcombine.low %v1069_v16, %v1076_v19  ;;  %976 = vrot.lane.b32.xlu1 %v6345_v0, %s6023_s7  ;;  %974 = vrot.lane.b32.xlu0 %v6349_v2, %s6023_s7  ;;  %v1227_v48 = vcombine.low %v1207_v41, %v1206_v35 }
  0xda   : > { %1146 = vst [vmem:[#allocation2 + $0x4] ss:$8 sm:$0xf] %v1077_v27  ;;  %1147 = vst [vmem:[#allocation2 + $0x4] ss:$8 sm:$0xf0] %v1077_v27  ;;  %v1165_v28 = vpop.permute.xlu1 %1164  ;;  %v1163_v29 = vpop.permute.xlu0 %1162  ;;  %v1237_v55 = vrot.slane %v1227_v48, %v6303_v40 }
  0xdb   : > { %v1204_v31 = vsel %vm1190_vm4, %v1161_v22, %v1163_v29  ;;  %v1203_v49 = vsel %vm1190_vm4, %v1163_v29, %v1165_v28 }
  0xdc   : > { %980 = vrot.lane.b32.xlu1 %v6366_v20, %s6023_s7  ;;  %978 = vrot.lane.b32.xlu0 %v6370_v21, %s6023_s7  ;;  %v1228_v36 = vcombine.low %v1205_v32, %v1204_v31 }
  0xde   : > { %v1169_v37 = vpop.permute.xlu1 %1168  ;;  %v1167_v38 = vpop.permute.xlu0 %1166  ;;  %v1244_v50 = vrot.slane %v1228_v36, %v6303_v40 }
  0xdf   : > { %v1202_v47 = vsel %vm1190_vm4, %v1165_v28, %v1167_v38  ;;  %v1201_v53 = vsel %vm1190_vm4, %v1167_v38, %v1169_v37 }
  0xe0   : > { %984 = vrot.lane.b32.xlu1 %v6382_v30, %s6023_s7  ;;  %982 = vrot.lane.b32.xlu0 %v6391_v33, %s6023_s7  ;;  %v1229_v51 = vcombine.low %v1203_v49, %v1202_v47  ;;  %v1259_v58 = vcombine.low %v1237_v55, %v1244_v50 }
  0xe2   : > { %v6537_v8 = vpop.permute.xlu1 %1352  ;;  %v6539_v52 = vpop.permute.xlu0 %1170  ;;  %v1251_v59 = vrot.slane %v1229_v51, %v6303_v40  ;;  %v1267_v7 = vrot.slane %v1259_v58, %v6303_v40 }
  0xe3   : > { %v1200_v54 = vsel %vm1190_vm4, %v1169_v37, %v6539_v52 }
  0xe4   : > { %v1230_v57 = vcombine.low %v1201_v53, %v1200_v54  ;;  %988 = vrot.lane.b32.xlu1 %v6406_v42, %s6023_s7  ;;  %986 = vrot.lane.b32.xlu0 %v6410_v43, %s6023_s7 }
  0xe6   : > { %v1258_v60 = vrot.slane %v1230_v57, %v6303_v40  ;;  %v1357_v61 = vpop.permute.xlu1 %1356  ;;  %v1355_v62 = vpop.permute.xlu0 %1354 }
  0xe7   : > { %v1404_v27 = vsel %vm1388_vm5, %v1355_v62, %v1357_v61  ;;  %v1405_v28 = vsel %vm1388_vm5, %v6537_v8, %v1355_v62 }
  0xe8   : > { %v1260_v63 = vcombine.low %v1251_v59, %v1258_v60  ;;  %1174 = vrot.lane.b32.xlu1 %v6345_v0, %s6024_s8  ;;  %1172 = vrot.lane.b32.xlu0 %v6349_v2, %s6024_s8  ;;  %v1425_v37 = vcombine.low %v1405_v28, %v1404_v27 }
  0xea   : > { %v1274_v11 = vrot.slane %v1260_v63, %v6303_v40  ;;  %v1361_v15 = vpop.permute.xlu1 %1360  ;;  %v1359_v16 = vpop.permute.xlu0 %1358  ;;  %v1435_v51 = vrot.slane %v1425_v37, %v6303_v40  ;;  %v6030_v37 = vmov 0  }
  0xeb   : > { %v1402_v19 = vsel %vm1388_vm5, %v1359_v16, %v1361_v15  ;;  %v1403_v22 = vsel %vm1388_vm5, %v1357_v61, %v1359_v16  ;;  %5756 = vset.pattern.permute.xlu0 %v6030_v37  ;;  %5757 = vset.pattern.permute.xlu1 %v6030_v37 }
  0xec   : > { %v1275_v25 = vcombine.low %v1267_v7, %v1274_v11  ;;  %1178 = vrot.lane.b32.xlu1 %v6366_v20, %s6024_s8  ;;  %1176 = vrot.lane.b32.xlu0 %v6370_v21, %s6024_s8  ;;  %v1426_v29 = vcombine.low %v1403_v22, %v1402_v19 }
  0xee   : > { %1344 = vst [vmem:[#allocation2 + $0x5] ss:$8 sm:$0xf] %v1275_v25  ;;  %1345 = vst [vmem:[#allocation2 + $0x5] ss:$8 sm:$0xf0] %v1275_v25  ;;  %v1365_v31 = vpop.permute.xlu1 %1364  ;;  %v1363_v32 = vpop.permute.xlu0 %1362  ;;  %v1442_v38 = vrot.slane %v1426_v29, %v6303_v40 }
  0xef   : > { %v1400_v35 = vsel %vm1388_vm5, %v1363_v32, %v1365_v31  ;;  %v1401_v36 = vsel %vm1388_vm5, %v1361_v15, %v1363_v32 }
  0xf0   : > { %1182 = vrot.lane.b32.xlu1 %v6382_v30, %s6024_s8  ;;  %1180 = vrot.lane.b32.xlu0 %v6391_v33, %s6024_s8  ;;  %v1427_v41 = vcombine.low %v1401_v36, %v1400_v35  ;;  %v1457_v54 = vcombine.low %v1435_v51, %v1442_v38 }
  0xf2   : > { %v6582_v47 = vpop.permute.xlu1 %1368  ;;  %v1367_v48 = vpop.permute.xlu0 %1366  ;;  %v1449_v55 = vrot.slane %v1427_v41, %v6303_v40  ;;  %v1465_v61 = vrot.slane %v1457_v54, %v6303_v40 }
  0xf3   : > { %v1398_v49 = vsel %vm1388_vm5, %v1367_v48, %v6582_v47  ;;  %v1399_v50 = vsel %vm1388_vm5, %v1365_v31, %v1367_v48 }
  0xf4   : > { %v1428_v53 = vcombine.low %v1399_v50, %v1398_v49  ;;  %1186 = vrot.lane.b32.xlu1 %v6406_v42, %s6024_s8  ;;  %1184 = vrot.lane.b32.xlu0 %v6410_v43, %s6024_s8 }
  0xf6   : > { %v1456_v57 = vrot.slane %v1428_v53, %v6303_v40  ;;  %v1553_v58 = vpop.permute.xlu1 %1552  ;;  %v6596_v59 = vpop.permute.xlu0 %1550 }
  0xf7   : > { %v1603_v31 = vsel %vm1586_vm6, %v6596_v59, %v1553_v58 }
  0xf8   : > { %v1458_v60 = vcombine.low %v1449_v55, %v1456_v57  ;;  %1372 = vrot.lane.b32.xlu1 %v6345_v0, %s6025_s9  ;;  %1370 = vrot.lane.b32.xlu0 %v6349_v2, %s6025_s9 }
  0xfa   : > { %v1472_v62 = vrot.slane %v1458_v60, %v6303_v40  ;;  %v1557_v63 = vpop.permute.xlu1 %1556  ;;  %v1555_v7 = vpop.permute.xlu0 %1554 }
  0xfb   : > { %v1601_v22 = vsel %vm1586_vm6, %v1555_v7, %v1557_v63  ;;  %v1602_v25 = vsel %vm1586_vm6, %v1553_v58, %v1555_v7 }
  0xfc   : > { %v1473_v11 = vcombine.low %v1465_v61, %v1472_v62  ;;  %1376 = vrot.lane.b32.xlu1 %v6366_v20, %s6025_s9  ;;  %1374 = vrot.lane.b32.xlu0 %v6370_v21, %s6025_s9  ;;  %v1623_v35 = vcombine.low %v1603_v31, %v1602_v25 }
  0xfe   : > { %1542 = vst [vmem:[#allocation2 + $0x6] ss:$8 sm:$0xf] %v1473_v11  ;;  %1543 = vst [vmem:[#allocation2 + $0x6] ss:$8 sm:$0xf0] %v1473_v11  ;;  %v1561_v15 = vpop.permute.xlu1 %1560  ;;  %v1559_v16 = vpop.permute.xlu0 %1558  ;;  %v1633_v53 = vrot.slane %v1623_v35, %v6303_v40 }
  0xff   : > { %v1600_v19 = vsel %vm1586_vm6, %v1557_v63, %v1559_v16  ;;  %v1599_v36 = vsel %vm1586_vm6, %v1559_v16, %v1561_v15 }
 0x100   : > { %1380 = vrot.lane.b32.xlu1 %v6382_v30, %s6025_s9  ;;  %1378 = vrot.lane.b32.xlu0 %v6391_v33, %s6025_s9  ;;  %v1624_v27 = vcombine.low %v1601_v22, %v1600_v19 }
 0x102   : > { %v1565_v28 = vpop.permute.xlu1 %1564  ;;  %v1563_v29 = vpop.permute.xlu0 %1562  ;;  %v1640_v38 = vrot.slane %v1624_v27, %v6303_v40 }
 0x103   : > { %v1598_v32 = vsel %vm1586_vm6, %v1561_v15, %v1563_v29  ;;  %v1597_v50 = vsel %vm1586_vm6, %v1563_v29, %v1565_v28 }
 0x104   : > { %1384 = vrot.lane.b32.xlu1 %v6406_v42, %s6025_s9  ;;  %1382 = vrot.lane.b32.xlu0 %v6410_v43, %s6025_s9  ;;  %v1625_v41 = vcombine.low %v1599_v36, %v1598_v32  ;;  %v1655_v55 = vcombine.low %v1633_v53, %v1640_v38 }
 0x106   : > { %v6631_v48 = vpop.permute.xlu1 %1748  ;;  %v6633_v49 = vpop.permute.xlu0 %1566  ;;  %v1647_v57 = vrot.slane %v1625_v41, %v6303_v40  ;;  %v1663_v63 = vrot.slane %v1655_v55, %v6303_v40 }
 0x107   : > { %v1596_v51 = vsel %vm1586_vm6, %v1565_v28, %v6633_v49 }
 0x108   : > { %v1626_v54 = vcombine.low %v1597_v50, %v1596_v51  ;;  %1570 = vrot.lane.b32.xlu1 %v6345_v0, %s6026_s10  ;;  %1568 = vrot.lane.b32.xlu0 %v6349_v2, %s6026_s10 }
 0x10a   : > { %v1654_v58 = vrot.slane %v1626_v54, %v6303_v40  ;;  %v1753_v60 = vpop.permute.xlu1 %1752  ;;  %v1751_v61 = vpop.permute.xlu0 %1750 }
 0x10b   : > { %v1800_v25 = vsel %vm1784_vm7, %v1751_v61, %v1753_v60  ;;  %v1801_v27 = vsel %vm1784_vm7, %v6631_v48, %v1751_v61 }
 0x10c   : > { %v1656_v62 = vcombine.low %v1647_v57, %v1654_v58  ;;  %1574 = vrot.lane.b32.xlu1 %v6366_v20, %s6026_s10  ;;  %1572 = vrot.lane.b32.xlu0 %v6370_v21, %s6026_s10  ;;  %v1821_v36 = vcombine.low %v1801_v27, %v1800_v25 }
 0x10e   : > { %v1670_v7 = vrot.slane %v1656_v62, %v6303_v40  ;;  %v1757_v11 = vpop.permute.xlu1 %1756  ;;  %v1755_v15 = vpop.permute.xlu0 %1754  ;;  %v1831_v54 = vrot.slane %v1821_v36, %v6303_v40 }
 0x10f   : > { %v1798_v16 = vsel %vm1784_vm7, %v1755_v15, %v1757_v11  ;;  %v1799_v19 = vsel %vm1784_vm7, %v1753_v60, %v1755_v15 }
 0x110   : > { %v1671_v22 = vcombine.low %v1663_v63, %v1670_v7  ;;  %1578 = vrot.lane.b32.xlu1 %v6382_v30, %s6026_s10  ;;  %1576 = vrot.lane.b32.xlu0 %v6391_v33, %s6026_s10  ;;  %v1822_v28 = vcombine.low %v1799_v19, %v1798_v16 }
 0x112   : > { %1740 = vst [vmem:[#allocation2 + $0x7] ss:$8 sm:$0xf] %v1671_v22  ;;  %1741 = vst [vmem:[#allocation2 + $0x7] ss:$8 sm:$0xf0] %v1671_v22  ;;  %v1761_v29 = vpop.permute.xlu1 %1760  ;;  %v1759_v31 = vpop.permute.xlu0 %1758  ;;  %v1838_v37 = vrot.slane %v1822_v28, %v6303_v40 }
 0x113   : > { %v1796_v32 = vsel %vm1784_vm7, %v1759_v31, %v1761_v29  ;;  %v1797_v35 = vsel %vm1784_vm7, %v1757_v11, %v1759_v31  ;;  %v9233_v28 = vmov 0 }
 0x114   : > { %1582 = vrot.lane.b32.xlu1 %v6406_v42, %s6026_s10  ;;  %1580 = vrot.lane.b32.xlu0 %v6410_v43, %s6026_s10  ;;  %v1823_v38 = vcombine.low %v1797_v35, %v1796_v32  ;;  %v1853_v57 = vcombine.low %v1831_v54, %v1838_v37  ;;  %v9234_v28 = vsel %vm6710_vm8, 4294967295, %v9233_v28 }
 0x115   : > { %9235 = vst [vmem:[#allocation14_spill] sm:$0xff] %v9234_v28 }
 0x116   : > { %v6676_v41 = vpop.permute.xlu1 %1764  ;;  %v1763_v50 = vpop.permute.xlu0 %1762  ;;  %v1845_v58 = vrot.slane %v1823_v38, %v6303_v40  ;;  %v1861_v7 = vrot.slane %v1853_v57, %v6303_v40 }
 0x117   : > { %v1794_v51 = vsel %vm1784_vm7, %v1763_v50, %v6676_v41  ;;  %v1795_v53 = vsel %vm1784_vm7, %v1761_v29, %v1763_v50 }
 0x118   : > { %v1824_v55 = vcombine.low %v1795_v53, %v1794_v51  ;;  %1768 = vrot.lane.b32.xlu1 %v6345_v0, %s6028_s11  ;;  %1766 = vrot.lane.b32.xlu0 %v6349_v2, %s6028_s11 }
 0x119   : > { %v1951_v34 = vld [vmem:[#allocation2 + $0x8] sm:$0xff]  ;;  %v1950_v51 = vld [vmem:[#allocation2] sm:$0xff] }
 0x11a   : > { %v1852_v60 = vrot.slane %v1824_v55, %v6303_v40  ;;  %v381_v61 = vpop.permute.xlu1 %380  ;;  %v379_v62 = vpop.permute.xlu0 %378 }
 0x11b   : > { %v406_v22 = vsel %vm398_vm0, %v379_v62, %v381_v61 }
 0x11c   : > { %v1854_v63 = vcombine.low %v1845_v58, %v1852_v60  ;;  %1772 = vrot.lane.b32.xlu1 %v6366_v20, %s6028_s11  ;;  %1770 = vrot.lane.b32.xlu0 %v6370_v21, %s6028_s11  ;;  %v407_v20 = vsel %vm398_vm0, %v6314_v46, %v379_v62 }
 0x11d   : > { %v484_v29 = vcombine.low %v407_v20, %v406_v22 }
 0x11e   : > { %v1868_v0 = vrot.slane %v1854_v63, %v6303_v40  ;;  %v385_v11 = vpop.permute.xlu1 %384  ;;  %v383_v2 = vpop.permute.xlu0 %382 }
 0x11f   : > { %v404_v15 = vsel %vm398_vm0, %v383_v2, %v385_v11  ;;  %v405_v16 = vsel %vm398_vm0, %v381_v61, %v383_v2  ;;  %v494_v36 = vrot.slane %v484_v29, %v6303_v40  ;;  %v1955_v2 = vld [vmem:[#allocation2 + $0x28] sm:$0xff]  ;;  %v6766_v29 = vld [vmem:[%s9165_s2] sm:$0xff] }
 0x120   : > { %v1869_v19 = vcombine.low %v1861_v7, %v1868_v0  ;;  %1776 = vrot.lane.b32.xlu1 %v6382_v30, %s6028_s11  ;;  %1774 = vrot.lane.b32.xlu0 %v6391_v33, %s6028_s11  ;;  %v485_v21 = vcombine.low %v405_v16, %v404_v15 }
 0x122   : > { %1938 = vst [vmem:[#allocation2 + $0x90] ss:$8 sm:$0xf] %v1869_v19  ;;  %1939 = vst [vmem:[#allocation2 + $0x90] ss:$8 sm:$0xf0] %v1869_v19  ;;  %v389_v25 = vpop.permute.xlu1 %388  ;;  %v387_v27 = vpop.permute.xlu0 %386  ;;  %v501_v33 = vrot.slane %v485_v21, %v6303_v40 }
 0x123   : > { %v402_v46 = vsel %vm398_vm0, %v387_v27, %v389_v25  ;;  %v403_v30 = vsel %vm398_vm0, %v385_v11, %v387_v27  ;;  %v1953_v11 = vld [vmem:[#allocation2 + $0x18] sm:$0xff] }
 0x124   : > { %1780 = vrot.lane.b32.xlu1 %v6406_v42, %s6028_s11  ;;  %1778 = vrot.lane.b32.xlu0 %v6410_v43, %s6028_s11  ;;  %v486_v31 = vcombine.low %v403_v30, %v402_v46  ;;  %v516_v38 = vcombine.low %v494_v36, %v501_v33  ;;  %v6771_v46 = vld [vmem:[%s9165_s2 + $0x18] sm:$0xff]  ;;  %v1954_v36 = vld [vmem:[#allocation2 + $0x20] sm:$0xff] }
 0x126   : > { %v6730_v32 = vpop.permute.xlu1 %392  ;;  %v391_v35 = vpop.permute.xlu0 %390  ;;  %v508_v54 = vrot.slane %v486_v31, %v6303_v40  ;;  %v524_v20 = vrot.slane %v516_v38, %v6303_v40 }
 0x127   : > { %v400_v42 = vsel %vm398_vm0, %v391_v35, %v6730_v32  ;;  %v401_v43 = vsel %vm398_vm0, %v389_v25, %v391_v35  ;;  %v1952_v35 = vld [vmem:[#allocation2 + $0x10] sm:$0xff] }
 0x128   : > { %v487_v37 = vcombine.low %v401_v43, %v400_v42  ;;  %594 = vrot.lane.b32.xlu1 %v6727_v1, %s6021_s29  ;;  %394 = vrot.lane.b32.xlu0 %v6727_v1, %s6020_s28 }
 0x129   : > { %v1969_v50 = vld [vmem:[#allocation2 + $0x98] sm:$0x1]  ;;  %v1968_v53 = vld [vmem:[#allocation2 + $0x90] sm:$0x1]  ;;  %v1971_v63 = vld [vmem:[#allocation2 + $0xa8] sm:$0x1] }
 0x12a   : > { %v515_v55 = vrot.slane %v487_v37, %v6303_v40  ;;  %v581_v57 = vpop.permute.xlu1 %580  ;;  %v579_v58 = vpop.permute.xlu0 %578  ;;  %v5599_v60 = vpack.c.bf16 %v1969_v50, %v1951_v34  ;;  %v5602_v62 = vpack.c.bf16 %v1968_v53, %v1950_v51  ;;  %v1973_v7 = vld [vmem:[#allocation2 + $0xb8] sm:$0x1]  ;;  %v5605_v15 = vpack.c.bf16 %v1971_v63, %v1953_v11  ;;  %v1970_v19 = vld [vmem:[#allocation2 + $0xa0] sm:$0x1]  ;;  %v1972_v22 = vld [vmem:[#allocation2 + $0xb0] sm:$0x1] }
 0x12b   : > { %v5611_v16 = vpack.c.bf16 %v1973_v7, %v1955_v2  ;;  %v1975_v30 = vld [vmem:[#allocation2 + $0xc8] sm:$0x1]  ;;  %v5608_v43 = vpack.c.bf16 %v1970_v19, %v1952_v35  ;;  %v5614_v37 = vpack.c.bf16 %v1972_v22, %v1954_v36  ;;  %v1957_v34 = vld [vmem:[#allocation2 + $0x38] sm:$0xff]  ;;  %v604_v38 = vsel %vm596_vm1, %v579_v58, %v581_v57  ;;  %v1956_v63 = vld [vmem:[#allocation2 + $0x30] sm:$0xff] }
 0x12c   : > { %v517_v0 = vcombine.low %v508_v54, %v515_v55  ;;  %990 = vrot.lane.b32.xlu1 %v6727_v1, %s6023_s7  ;;  %792 = vrot.lane.b32.xlu0 %v6727_v1, %s6022_s30  ;;  %v605_v50 = vsel %vm596_vm1, %v6373_v26, %v579_v58  ;;  %v5617_v51 = vpack.c.bf16 %v1975_v30, %v1957_v34  ;;  %v6801_v26 = vld [vmem:[%s9165_s2 + $0x8] sm:$0xff]  ;;  %v1986_v19 = vld [vmem:[%s9166_s3] sm:$0xff] }
 0x12d   : > { %5601 = vmatprep.subr.msk.bf16.mxu0 %vm6745_vm11, %v5599_v60  ;;  %5725 = vmatprep.subr.msk.bf16.mxu1 %vm6745_vm11, %v5599_v60 }
 0x12e   : > { %v531_v21 = vrot.slane %v517_v0, %v6303_v40  ;;  %5604 = vmatpush1.bf16.msk.msra.mxu0 %vm6745_vm11, %v5602_v62  ;;  %5726 = vmatpush1.bf16.msk.msra.mxu1 %vm6745_vm11, %v5602_v62  ;;  %v585_v25 = vpop.permute.xlu1 %584  ;;  %v583_v27 = vpop.permute.xlu0 %582  ;;  %v682_v62 = vcombine.low %v605_v50, %v604_v38  ;;  %v1987_v0 = vld [vmem:[%s9166_s3 + $0x8] sm:$0xff] }
 0x12f   : > { %v602_v33 = vsel %vm596_vm1, %v583_v27, %v585_v25  ;;  %v603_v31 = vsel %vm596_vm1, %v581_v57, %v583_v27  ;;  %5607 = vmatprep.subr.msk.bf16.mxu1 %vm6745_vm11, %v5605_v15  ;;  %5613 = vmatprep.subr.msk.bf16.mxu0 %vm6745_vm11, %v5611_v16  ;;  %v1974_v57 = vld [vmem:[#allocation2 + $0xc0] sm:$0x1]  ;;  %v1988_v27 = vld [vmem:[%s9166_s3 + $0x10] sm:$0xff] }
 0x130   : > { %v532_v42 = vcombine.low %v524_v20, %v531_v21  ;;  %1386 = vrot.lane.b32.xlu1 %v6727_v1, %s6025_s9  ;;  %1188 = vrot.lane.b32.xlu0 %v6727_v1, %s6024_s8  ;;  %v683_v53 = vcombine.low %v603_v31, %v602_v33  ;;  %v5620_v7 = vpack.c.bf16 %v1974_v57, %v1956_v63  ;;  %s248_s8 = scalar_lea.vmem %s9169_s6, %s5727_s5 }
 0x131   : > { %5527 = vmatmul.mubr.msk.f32.vlgmr.msra.gmra.mrb[0].mxu0 %vm2010_vm12, %v6766_v29  ;;  %5530 = vmatmul.mubr.msk.f32.vlgmr.msra.gmra.mrb[0].mxu1 %vm2010_vm12, %v6771_v46  ;;  %v692_v21 = vrot.slane %v682_v62, %v6303_v40 }
 0x132   : > { %555 = vst [vmem:[#allocation2 + $0x41] ss:$8 sm:$0xf] %v532_v42  ;;  %556 = vst [vmem:[#allocation2 + $0x41] ss:$8 sm:$0xf0] %v532_v42  ;;  %5610 = vmatpush1.bf16.msk.msra.mxu1 %vm6745_vm11, %v5608_v43  ;;  %5616 = vmatpush1.bf16.msk.msra.mxu0 %vm6745_vm11, %v5614_v37  ;;  %v589_v54 = vpop.permute.xlu1 %588  ;;  %v587_v55 = vpop.permute.xlu0 %586  ;;  %v699_v11 = vrot.slane %v683_v53, %v6303_v40 }
 0x133   : > { %v600_v58 = vsel %vm596_vm1, %v587_v55, %v589_v54  ;;  %v601_v60 = vsel %vm596_vm1, %v585_v25, %v587_v55  ;;  %5619 = vmatprep.subr.msk.bf16.mxu1 %vm6745_vm11, %v5617_v51  ;;  %2148 = vmatprep.mubr.f32.mxu0 %v9170_v44  ;;  %v1989_v42 = vld [vmem:[%s9166_s3 + $0x18] sm:$0xff]  ;;  %v5212_v51 = vld [vmem:[#allocation3] sm:$0x1] }
 0x134   : > { %2231 = vmatprep.mubr.f32.mxu1 %v9170_v44  ;;  %1782 = vrot.lane.b32.xlu1 %v6727_v1, %s6028_s11  ;;  %v684_v2 = vcombine.low %v601_v60, %v600_v58  ;;  %v714_v30 = vcombine.low %v692_v21, %v699_v11 }
 0x135   : > { %1584 = vrot.lane.b32.xlu0 %v6727_v1, %s6026_s10  ;;  %5528 = vmatmul.mubr.msk.f32.gmra.mrb[2].mxu0 %vm2010_vm12, %v6801_v26  ;;  %v6829_v1 = vld [vmem:[%s9165_s2 + $0x10] sm:$0xff] }
 0x136   : > { %5533 = vmatmul.mubr.msk.f32.vlgmr.msra.gmra.mrb[2].mxu1 %vm2010_vm12, %v6766_v29  ;;  %v6823_v15 = vpop.permute.xlu1 %592  ;;  %v591_v16 = vpop.permute.xlu0 %590  ;;  %2154 = vmatprep.mubr.f32.mxu0 %v9170_v44  ;;  %v706_v33 = vrot.slane %v684_v2, %v6303_v40  ;;  %v722_v37 = vrot.slane %v714_v30, %v6303_v40 }
 0x137   : > { %5622 = vmatpush1.bf16.msk.msra.mxu1 %vm6745_vm11, %v5620_v7  ;;  %v598_v22 = vsel %vm596_vm1, %v591_v16, %v6823_v15  ;;  %v599_v20 = vsel %vm596_vm1, %v589_v54, %v591_v16  ;;  %2237 = vmatprep.mubr.f32.mxu1 %v9170_v44 }
 0x138   : > { %v685_v25 = vcombine.low %v599_v20, %v598_v22  ;;  %1997 = vperm.xlu1 %5757, %v1987_v0  }
 0x139   : > { %5529 = vmatmul.mubr.msk.f32.gmra.mrb[4].mxu0 %vm2010_vm12, %v6829_v1  ;;  %1992 = vperm.xlu0 %5756, %v1986_v19  }
 0x13a   : > { %v713_v31 = vrot.slane %v685_v25, %v6303_v40  ;;  %5534 = vmatmul.mubr.msk.f32.gmra.mrb[4].mxu1 %vm2010_vm12, %v6801_v26  ;;  %v779_v35 = vpop.permute.xlu1 %778  ;;  %v777_v36 = vpop.permute.xlu0 %776  ;;  %2320 = vmatprep.mubr.f32.mxu0 %v9170_v44 }
 0x13b   : > { %2243 = vmatprep.mubr.f32.mxu1 %v9170_v44  ;;  %v802_v57 = vsel %vm794_vm2, %v777_v36, %v779_v35  ;;  %v803_v58 = vsel %vm794_vm2, %v6445_v10, %v777_v36 }
 0x13c   : > { %v715_v43 = vcombine.low %v706_v33, %v713_v31  ;;  %2002 = vperm.xlu1 %5757, %v1988_v27   ;;  %v880_v0 = vcombine.low %v803_v58, %v802_v57 }
 0x13d   : > { %5539 = vmatmul.mubr.msk.f32.vlgmr.msra.gmra.mrb[6].mxu0 %vm2010_vm12, %v6766_v29  ;;  %2007 = vperm.xlu0 %5756, %v1989_v42  }
 0x13e   : > { %v729_v34 = vrot.slane %v715_v43, %v6303_v40  ;;  %5535 = vmatmul.mubr.msk.f32.gmra.mrb[6].mxu1 %vm2010_vm12, %v6829_v1  ;;  %v783_v38 = vpop.permute.xlu1 %782  ;;  %v781_v50 = vpop.permute.xlu0 %780  ;;  %2326 = vmatprep.mubr.f32.mxu0 %v9170_v44  ;;  %v890_v21 = vrot.slane %v880_v0, %v6303_v40 }
 0x13f   : > { %v800_v53 = vsel %vm794_vm2, %v781_v50, %v783_v38  ;;  %v801_v54 = vsel %vm794_vm2, %v779_v35, %v781_v50  ;;  %2249 = vmatprep.mubr.f32.mxu1 %v9170_v44 }
 0x140   : > { %v730_v55 = vcombine.low %v722_v37, %v729_v34  ;;  %v881_v60 = vcombine.low %v801_v54, %v800_v53 }
 0x141   : > { %5540 = vmatmul.mubr.msk.f32.gmra.mrb[8].mxu0 %vm2010_vm12, %v6801_v26  ;;  %5215 = vperm.xlu0 %5756, %v5212_v51  }
 0x142   : > { %753 = vst [vmem:[#allocation2 + $0x42] ss:$8 sm:$0xf] %v730_v55  ;;  %754 = vst [vmem:[#allocation2 + $0x42] ss:$8 sm:$0xf0] %v730_v55  ;;  %5536 = vmatmul.mubr.msk.f32.gmra.mrb[8].mxu1 %vm2010_vm12, %v6771_v46  ;;  %v787_v62 = vpop.permute.xlu1 %786  ;;  %v785_v63 = vpop.permute.xlu0 %784  ;;  %2332 = vmatprep.mubr.f32.mxu0 %v9170_v44  ;;  %v897_v11 = vrot.slane %v881_v60, %v6303_v40 }
 0x143   : > { %v798_v7 = vsel %vm794_vm2, %v785_v63, %v787_v62  ;;  %v799_v10 = vsel %vm794_vm2, %v783_v38, %v785_v63  ;;  %2409 = vmatprep.mubr.f32.mxu1 %v9170_v44 }
 0x144   : > { %v882_v2 = vcombine.low %v799_v10, %v798_v7  ;;  %v912_v27 = vcombine.low %v890_v21, %v897_v11 }
 0x145   : > { %5541 = vmatmul.mubr.msk.f32.gmra.mrb[10].mxu0 %vm2010_vm12, %v6829_v1 }
 0x146   : > { %5545 = vmatmul.mubr.msk.f32.vlgmr.msra.gmra.mrb[10].mxu1 %vm2010_vm12, %v6766_v29  ;;  %v6889_v16 = vpop.permute.xlu1 %790  ;;  %v789_v19 = vpop.permute.xlu0 %788  ;;  %2338 = vmatprep.mubr.f32.mxu0 %v9170_v44  ;;  %v904_v30 = vrot.slane %v882_v2, %v6303_v40  ;;  %v920_v42 = vrot.slane %v912_v27, %v6303_v40 }
 0x147   : > { %v796_v22 = vsel %vm794_vm2, %v789_v19, %v6889_v16  ;;  %v797_v20 = vsel %vm794_vm2, %v787_v62, %v789_v19  ;;  %2415 = vmatprep.mubr.f32.mxu1 %v9170_v44 }
 0x148   : > { %v883_v25 = vcombine.low %v797_v20, %v796_v22 }
 0x149   : > { %5542 = vmatmul.mubr.msk.f32.gmra.mrb[12].mxu0 %vm2010_vm12, %v6771_v46 }
 0x14a   : > { %v911_v33 = vrot.slane %v883_v25, %v6303_v40  ;;  %5546 = vmatmul.mubr.msk.f32.gmra.mrb[12].mxu1 %vm2010_vm12, %v6801_v26  ;;  %v977_v31 = vpop.permute.xlu1 %976  ;;  %v975_v35 = vpop.permute.xlu0 %974  ;;  %2498 = vmatprep.mubr.f32.mxu0 %v9170_v44 }
 0x14b   : > { %2421 = vmatprep.mubr.f32.mxu1 %v9170_v44  ;;  %v1000_v53 = vsel %vm992_vm3, %v975_v35, %v977_v31  ;;  %v1001_v54 = vsel %vm992_vm3, %v6488_v56, %v975_v35 }
 0x14c   : > { %v913_v36 = vcombine.low %v904_v30, %v911_v33  ;;  %v1078_v63 = vcombine.low %v1001_v54, %v1000_v53 }
 0x14e   : > { %v927_v43 = vrot.slane %v913_v36, %v6303_v40  ;;  %5547 = vmatmul.mubr.msk.f32.gmra.mrb[14].mxu1 %vm2010_vm12, %v6829_v1  ;;  %v981_v37 = vpop.permute.xlu1 %980  ;;  %v979_v34 = vpop.permute.xlu0 %978  ;;  %v1088_v19 = vrot.slane %v1078_v63, %v6303_v40 }
 0x14f   : > { %v998_v38 = vsel %vm992_vm3, %v979_v34, %v981_v37  ;;  %v999_v50 = vsel %vm992_vm3, %v977_v31, %v979_v34  ;;  %2427 = vmatprep.mubr.f32.mxu1 %v9170_v44 }
 0x150   : > { %v928_v51 = vcombine.low %v920_v42, %v927_v43  ;;  %v1079_v55 = vcombine.low %v999_v50, %v998_v38 }
 0x152   : > { %951 = vst [vmem:[#allocation2 + $0x43] ss:$8 sm:$0xf] %v928_v51  ;;  %952 = vst [vmem:[#allocation2 + $0x43] ss:$8 sm:$0xf0] %v928_v51  ;;  %5548 = vmatmul.mubr.msk.f32.gmra.mrb[16].mxu1 %vm2010_vm12, %v6771_v46  ;;  %v985_v57 = vpop.permute.xlu1 %984  ;;  %v983_v58 = vpop.permute.xlu0 %982  ;;  %v1095_v7 = vrot.slane %v1079_v55, %v6303_v40 }
 0x153   : > { %v996_v60 = vsel %vm992_vm3, %v983_v58, %v985_v57  ;;  %v997_v62 = vsel %vm992_vm3, %v981_v37, %v983_v58  ;;  %2587 = vmatprep.mubr.f32.mxu1 %v9170_v44 }
 0x154   : > { %v1080_v56 = vcombine.low %v997_v62, %v996_v60  ;;  %v1110_v20 = vcombine.low %v1088_v19, %v1095_v7 }
 0x156   : > { %v6929_v10 = vpop.permute.xlu1 %988  ;;  %v987_v0 = vpop.permute.xlu0 %986  ;;  %v1102_v21 = vrot.slane %v1080_v56, %v6303_v40  ;;  %v1118_v31 = vrot.slane %v1110_v20, %v6303_v40 }
 0x157   : > { %v994_v11 = vsel %vm992_vm3, %v987_v0, %v6929_v10  ;;  %v995_v2 = vsel %vm992_vm3, %v985_v57, %v987_v0 }
 0x158   : > { %v1081_v22 = vcombine.low %v995_v2, %v994_v11 }
 0x15a   : > { %v1109_v25 = vrot.slane %v1081_v22, %v6303_v40  ;;  %v1175_v27 = vpop.permute.xlu1 %1174  ;;  %v1173_v30 = vpop.permute.xlu0 %1172 }
 0x15b   : > { %v1198_v38 = vsel %vm1190_vm4, %v1173_v30, %v1175_v27  ;;  %v1199_v50 = vsel %vm1190_vm4, %v6539_v52, %v1173_v30 }
 0x15c   : > { %v1111_v33 = vcombine.low %v1102_v21, %v1109_v25  ;;  %v1276_v58 = vcombine.low %v1199_v50, %v1198_v38 }
 0x15e   : > { %v1125_v35 = vrot.slane %v1111_v33, %v6303_v40  ;;  %v1179_v36 = vpop.permute.xlu1 %1178  ;;  %v1177_v42 = vpop.permute.xlu0 %1176  ;;  %v1286_v0 = vrot.slane %v1276_v58, %v6303_v40 }
 0x15f   : > { %v1196_v43 = vsel %vm1190_vm4, %v1177_v42, %v1179_v36  ;;  %v1197_v37 = vsel %vm1190_vm4, %v1175_v27, %v1177_v42 }
 0x160   : > { %v1126_v34 = vcombine.low %v1118_v31, %v1125_v35  ;;  %v1277_v51 = vcombine.low %v1197_v37, %v1196_v43 }
 0x162   : > { %1149 = vst [vmem:[#allocation2 + $0x44] ss:$8 sm:$0xf] %v1126_v34  ;;  %1150 = vst [vmem:[#allocation2 + $0x44] ss:$8 sm:$0xf0] %v1126_v34  ;;  %v1183_v53 = vpop.permute.xlu1 %1182  ;;  %v1181_v54 = vpop.permute.xlu0 %1180  ;;  %v1293_v60 = vrot.slane %v1277_v51, %v6303_v40 }
 0x163   : > { %v1194_v55 = vsel %vm1190_vm4, %v1181_v54, %v1183_v53  ;;  %v1195_v57 = vsel %vm1190_vm4, %v1179_v36, %v1181_v54 }
 0x164   : > { %v1278_v62 = vcombine.low %v1195_v57, %v1194_v55  ;;  %v1308_v2 = vcombine.low %v1286_v0, %v1293_v60 }
 0x166   : > { %v6955_v63 = vpop.permute.xlu1 %1186  ;;  %v1185_v7 = vpop.permute.xlu0 %1184  ;;  %v1300_v19 = vrot.slane %v1278_v62, %v6303_v40  ;;  %v1316_v27 = vrot.slane %v1308_v2, %v6303_v40 }
 0x167   : > { %v1192_v52 = vsel %vm1190_vm4, %v1185_v7, %v6955_v63  ;;  %v1193_v56 = vsel %vm1190_vm4, %v1183_v53, %v1185_v7 }
 0x168   : > { %v1279_v11 = vcombine.low %v1193_v56, %v1192_v52 }
 0x16a   : > { %v1307_v22 = vrot.slane %v1279_v11, %v6303_v40  ;;  %v1373_v20 = vpop.permute.xlu1 %1372  ;;  %v1371_v21 = vpop.permute.xlu0 %1370 }
 0x16b   : > { %v1396_v43 = vsel %vm1388_vm5, %v1371_v21, %v1373_v20  ;;  %v1397_v37 = vsel %vm1388_vm5, %v6582_v47, %v1371_v21 }
 0x16c   : > { %v1309_v25 = vcombine.low %v1300_v19, %v1307_v22  ;;  %v1474_v54 = vcombine.low %v1397_v37, %v1396_v43 }
 0x16e   : > { %v1323_v30 = vrot.slane %v1309_v25, %v6303_v40  ;;  %v1377_v33 = vpop.permute.xlu1 %1376  ;;  %v1375_v31 = vpop.permute.xlu0 %1374  ;;  %v1484_v7 = vrot.slane %v1474_v54, %v6303_v40 }
 0x16f   : > { %v1394_v35 = vsel %vm1388_vm5, %v1375_v31, %v1377_v33  ;;  %v1395_v36 = vsel %vm1388_vm5, %v1373_v20, %v1375_v31 }
 0x170   : > { %v1324_v42 = vcombine.low %v1316_v27, %v1323_v30  ;;  %v1475_v34 = vcombine.low %v1395_v36, %v1394_v35 }
 0x172   : > { %1347 = vst [vmem:[#allocation2 + $0x45] ss:$8 sm:$0xf] %v1324_v42  ;;  %1348 = vst [vmem:[#allocation2 + $0x45] ss:$8 sm:$0xf0] %v1324_v42  ;;  %v1381_v38 = vpop.permute.xlu1 %1380  ;;  %v1379_v50 = vpop.permute.xlu0 %1378  ;;  %v1491_v55 = vrot.slane %v1475_v34, %v6303_v40 }
 0x173   : > { %v1392_v51 = vsel %vm1388_vm5, %v1379_v50, %v1381_v38  ;;  %v1393_v53 = vsel %vm1388_vm5, %v1377_v33, %v1379_v50 }
 0x174   : > { %v1476_v57 = vcombine.low %v1393_v53, %v1392_v51  ;;  %v1506_v56 = vcombine.low %v1484_v7, %v1491_v55 }
 0x176   : > { %v6981_v58 = vpop.permute.xlu1 %1384  ;;  %v1383_v60 = vpop.permute.xlu0 %1382  ;;  %v1498_v0 = vrot.slane %v1476_v57, %v6303_v40  ;;  %v1514_v20 = vrot.slane %v1506_v56, %v6303_v40 }
 0x177   : > { %v1390_v47 = vsel %vm1388_vm5, %v1383_v60, %v6981_v58  ;;  %v1391_v62 = vsel %vm1388_vm5, %v1381_v38, %v1383_v60 }
 0x178   : > { %v1477_v52 = vcombine.low %v1391_v62, %v1390_v47 }
 0x17a   : > { %v1505_v11 = vrot.slane %v1477_v52, %v6303_v40  ;;  %v1571_v2 = vpop.permute.xlu1 %1570  ;;  %v1569_v19 = vpop.permute.xlu0 %1568 }
 0x17b   : > { %v1594_v35 = vsel %vm1586_vm6, %v1569_v19, %v1571_v2  ;;  %v1595_v36 = vsel %vm1586_vm6, %v6633_v49, %v1569_v19 }
 0x17c   : > { %v1507_v22 = vcombine.low %v1498_v0, %v1505_v11  ;;  %v1672_v50 = vcombine.low %v1595_v36, %v1594_v35 }
 0x17e   : > { %v1521_v21 = vrot.slane %v1507_v22, %v6303_v40  ;;  %v1575_v25 = vpop.permute.xlu1 %1574  ;;  %v1573_v27 = vpop.permute.xlu0 %1572  ;;  %v1682_v60 = vrot.slane %v1672_v50, %v6303_v40 }
 0x17f   : > { %v1592_v30 = vsel %vm1586_vm6, %v1573_v27, %v1575_v25  ;;  %v1593_v33 = vsel %vm1586_vm6, %v1571_v2, %v1573_v27 }
 0x180   : > { %v1522_v31 = vcombine.low %v1514_v20, %v1521_v21  ;;  %v1673_v42 = vcombine.low %v1593_v33, %v1592_v30 }
 0x182   : > { %1545 = vst [vmem:[#allocation2 + $0x46] ss:$8 sm:$0xf] %v1522_v31  ;;  %1546 = vst [vmem:[#allocation2 + $0x46] ss:$8 sm:$0xf0] %v1522_v31  ;;  %v1579_v43 = vpop.permute.xlu1 %1578  ;;  %v1577_v37 = vpop.permute.xlu0 %1576  ;;  %v1689_v51 = vrot.slane %v1673_v42, %v6303_v40 }
 0x183   : > { %v1590_v34 = vsel %vm1586_vm6, %v1577_v37, %v1579_v43  ;;  %v1591_v38 = vsel %vm1586_vm6, %v1575_v25, %v1577_v37 }
 0x184   : > { %v1674_v53 = vcombine.low %v1591_v38, %v1590_v34  ;;  %v1704_v62 = vcombine.low %v1682_v60, %v1689_v51 }
 0x186   : > { %v7007_v54 = vpop.permute.xlu1 %1582  ;;  %v1581_v55 = vpop.permute.xlu0 %1580  ;;  %v1696_v7 = vrot.slane %v1674_v53, %v6303_v40  ;;  %v1712_v2 = vrot.slane %v1704_v62, %v6303_v40 }
 0x187   : > { %v1588_v49 = vsel %vm1586_vm6, %v1581_v55, %v7007_v54  ;;  %v1589_v57 = vsel %vm1586_vm6, %v1579_v43, %v1581_v55 }
 0x188   : > { %v1675_v47 = vcombine.low %v1589_v57, %v1588_v49 }
 0x18a   : > { %v1703_v52 = vrot.slane %v1675_v47, %v6303_v40  ;;  %v1769_v56 = vpop.permute.xlu1 %1768  ;;  %v1767_v0 = vpop.permute.xlu0 %1766 }
 0x18b   : > { %v1792_v30 = vsel %vm1784_vm7, %v1767_v0, %v1769_v56  ;;  %v1793_v33 = vsel %vm1784_vm7, %v6676_v41, %v1767_v0 }
 0x18c   : > { %v1705_v11 = vcombine.low %v1696_v7, %v1703_v52  ;;  %v1870_v37 = vcombine.low %v1793_v33, %v1792_v30 }
 0x18e   : > { %v1719_v19 = vrot.slane %v1705_v11, %v6303_v40  ;;  %v1773_v22 = vpop.permute.xlu1 %1772  ;;  %v1771_v20 = vpop.permute.xlu0 %1770  ;;  %v1880_v55 = vrot.slane %v1870_v37, %v6303_v40 }
 0x18f   : > { %v1790_v21 = vsel %vm1784_vm7, %v1771_v20, %v1773_v22  ;;  %v1791_v25 = vsel %vm1784_vm7, %v1769_v56, %v1771_v20 }
 0x190   : > { %v1720_v27 = vcombine.low %v1712_v2, %v1719_v19  ;;  %v1871_v31 = vcombine.low %v1791_v25, %v1790_v21 }
 0x192   : > { %1743 = vst [vmem:[#allocation2 + $0x47] ss:$8 sm:$0xf] %v1720_v27  ;;  %1744 = vst [vmem:[#allocation2 + $0x47] ss:$8 sm:$0xf0] %v1720_v27  ;;  %v1777_v35 = vpop.permute.xlu1 %1776  ;;  %v1775_v36 = vpop.permute.xlu0 %1774  ;;  %v1887_v34 = vrot.slane %v1871_v31, %v6303_v40 }
 0x193   : > { %v1788_v42 = vsel %vm1784_vm7, %v1775_v36, %v1777_v35  ;;  %v1789_v43 = vsel %vm1784_vm7, %v1773_v22, %v1775_v36 }
 0x194   : > { %v1872_v38 = vcombine.low %v1789_v43, %v1788_v42  ;;  %v1902_v57 = vcombine.low %v1880_v55, %v1887_v34 }
 0x196   : > { %v1781_v50 = vpop.permute.xlu1 %1780  ;;  %v1779_v51 = vpop.permute.xlu0 %1778  ;;  %v1894_v60 = vrot.slane %v1872_v38, %v6303_v40  ;;  %v1910_v20 = vrot.slane %v1902_v57, %v6303_v40 }
 0x197   : > { %v1786_v41 = vsel %vm1784_vm7, %v1779_v51, %v1781_v50  ;;  %v1787_v53 = vsel %vm1784_vm7, %v1777_v35, %v1779_v51 }
 0x198   : > { %v1873_v49 = vcombine.low %v1787_v53, %v1786_v41 }
 0x19a   : > { %v1901_v47 = vrot.slane %v1873_v49, %v6303_v40  ;;  %v595_v62 = vpop.permute.xlu1 %594  ;;  %v395_v7 = vpop.permute.xlu0 %394 }
 0x19b   : > { %v597_v52 = vsel %vm596_vm1, %v6823_v15, %v595_v62  ;;  %v614_v56 = vsel %vm596_vm1, %v595_v62, %v6312_v45  ;;  %v399_v0 = vsel %vm398_vm0, %v6730_v32, %v395_v7  ;;  %v416_v11 = vsel %vm398_vm0, %v395_v7, %v6273_v23 }
 0x19c   : > { %v1903_v2 = vcombine.low %v1894_v60, %v1901_v47  ;;  %v731_v19 = vcombine.low %v597_v52, %v614_v56  ;;  %v533_v22 = vcombine.low %v399_v0, %v416_v11  ;;  %v1959_v47 = vld [vmem:[#allocation2 + $0x48] sm:$0xff]  ;;  %v1961_v0 = vld [vmem:[#allocation2 + $0x58] sm:$0xff]  ;;  %v1958_v11 = vld [vmem:[#allocation2 + $0x40] sm:$0xff] }
 0x19e   : > { %v1917_v21 = vrot.slane %v1903_v2, %v6303_v40  ;;  %v738_v15 = vrot.slane %v731_v19, %v6303_v40  ;;  %v540_v25 = vrot.slane %v533_v22, %v6303_v40  ;;  %v991_v45 = vpop.permute.xlu1 %990  ;;  %v793_v27 = vpop.permute.xlu0 %792 }
 0x19f   : > { %v993_v32 = vsel %vm992_vm3, %v6929_v10, %v991_v45  ;;  %v1010_v23 = vsel %vm992_vm3, %v991_v45, %v6443_v9  ;;  %v795_v30 = vsel %vm794_vm2, %v6889_v16, %v793_v27  ;;  %v812_v33 = vsel %vm794_vm2, %v793_v27, %v6398_v39 }
 0x1a0   : > { %v1918_v31 = vcombine.low %v1910_v20, %v1917_v21  ;;  %v745_v35 = vrot.slane %v738_v15, %v6303_v40  ;;  %v547_v36 = vrot.slane %v540_v25, %v6303_v40  ;;  %v1127_v42 = vcombine.low %v993_v32, %v1010_v23 }
 0x1a1   : > { %v929_v43 = vcombine.low %v795_v30, %v812_v33  ;;  %v1963_v30 = vld [vmem:[#allocation2 + $0x68] sm:$0xff]  ;;  %v1965_v33 = vld [vmem:[#allocation2 + $0x78] sm:$0xff] }
 0x1a2   : > { %1941 = vst [vmem:[#allocation2 + $0xd0] ss:$8 sm:$0xf] %v1918_v31  ;;  %1942 = vst [vmem:[#allocation2 + $0xd0] ss:$8 sm:$0xf0] %v1918_v31  ;;  %v1134_v9 = vrot.slane %v1127_v42, %v6303_v40  ;;  %v1387_v16 = vpop.permute.xlu1 %1386  ;;  %v1189_v10 = vpop.permute.xlu0 %1188 }
 0x1a3   : > { %756 = vst.msk [vmem:[#allocation2 + $0x82] ss:$8 sm:$0x3] %vm6710_vm8, %v745_v35  ;;  %558 = vst.msk [vmem:[#allocation2 + $0x81] ss:$8 sm:$0x3] %vm6710_vm8, %v547_v36  ;;  %v936_v39 = vrot.slane %v929_v43, %v6303_v40  ;;  %v1389_v37 = vsel %vm1388_vm5, %v6981_v58, %v1387_v16  ;;  %v1406_v34 = vsel %vm1388_vm5, %v1387_v16, %v6537_v8 }
 0x1a4   : > { %v1191_v38 = vsel %vm1190_vm4, %v6955_v63, %v1189_v10  ;;  %v1141_v51 = vrot.slane %v1134_v9, %v6303_v40  ;;  %v1523_v41 = vcombine.low %v1389_v37, %v1406_v34  ;;  %v1208_v53 = vsel %vm1190_vm4, %v1189_v10, %v6502_v12  ;;  %v1962_v16 = vld [vmem:[#allocation2 + $0x60] sm:$0xff]  ;;  %v1964_v10 = vld [vmem:[#allocation2 + $0x70] sm:$0xff] }
 0x1a5   : > { %v943_v55 = vrot.slane %v936_v39, %v6303_v40  ;;  %v1325_v49 = vcombine.low %v1191_v38, %v1208_v53 }
 0x1a6   : > { %1152 = vst.msk [vmem:[#allocation2 + $0x84] ss:$8 sm:$0x3] %vm6710_vm8, %v1141_v51  ;;  %v1530_v58 = vrot.slane %v1523_v41, %v6303_v40  ;;  %v1783_v8 = vpop.permute.xlu1 %1782 }
 0x1a7   : > { %954 = vst.msk [vmem:[#allocation2 + $0x83] ss:$8 sm:$0x3] %vm6710_vm8, %v943_v55  ;;  %v1332_v63 = vrot.slane %v1325_v49, %v6303_v40  ;;  %v1785_v57 = vsel %vm1784_vm7, %v1781_v50, %v1783_v8  ;;  %v1802_v12 = vsel %vm1784_vm7, %v1783_v8, %v6631_v48  ;;  %v1585_v60 = vpop.permute.xlu0 %1584  ;;  %v1960_v50 = vld [vmem:[#allocation2 + $0x50] sm:$0xff] }
 0x1a8   : > { %v1537_v62 = vrot.slane %v1530_v58, %v6303_v40  ;;  %v1919_v7 = vcombine.low %v1785_v57, %v1802_v12  ;;  %v1587_v52 = vsel %vm1586_vm6, %v7007_v54, %v1585_v60  ;;  %v1604_v56 = vsel %vm1586_vm6, %v1585_v60, %v6596_v59 }
 0x1a9   : > { %v1339_v2 = vrot.slane %v1332_v63, %v6303_v40  ;;  %v1721_v19 = vcombine.low %v1587_v52, %v1604_v56  ;;  %v1977_v48 = vld [vmem:[#allocation2 + $0xd8] sm:$0x1]  ;;  %v1979_v22 = vld [vmem:[#allocation2 + $0xe8] sm:$0x1]  ;;  %v1976_v20 = vld [vmem:[#allocation2 + $0xd0] sm:$0x1] }
 0x1aa   : > { %1548 = vst.msk [vmem:[#allocation2 + $0x86] ss:$8 sm:$0x3] %vm6710_vm8, %v1537_v62  ;;  %v1926_v21 = vrot.slane %v1919_v7, %v6303_v40  ;;  %v5623_v15 = vpack.c.bf16 %v1977_v48, %v1959_v47  ;;  %v5629_v54 = vpack.c.bf16 %v1979_v22, %v1961_v0  ;;  %v5626_v25 = vpack.c.bf16 %v1976_v20, %v1958_v11  ;;  %v1978_v45 = vld [vmem:[#allocation2 + $0xe0] sm:$0x1] }
 0x1ab   : > { %v1981_v27 = vld [vmem:[#allocation2 + $0xf8] sm:$0x1]  ;;  %v1983_v59 = vld [vmem:[#allocation2 + $0x108] sm:$0x1]  ;;  %v1728_v32 = vrot.slane %v1721_v19, %v6303_v40  ;;  %v5632_v23 = vpack.c.bf16 %v1978_v45, %v1960_v50  ;;  %v1980_v42 = vld [vmem:[#allocation2 + $0xf0] sm:$0x1] }
 0x1ac   : > { %1350 = vst.msk [vmem:[#allocation2 + $0x85] ss:$8 sm:$0x3] %vm6710_vm8, %v1339_v2  ;;  %v1933_v31 = vrot.slane %v1926_v21, %v6303_v40  ;;  %5625 = vmatprep.subr.msk.bf16.mxu0 %vm6745_vm11, %v5623_v15  ;;  %5631 = vmatprep.subr.msk.bf16.mxu1 %vm6745_vm11, %v5629_v54  ;;  %v5635_v35 = vpack.c.bf16 %v1981_v27, %v1963_v30  ;;  %v1982_v43 = vld [vmem:[#allocation2 + $0x100] sm:$0x1] }
 0x1ad   : > { %v5641_v36 = vpack.c.bf16 %v1983_v59, %v1965_v33  ;;  %v1735_v9 = vrot.slane %v1728_v32, %v6303_v40  ;;  %5628 = vmatpush1.bf16.msk.msra.mxu0 %vm6745_vm11, %v5626_v25  ;;  %5634 = vmatpush1.bf16.msk.msra.mxu1 %vm6745_vm11, %v5632_v23  ;;  %v5638_v39 = vpack.c.bf16 %v1980_v42, %v1962_v16 }
 0x1ae   : > { %1944 = vst.msk [vmem:[#allocation2 + $0x110] ss:$8 sm:$0x3] %vm6710_vm8, %v1933_v31  ;;  %5637 = vmatprep.subr.msk.bf16.mxu0 %vm6745_vm11, %v5635_v35  ;;  %v5644_v37 = vpack.c.bf16 %v1982_v43, %v1964_v10 }
 0x1af   : > { %5643 = vmatprep.subr.msk.bf16.mxu1 %vm6745_vm11, %v5641_v36  ;;  %1746 = vst.msk [vmem:[#allocation2 + $0x87] ss:$8 sm:$0x3] %vm6710_vm8, %v1735_v9 }
 0x1b0   : > { %5551 = vmatmul.mubr.msk.f32.vlgmr.msra.gmra.mrb[14].mxu0 %vm2010_vm12, %v6766_v29  ;;  %5557 = vmatmul.mubr.msk.f32.vlgmr.msra.gmra.mrb[18].mxu1 %vm2010_vm12, %v6766_v29 }
 0x1b1   : > { %5640 = vmatpush1.bf16.msk.msra.mxu0 %vm6745_vm11, %v5638_v39  ;;  %5646 = vmatpush1.bf16.msk.msra.mxu1 %vm6745_vm11, %v5644_v37 }
 0x1b2   : > { %2504 = vmatprep.mubr.f32.mxu0 %v9170_v44  ;;  %2593 = vmatprep.mubr.f32.mxu1 %v9170_v44 }
 0x1b4   : > { %5552 = vmatmul.mubr.msk.f32.gmra.mrb[16].mxu0 %vm2010_vm12, %v6801_v26  ;;  %5558 = vmatmul.mubr.msk.f32.gmra.mrb[20].mxu1 %vm2010_vm12, %v6801_v26 }
 0x1b5   : > { %2510 = vmatprep.mubr.f32.mxu0 %v9170_v44  ;;  %2599 = vmatprep.mubr.f32.mxu1 %v9170_v44  ;;  %v1985_v34 = vld [vmem:[#allocation2 + $0x118] sm:$0x1]  ;;  %v1984_v53 = vld [vmem:[#allocation2 + $0x110] sm:$0x1] }
 0x1b6   : > { %v1967_v38 = vld [vmem:[#allocation2 + $0x88] sm:$0xff]  ;;  %v1966_v41 = vld [vmem:[#allocation2 + $0x80] sm:$0xff] }
 0x1b7   : > { %v5647_v51 = vpack.c.bf16 %v1985_v34, %v1967_v38  ;;  %v5650_v55 = vpack.c.bf16 %v1984_v53, %v1966_v41  ;;  %v7203_v63 = vpop.permute.xlu1 %1997 }
 0x1b8   : > { %5553 = vmatmul.mubr.msk.f32.gmra.mrb[18].mxu0 %vm2010_vm12, %v6829_v1  ;;  %5559 = vmatmul.mubr.msk.f32.gmra.mrb[22].mxu1 %vm2010_vm12, %v6829_v1  ;;  %v7201_v8 = vpop.permute.xlu0 %1992 }
 0x1b9   : > { %5649 = vmatprep.subr.msk.bf16.mxu0 %vm6745_vm11, %v5647_v51  ;;  %2516 = vmatprep.mubr.f32.mxu0 %v9170_v44 }
 0x1ba   : > { %2605 = vmatprep.mubr.f32.mxu1 %v9170_v44 }
 0x1bb   : > { %v7224_v0 = vpop.permute.xlu1 %2002 }
 0x1bc   : > { %5554 = vmatmul.mubr.msk.f32.gmra.mrb[20].mxu0 %vm2010_vm12, %v6771_v46  ;;  %5560 = vmatmul.mubr.msk.f32.gmra.mrb[24].mxu1 %vm2010_vm12, %v6771_v46  ;;  %v7229_v48 = vpop.permute.xlu0 %2007 }
 0x1bd   : > { %2676 = vmatprep.mubr.f32.mxu0 %v9170_v44  ;;  %2765 = vmatprep.mubr.f32.mxu1 %v9170_v44 }
 0x1c0   : > { %5563 = vmatmul.mubr.msk.f32.vlgmr.msra.gmra.mrb[22].mxu0 %vm2010_vm12, %v6766_v29  ;;  %5569 = vmatmul.mubr.msk.f32.vlgmr.msra.gmra.mrb[26].mxu1 %vm2010_vm12, %v6766_v29 }
 0x1c1   : > { %5652 = vmatpush1.bf16.msk.msra.mxu0 %vm6745_vm11, %v5650_v55  ;;  %2682 = vmatprep.mubr.f32.mxu0 %v9170_v44 }
 0x1c2   : > { %2771 = vmatprep.mubr.f32.mxu1 %v9170_v44 }
 0x1c4   : > { %5564 = vmatmul.mubr.msk.f32.gmra.mrb[24].mxu0 %vm2010_vm12, %v6801_v26  ;;  %5570 = vmatmul.mubr.msk.f32.gmra.mrb[28].mxu1 %vm2010_vm12, %v6801_v26 }
 0x1c5   : > { %2688 = vmatprep.mubr.f32.mxu0 %v9170_v44  ;;  %2777 = vmatprep.mubr.f32.mxu1 %v9170_v44 }
 0x1c8   : > { %5565 = vmatmul.mubr.msk.f32.gmra.mrb[26].mxu0 %vm2010_vm12, %v6829_v1  ;;  %5571 = vmatmul.mubr.msk.f32.gmra.mrb[30].mxu1 %vm2010_vm12, %v6829_v1 }
 0x1c9   : > { %2694 = vmatprep.mubr.f32.mxu0 %v9170_v44  ;;  %2783 = vmatprep.mubr.f32.mxu1 %v9170_v44 }
 0x1cc   : > { %5566 = vmatmul.mubr.msk.f32.gmra.mrb[28].mxu0 %vm2010_vm12, %v6771_v46  ;;  %5572 = vmatmul.mubr.msk.f32.gmra.mrb[32].mxu1 %vm2010_vm12, %v6771_v46 }
 0x1cd   : > { %2854 = vmatprep.mubr.f32.mxu0 %v9170_v44  ;;  %3582 = vmatprep.mubr.f32.mxu1 %v9170_v44 }
 0x1d0   : > { %5575 = vmatmul.mubr.msk.f32.vlgmr.msra.gmra.mrb[30].mxu0 %vm2010_vm12, %v6766_v29 }
 0x1d1   : > { %2860 = vmatprep.mubr.f32.mxu0 %v9170_v44 }
 0x1d4   : > { %5576 = vmatmul.mubr.msk.f32.gmra.mrb[32].mxu0 %vm2010_vm12, %v6801_v26 }
 0x1d5   : > { %2866 = vmatprep.mubr.f32.mxu0 %v9170_v44 }
 0x1d8   : > { %5577 = vmatmul.mubr.msk.f32.gmra.mrb[34].mxu0 %vm2010_vm12, %v6829_v1 }
 0x1d9   : > { %2872 = vmatprep.mubr.f32.mxu0 %v9170_v44 }
 0x1dc   : > { %5578 = vmatmul.mubr.msk.f32.gmra.mrb[36].mxu0 %vm2010_vm12, %v6771_v46 }
 0x1dd   : > { %3736 = vmatprep.mubr.f32.mxu0 %v9170_v44 }
 0x204   : > { %v2144_v61 = vpop.f32.mrb[0].mxu0  ;;  %v2162_v49 = vpop.f32.mrb[0].mxu1 }
 0x205   : > { %v2146_v29 = vpop.f32.mrb[1].mxu0  ;;  %v2164_v58 = vpop.f32.mrb[1].mxu1  ;;  %v7206_v57 = vadd.f32 %v2144_v61, %v7201_v8  ;;  %v7241_v54 = vadd.f32 %v2162_v49, %v7229_v48 }
 0x206   : > { %v7212_v46 = vadd.f32 %v2146_v29, %v7201_v8  ;;  %v7250_v59 = vadd.f32 %v2164_v58, %v7229_v48 }
 0x208   : > { %v2150_v26 = vpop.f32.mrb[2].mxu0 }
 0x209   : > { %v7209_v1 = vadd.f32 %v2150_v26, %v7203_v63  ;;  %v2152_v12 = vpop.f32.mrb[3].mxu0  ;;  %v2233_v60 = vpop.f32.mrb[2].mxu1 }
 0x20a   : > { %v7215_v47 = vadd.f32 %v2152_v12, %v7203_v63  ;;  %v2235_v62 = vpop.f32.mrb[3].mxu1  ;;  %v7222_v56 = vadd.f32 %v2233_v60, %v7201_v8 }
 0x20b   : > { %v2879_v7 = vmax.f32 %v7206_v57, %v7209_v1  ;;  %v7238_v15 = vadd.f32 %v2235_v62, %v7201_v8 }
 0x20c   : > { %v2888_v52 = vmax.f32 %v7212_v46, %v7215_v47  ;;  %v2156_v11 = vpop.f32.mrb[4].mxu0 }
 0x20d   : > { %v7227_v50 = vadd.f32 %v2156_v11, %v7224_v0  ;;  %v2239_v2 = vpop.f32.mrb[4].mxu1  ;;  %v2158_v19 = vpop.f32.mrb[5].mxu0 }
 0x20e   : > { %v7232_v22 = vadd.f32 %v2239_v2, %v7203_v63  ;;  %v7235_v20 = vadd.f32 %v2158_v19, %v7224_v0  ;;  %v2241_v21 = vpop.f32.mrb[5].mxu1 }
 0x20f   : > { %v2880_v25 = vmax.f32 %v2879_v7, %v7227_v50  ;;  %v7245_v45 = vadd.f32 %v2241_v21, %v7203_v63 }
 0x210   : > { %v2897_v27 = vmax.f32 %v7222_v56, %v7232_v22  ;;  %v2889_v32 = vmax.f32 %v2888_v52, %v7235_v20  ;;  %v2322_v23 = vpop.f32.mrb[6].mxu0 }
 0x211   : > { %v2881_v30 = vmax.f32 %v2880_v25, %v7241_v54  ;;  %v2906_v33 = vmax.f32 %v7238_v15, %v7245_v45  ;;  %v2245_v31 = vpop.f32.mrb[6].mxu1  ;;  %v2324_v35 = vpop.f32.mrb[7].mxu0  ;;  %v7265_v38 = vadd.f32 %v2322_v23, %v7201_v8 }
 0x212   : > { %v2890_v36 = vmax.f32 %v2889_v32, %v7250_v59  ;;  %v7258_v42 = vadd.f32 %v2245_v31, %v7224_v0  ;;  %v2247_v43 = vpop.f32.mrb[7].mxu1  ;;  %v7272_v49 = vadd.f32 %v2324_v35, %v7201_v8 }
 0x213   : > { %v2882_v9 = vrot.slane %v2881_v30, 4  ;;  %v7261_v16 = vadd.f32 %v2247_v43, %v7224_v0 }
 0x214   : > { %v2891_v10 = vrot.slane %v2890_v36, 4  ;;  %v2898_v39 = vmax.f32 %v2897_v27, %v7258_v42  ;;  %v2328_v37 = vpop.f32.mrb[8].mxu0 }
 0x215   : > { %v2883_v34 = vmax.f32 %v2881_v30, %v2882_v9  ;;  %v2907_v51 = vmax.f32 %v2906_v33, %v7261_v16  ;;  %v2251_v41 = vpop.f32.mrb[8].mxu1  ;;  %v7269_v53 = vadd.f32 %v2328_v37, %v7203_v63  ;;  %v2330_v55 = vpop.f32.mrb[9].mxu0 }
 0x216   : > { %v2892_v61 = vmax.f32 %v2890_v36, %v2891_v10  ;;  %v7275_v29 = vadd.f32 %v2251_v41, %v7229_v48  ;;  %v2253_v58 = vpop.f32.mrb[9].mxu1  ;;  %v7278_v26 = vadd.f32 %v2330_v55, %v7203_v63 }
 0x217   : > { %v2884_v12 = vrot.slane %v2883_v34, 2  ;;  %v2915_v60 = vmax.f32 %v7265_v38, %v7269_v53  ;;  %v7283_v62 = vadd.f32 %v2253_v58, %v7229_v48 }
 0x218   : > { %v2893_v7 = vrot.slane %v2892_v61, 2  ;;  %v2899_v52 = vmax.f32 %v2898_v39, %v7275_v29  ;;  %v2924_v11 = vmax.f32 %v7272_v49, %v7278_v26  ;;  %v2334_v2 = vpop.f32.mrb[10].mxu0 }
 0x219   : > { %v2885_v19 = vmax.f32 %v2883_v34, %v2884_v12  ;;  %v2908_v21 = vmax.f32 %v2907_v51, %v7283_v62  ;;  %v7290_v25 = vadd.f32 %v2334_v2, %v7224_v0  ;;  %v2411_v27 = vpop.f32.mrb[10].mxu1  ;;  %v2336_v32 = vpop.f32.mrb[11].mxu0 }
 0x21a   : > { %v2894_v23 = vmax.f32 %v2892_v61, %v2893_v7  ;;  %v2900_v30 = vrot.slane %v2899_v52, 4  ;;  %v7293_v33 = vadd.f32 %v2336_v32, %v7224_v0  ;;  %v2413_v31 = vpop.f32.mrb[11].mxu1  ;;  %v7297_v39 = vadd.f32 %v2411_v27, %v7201_v8 }
 0x21b   : > { %v2886_v35 = vrot.slane %v2885_v19, 1  ;;  %v2909_v36 = vrot.slane %v2908_v21, 4  ;;  %v2916_v43 = vmax.f32 %v2915_v60, %v7290_v25  ;;  %v7301_v55 = vadd.f32 %v2413_v31, %v7201_v8 }
 0x21c   : > { %v2895_v9 = vrot.slane %v2894_v23, 1  ;;  %v2901_v10 = vmax.f32 %v2899_v52, %v2900_v30  ;;  %v2925_v37 = vmax.f32 %v2924_v11, %v7293_v33  ;;  %v2340_v34 = vpop.f32.mrb[12].mxu0 }
 0x21d   : > { %v2887_v51 = vmax.f32 %v2885_v19, %v2886_v35  ;;  %v2910_v41 = vmax.f32 %v2908_v21, %v2909_v36  ;;  %v7304_v61 = vadd.f32 %v2340_v34, %v7229_v48  ;;  %v2417_v58 = vpop.f32.mrb[12].mxu1  ;;  %v2342_v12 = vpop.f32.mrb[13].mxu0 }
 0x21e   : > { %v2896_v7 = vmax.f32 %v2894_v23, %v2895_v9  ;;  %v2902_v60 = vrot.slane %v2901_v10, 2  ;;  %v7307_v52 = vadd.f32 %v2417_v58, %v7203_v63  ;;  %v7310_v2 = vadd.f32 %v2342_v12, %v7229_v48  ;;  %v2419_v11 = vpop.f32.mrb[13].mxu1 }
 0x21f   : > { %v3041_v19 = vsub.f32 %v7206_v57, %v2887_v51  ;;  %v3059_v21 = vsub.f32 %v7209_v1, %v2887_v51  ;;  %v3077_v27 = vsub.f32 %v7227_v50, %v2887_v51  ;;  %v3095_v32 = vsub.f32 %v7241_v54, %v2887_v51 }
 0x220   : > { %v3042_v30 = vsub.f32 %v7212_v46, %v2896_v7  ;;  %v3060_v23 = vsub.f32 %v7215_v47, %v2896_v7  ;;  %v3078_v31 = vsub.f32 %v7235_v20, %v2896_v7  ;;  %v3096_v35 = vsub.f32 %v7250_v59, %v2896_v7 }
 0x221   : > { %v3113_v36 = vmul.f32 1.442695, %v3041_v19  ;;  %v3149_v9 = vmul.f32 1.442695, %v3059_v21  ;;  %v3185_v34 = vmul.f32 1.442695, %v3077_v27  ;;  %v2903_v58 = vmax.f32 %v2901_v10, %v2902_v60 }
 0x222   : > { %v3221_v12 = vmul.f32 1.442695, %v3095_v32  ;;  %v3115_v57 = vmul.f32 1.442695, %v3042_v30  ;;  %v3151_v44 = vmul.f32 1.442695, %v3060_v23  ;;  %v2917_v1 = vmax.f32 %v2916_v43, %v7304_v61 }
 0x223   : > { %5758 = vpow2.f32 %v3113_v36  ;;  %v3187_v50 = vmul.f32 1.442695, %v3078_v31  ;;  %v3223_v54 = vmul.f32 1.442695, %v3096_v35  ;;  %v2904_v51 = vrot.slane %v2903_v58, 1  ;;  %v2423_v46 = vpop.f32.mrb[14].mxu1 }
 0x224   : > { %5760 = vpow2.f32 %v3149_v9  ;;  %v2911_v47 = vrot.slane %v2910_v41, 2  ;;  %v2918_v28 = vrot.slane %v2917_v1, 4  ;;  %v2933_v20 = vmax.f32 %v7297_v39, %v7307_v52  ;;  %v2425_v59 = vpop.f32.mrb[15].mxu1 }
 0x225   : > { %5762 = vpow2.f32 %v3185_v34  ;;  %v2905_v7 = vmax.f32 %v2903_v58, %v2904_v51  ;;  %v2926_v10 = vmax.f32 %v2925_v37, %v7310_v2  ;;  %v7325_v60 = vadd.f32 %v2419_v11, %v7203_v63  ;;  %v2429_v43 = vpop.f32.mrb[16].mxu1 }
 0x226   : > { %5764 = vpow2.f32 %v3221_v12  ;;  %v2912_v19 = vmax.f32 %v2910_v41, %v2911_v47  ;;  %v2919_v21 = vmax.f32 %v2917_v1, %v2918_v28  ;;  %v7328_v27 = vadd.f32 %v2423_v46, %v7224_v0  ;;  %v2431_v32 = vpop.f32.mrb[17].mxu1 }
 0x227   : > { %5766 = vpow2.f32 %v3115_v57  ;;  %v3043_v30 = vsub.f32 %v7222_v56, %v2905_v7  ;;  %v3061_v23 = vsub.f32 %v7232_v22, %v2905_v7  ;;  %v3079_v31 = vsub.f32 %v7258_v42, %v2905_v7 }
 0x228   : > { %5768 = vpow2.f32 %v3151_v44  ;;  %v3097_v37 = vsub.f32 %v7275_v29, %v2905_v7  ;;  %v2913_v11 = vrot.slane %v2912_v19, 1  ;;  %v2920_v35 = vrot.slane %v2919_v21, 2 }
 0x229   : > { %5770 = vpow2.f32 %v3187_v50  ;;  %v3117_v36 = vmul.f32 1.442695, %v3043_v30  ;;  %v3153_v41 = vmul.f32 1.442695, %v3061_v23  ;;  %v3189_v28 = vmul.f32 1.442695, %v3079_v31 }
 0x22a   : > { %5772 = vpow2.f32 %v3223_v54  ;;  %v3225_v9 = vmul.f32 1.442695, %v3097_v37  ;;  %v2914_v34 = vmax.f32 %v2912_v19, %v2913_v11  ;;  %v2921_v58 = vmax.f32 %v2919_v21, %v2920_v35 }
 0x22b   : > { %5774 = vpow2.f32 %v3117_v36  ;;  %v2927_v12 = vrot.slane %v2926_v10, 4  ;;  %v2942_v56 = vmax.f32 %v7301_v55, %v7325_v60  ;;  %v2934_v22 = vmax.f32 %v2933_v20, %v7328_v27 }
 0x22c   : > { %5776 = vpow2.f32 %v3153_v41  ;;  %v3044_v44 = vsub.f32 %v7238_v15, %v2914_v34  ;;  %v3062_v42 = vsub.f32 %v7245_v45, %v2914_v34  ;;  %v3080_v29 = vsub.f32 %v7261_v16, %v2914_v34 }
 0x22d   : > { %v7340_v57 = vpop.eup %5758  ;;  %5778 = vpow2.f32 %v3189_v28  ;;  %v3098_v1 = vsub.f32 %v7283_v62, %v2914_v34  ;;  %v2922_v50 = vrot.slane %v2921_v58, 1  ;;  %v2928_v54 = vmax.f32 %v2926_v10, %v2927_v12 }
 0x22e   : > { %v7343_v51 = vpop.eup %5760  ;;  %5780 = vpow2.f32 %v3225_v9  ;;  %v3119_v46 = vmul.f32 1.442695, %v3044_v44  ;;  %v3155_v47 = vmul.f32 1.442695, %v3062_v42  ;;  %v3191_v20 = vmul.f32 1.442695, %v3080_v29 }
 0x22f   : > { %v7345_v7 = vpop.eup %5762  ;;  %v3257_v15 = vadd.f32 %v7343_v51, %v7340_v57  ;;  %v3227_v45 = vmul.f32 1.442695, %v3098_v1  ;;  %v2923_v16 = vmax.f32 %v2921_v58, %v2922_v50  ;;  %v2929_v19 = vrot.slane %v2928_v54, 2 }
 0x230   : > { %v7349_v21 = vpop.eup %5764  ;;  %5782 = vpow2.f32 %v3119_v46  ;;  %v7352_v62 = vadd.f32 %v2425_v59, %v7224_v0  ;;  %v7355_v10 = vadd.f32 %v2429_v43, %v7229_v48  ;;  %v7358_v30 = vadd.f32 %v2431_v32, %v7229_v48 }
 0x231   : > { %v7360_v23 = vpop.eup %5766  ;;  %v3258_v31 = vadd.f32 %v7345_v7, %v3257_v15  ;;  %5784 = vpow2.f32 %v3155_v47  ;;  %v3045_v37 = vsub.f32 %v7265_v38, %v2923_v16  ;;  %v3063_v11 = vsub.f32 %v7269_v53, %v2923_v16 }
 0x232   : > { %v7365_v35 = vpop.eup %5768  ;;  %5786 = vpow2.f32 %v3191_v20  ;;  %v3081_v59 = vsub.f32 %v7290_v25, %v2923_v16  ;;  %v3099_v43 = vsub.f32 %v7304_v61, %v2923_v16  ;;  %v2930_v36 = vmax.f32 %v2928_v54, %v2929_v19 }
 0x233   : > { %v7369_v41 = vpop.eup %5770  ;;  %v3259_v32 = vadd.f32 %v7349_v21, %v3258_v31  ;;  %v3266_v28 = vadd.f32 %v7365_v35, %v7360_v23  ;;  %5788 = vpow2.f32 %v3227_v45  ;;  %v3121_v9 = vmul.f32 1.442695, %v3045_v37 }
 0x234   : > { %v7374_v38 = vpop.eup %5772  ;;  %v3157_v53 = vmul.f32 1.442695, %v3063_v11  ;;  %v3193_v34 = vmul.f32 1.442695, %v3081_v59  ;;  %v3229_v58 = vmul.f32 1.442695, %v3099_v43  ;;  %v2943_v12 = vmax.f32 %v2942_v56, %v7352_v62 }
 0x235   : > { %v7377_v25 = vpop.eup %5774  ;;  %v3260_v61 = vrot.slane %v3259_v32, 4  ;;  %v3267_v44 = vadd.f32 %v7369_v41, %v3266_v28  ;;  %5790 = vpow2.f32 %v3121_v9  ;;  %v2931_v42 = vrot.slane %v2930_v36, 1 }
 0x236   : > { %v7380_v29 = vpop.eup %5776  ;;  %5792 = vpow2.f32 %v3157_v53  ;;  %v2935_v1 = vmax.f32 %v2934_v22, %v7355_v10  ;;  %v2944_v50 = vmax.f32 %v2943_v12, %v7358_v30 }
 0x237   : > { %v7384_v54 = vpop.eup %5778  ;;  %v3261_v46 = vadd.f32 %v3260_v61, %v3259_v32  ;;  %v3268_v47 = vadd.f32 %v7374_v38, %v3267_v44  ;;  %v3275_v56 = vadd.f32 %v7380_v29, %v7377_v25  ;;  %5794 = vpow2.f32 %v3193_v34 }
 0x238   : > { %v7389_v20 = vpop.eup %5780  ;;  %5796 = vpow2.f32 %v3229_v58  ;;  %v2932_v15 = vmax.f32 %v2930_v36, %v2931_v42  ;;  %v2936_v45 = vrot.slane %v2935_v1, 4  ;;  %v2945_v31 = vrot.slane %v2944_v50, 4 }
 0x239   : > { %v3262_v16 = vrot.slane %v3261_v46, 2  ;;  %v3269_v19 = vrot.slane %v3268_v47, 4  ;;  %v3276_v22 = vadd.f32 %v7384_v54, %v3275_v56 }
 0x23a   : > { %v7392_v37 = vpop.eup %5782  ;;  %v3046_v11 = vsub.f32 %v7272_v49, %v2932_v15  ;;  %v3064_v59 = vsub.f32 %v7278_v26, %v2932_v15  ;;  %v3082_v43 = vsub.f32 %v7293_v33, %v2932_v15  ;;  %v3100_v32 = vsub.f32 %v7310_v2, %v2932_v15 }
 0x23b   : > { %v7398_v28 = vpop.eup %5784  ;;  %v3263_v9 = vadd.f32 %v3262_v16, %v3261_v46  ;;  %v3270_v36 = vadd.f32 %v3269_v19, %v3268_v47  ;;  %v3277_v53 = vadd.f32 %v7389_v20, %v3276_v22  ;;  %v2937_v34 = vmax.f32 %v2935_v1, %v2936_v45 }
 0x23c   : > { %v7401_v58 = vpop.eup %5786  ;;  %v3284_v12 = vadd.f32 %v7398_v28, %v7392_v37  ;;  %v3123_v61 = vmul.f32 1.442695, %v3046_v11  ;;  %v3159_v49 = vmul.f32 1.442695, %v3064_v59  ;;  %v3195_v44 = vmul.f32 1.442695, %v3082_v43 }
 0x23d   : > { %v7405_v26 = vpop.eup %5788  ;;  %v3264_v33 = vrot.slane %v3263_v9, 1  ;;  %v3271_v42 = vrot.slane %v3270_v36, 2  ;;  %v3278_v2 = vrot.slane %v3277_v53, 4  ;;  %v3231_v56 = vmul.f32 1.442695, %v3100_v32 }
 0x23e   : > { %v3285_v46 = vadd.f32 %v7401_v58, %v3284_v12  ;;  %5798 = vpow2.f32 %v3123_v61  ;;  %v2938_v47 = vrot.slane %v2937_v34, 2  ;;  %v2946_v15 = vmax.f32 %v2944_v50, %v2945_v31 }
 0x23f   : > { %v7408_v1 = vpop.eup %5790  ;;  %v3265_v45 = vadd.f32 %v3264_v33, %v3263_v9  ;;  %v3272_v16 = vadd.f32 %v3271_v42, %v3270_v36  ;;  %v3279_v19 = vadd.f32 %v3278_v2, %v3277_v53  ;;  %5800 = vpow2.f32 %v3159_v49 }
 0x240   : > { %v7410_v22 = vpop.eup %5792  ;;  %v3286_v11 = vadd.f32 %v7405_v26, %v3285_v46  ;;  %5802 = vpow2.f32 %v3195_v44  ;;  %v2939_v59 = vmax.f32 %v2937_v34, %v2938_v47  ;;  %v2947_v43 = vrot.slane %v2946_v15, 2 }
 0x241   : > { %v7413_v40 = vpop.eup %5794  ;;  %5804 = vrcp.f32 %v3265_v45  ;;  %v3273_v32 = vrot.slane %v3272_v16, 1  ;;  %v3280_v12 = vrot.slane %v3279_v19, 2  ;;  %v3293_v50 = vadd.f32 %v7410_v22, %v7408_v1 }
 0x242   : > { %v7417_v31 = vpop.eup %5796  ;;  %v3287_v9 = vrot.slane %v3286_v11, 4  ;;  %v2940_v36 = vrot.slane %v2939_v59, 1  ;;  %v2948_v53 = vmax.f32 %v2946_v15, %v2947_v43  ;;  %5806 = vpow2.f32 %v3231_v56 }
 0x243   : > { %v3274_v61 = vadd.f32 %v3273_v32, %v3272_v16  ;;  %v3281_v49 = vadd.f32 %v3280_v12, %v3279_v19  ;;  %v3294_v33 = vadd.f32 %v7413_v40, %v3293_v50 }
 0x244   : > { %v3288_v34 = vadd.f32 %v3287_v9, %v3286_v11  ;;  %v2941_v44 = vmax.f32 %v2939_v59, %v2940_v36  ;;  %v2949_v42 = vrot.slane %v2948_v53, 1 }
 0x245   : > { %5808 = vrcp.f32 %v3274_v61  ;;  %v3282_v2 = vrot.slane %v3281_v49, 1  ;;  %v3295_v46 = vadd.f32 %v7417_v31, %v3294_v33 }
 0x246   : > { %v3289_v47 = vrot.slane %v3288_v34, 2  ;;  %v3047_v45 = vsub.f32 %v7297_v39, %v2941_v44  ;;  %v3065_v24 = vsub.f32 %v7307_v52, %v2941_v44  ;;  %v3083_v17 = vsub.f32 %v7328_v27, %v2941_v44 }
 0x247   : > { %v3283_v15 = vadd.f32 %v3282_v2, %v3281_v49  ;;  %v3296_v16 = vrot.slane %v3295_v46, 4  ;;  %v3101_v19 = vsub.f32 %v7355_v10, %v2941_v44  ;;  %v2950_v43 = vmax.f32 %v2948_v53, %v2949_v42 }
 0x248   : > { %v7425_v56 = vpop.eup %5798  ;;  %v3290_v11 = vadd.f32 %v3289_v47, %v3288_v34  ;;  %v3125_v59 = vmul.f32 1.442695, %v3047_v45  ;;  %v3161_v32 = vmul.f32 1.442695, %v3065_v24  ;;  %v3197_v12 = vmul.f32 1.442695, %v3083_v17 }
 0x249   : > { %v7427_v50 = vpop.eup %5800  ;;  %5810 = vrcp.f32 %v3283_v15  ;;  %v3297_v9 = vadd.f32 %v3296_v16, %v3295_v46  ;;  %v3233_v39 = vmul.f32 1.442695, %v3101_v19  ;;  %v3048_v52 = vsub.f32 %v7301_v55, %v2950_v43 }
 0x24a   : > { %v7430_v36 = vpop.eup %5802  ;;  %v3291_v27 = vrot.slane %v3290_v11, 1  ;;  %v3302_v10 = vadd.f32 %v7427_v50, %v7425_v56  ;;  %5812 = vpow2.f32 %v3125_v59  ;;  %v3066_v53 = vsub.f32 %v7325_v60, %v2950_v43 }
 0x24b   : > { %v5805_v61 = vpop.eup %5804  ;;  %v3298_v49 = vrot.slane %v3297_v9, 2  ;;  %5814 = vpow2.f32 %v3161_v32  ;;  %v3084_v17 = vsub.f32 %v7352_v62, %v2950_v43  ;;  %v3102_v24 = vsub.f32 %v7358_v30, %v2950_v43 }
 0x24c   : > { %v3292_v33 = vadd.f32 %v3291_v27, %v3290_v11  ;;  %v3303_v34 = vadd.f32 %v7430_v36, %v3302_v10  ;;  %5816 = vpow2.f32 %v3197_v12  ;;  %v3127_v55 = vmul.f32 1.442695, %v3048_v52  ;;  %v7438_v44 = vpop.eup %5806 }
 0x24d   : > { %v3299_v42 = vadd.f32 %v3298_v49, %v3297_v9  ;;  %5818 = vpow2.f32 %v3233_v39  ;;  %v3163_v2 = vmul.f32 1.442695, %v3066_v53  ;;  %v3199_v46 = vmul.f32 1.442695, %v3084_v17 }
 0x24e   : > { %5820 = vrcp.f32 %v3292_v33  ;;  %v3304_v60 = vadd.f32 %v7438_v44, %v3303_v34  ;;  %v3235_v47 = vmul.f32 1.442695, %v3102_v24  ;;  %v3437_v45 = vmul.f32 %v5805_v61, %v7340_v57 }
 0x24f   : > { %v5809_v62 = vpop.eup %5808  ;;  %v3300_v15 = vrot.slane %v3299_v42, 1  ;;  %5822 = vpow2.f32 %v3127_v55  ;;  %v3455_v30 = vmul.f32 %v5805_v61, %v7343_v51  ;;  %v3473_v16 = vmul.f32 %v5805_v61, %v7345_v7 }
 0x250   : > { %v3305_v19 = vrot.slane %v3304_v60, 4  ;;  %5824 = vpow2.f32 %v3163_v2  ;;  %v3438_v43 = vmul.f32 %v5809_v62, %v7360_v23  ;;  %v3456_v11 = vmul.f32 %v5809_v62, %v7365_v35  ;;  %v7471_v2 = vld [vmem:[%s9167_s4] sm:$0xff] }
 0x251   : > { %v3301_v59 = vadd.f32 %v3300_v15, %v3299_v42  ;;  %5826 = vpow2.f32 %v3199_v46  ;;  %v5655_v32 = vpack.c.bf16 %v3455_v30, %v3437_v45  ;;  %v3474_v12 = vmul.f32 %v5809_v62, %v7369_v41 }
 0x252   : > { %v3306_v9 = vadd.f32 %v3305_v19, %v3304_v60  ;;  %5828 = vpow2.f32 %v3235_v47  ;;  %v5653_v57 = vpack.c.bf16 %v3456_v11, %v3438_v43  ;;  %v3492_v39 = vmul.f32 %v5809_v62, %v7374_v38  ;;  %v7491_v11 = vld [vmem:[%s9167_s4 + $0x8] sm:$0x1] }
 0x253   : > { %v5811_v52 = vpop.eup %5810  ;;  %5830 = vrcp.f32 %v3301_v59  ;;  %v3491_v51 = vmul.f32 %v5805_v61, %v7349_v21  ;;  %v9238_v43 = vmov 0.0  }
 0x254   : > { %v7449_v7 = vpop.eup %5812  ;;  %v3307_v27 = vrot.slane %v3306_v9, 2  ;;  %5654 = vmatprep.subr.bf16.mxu1 %v5653_v57  ;;  %v5657_v23 = vpack.c.bf16 %v3492_v39, %v3474_v12  ;;  %v3439_v35 = vmul.f32 %v5811_v52, %v7377_v25  ;;  %v3457_v10 = vmul.f32 %v5811_v52, %v7380_v29 }
 0x255   : > { %v7453_v53 = vpop.eup %5814  ;;  %5656 = vmatpush1.bf16.msra.mxu1 %v5655_v32  ;;  %v5659_v41 = vpack.c.bf16 %v3491_v51, %v3473_v16  ;;  %v3475_v49 = vmul.f32 %v5811_v52, %v7384_v54  ;;  %v3493_v38 = vmul.f32 %v5811_v52, %v7389_v20 }
 0x256   : > { %v7457_v17 = vpop.eup %5816  ;;  %v3308_v21 = vadd.f32 %v3307_v27, %v3306_v9  ;;  %v3311_v61 = vadd.f32 %v7453_v53, %v7449_v7  ;;  %5658 = vmatprep.subr.bf16.mxu1 %v5657_v23  ;;  %v5663_v24 = vpack.c.bf16 %v3457_v10, %v3439_v35 }
 0x257   : > { %v7461_v33 = vpop.eup %5818  ;;  %v5667_v25 = vpack.c.bf16 %v3493_v38, %v3475_v49 }
 0x258   : > { %v5821_v29 = vpop.eup %5820  ;;  %v3309_v34 = vrot.slane %v3308_v21, 1  ;;  %v3312_v55 = vadd.f32 %v7457_v17, %v3311_v61 }
 0x259   : > { %v7464_v42 = vpop.eup %5822  ;;  %5660 = vmatpush1.bf16.msra.mxu1 %v5659_v41  ;;  %v3440_v54 = vmul.f32 %v5821_v29, %v7392_v37  ;;  %v3458_v20 = vmul.f32 %v5821_v29, %v7398_v28  ;;  %v3476_v46 = vmul.f32 %v5821_v29, %v7401_v58  ;;  %v3494_v60 = vmul.f32 %v5821_v29, %v7405_v26 }
 0x25a   : > { %v7475_v47 = vpop.eup %5824  ;;  %v3310_v45 = vadd.f32 %v3309_v34, %v3308_v21  ;;  %v3313_v62 = vadd.f32 %v7461_v33, %v3312_v55 }
 0x25b   : > { %v7478_v15 = vpop.eup %5826  ;;  %v3320_v37 = vadd.f32 %v7475_v47, %v7464_v42  ;;  %v5661_v28 = vpack.c.bf16 %v3458_v20, %v3440_v54  ;;  %v5665_v30 = vpack.c.bf16 %v3494_v60, %v3476_v46 }
 0x25c   : > { %v7482_v16 = vpop.eup %5828  ;;  %5832 = vrcp.f32 %v3310_v45  ;;  %v3314_v19 = vrot.slane %v3313_v62, 4  ;;  %5579 = vmatmul.mubr.msk.f32.vlgmr.msra.gmra.mrb[34].mxu1 %vm3511_vm13, %v7471_v2 }
 0x25d   : > { %v5831_v58 = vpop.eup %5830  ;;  %v3321_v26 = vadd.f32 %v7478_v15, %v3320_v37  ;;  %5662 = vmatprep.subr.bf16.mxu1 %v5661_v28  ;;  %3588 = vmatprep.mubr.f32.mxu1 %v9238_v43 }
 0x25e   : > { %v3315_v59 = vadd.f32 %v3314_v19, %v3313_v62  ;;  %5664 = vmatpush1.bf16.msra.mxu1 %v5663_v24  ;;  %v3441_v32 = vmul.f32 %v5831_v58, %v7408_v1  ;;  %v3459_v12 = vmul.f32 %v5831_v58, %v7410_v22  ;;  %v3477_v9 = vmul.f32 %v5831_v58, %v7413_v40 }
 0x25f   : > { %v3322_v57 = vadd.f32 %v7482_v16, %v3321_v26  ;;  %5666 = vmatprep.subr.bf16.mxu1 %v5665_v30  ;;  %v3495_v39 = vmul.f32 %v5831_v58, %v7417_v31 }
 0x260   : > { %v3316_v52 = vrot.slane %v3315_v59, 2  ;;  %v5671_v51 = vpack.c.bf16 %v3459_v12, %v3441_v32  ;;  %5580 = vmatmul.mubr.msk.f32.gmra.mrb[36].mxu1 %vm3511_vm13, %v7491_v11 }
 0x261   : > { %v3323_v27 = vrot.slane %v3322_v57, 4  ;;  %v5675_v23 = vpack.c.bf16 %v3495_v39, %v3477_v9  ;;  %3659 = vmatprep.mubr.f32.mxu1 %v9238_v43 }
 0x262   : > { %v3317_v35 = vadd.f32 %v3316_v52, %v3315_v59  ;;  %5668 = vmatpush1.bf16.msra.mxu1 %v5667_v25 }
 0x263   : > { %v3324_v1 = vadd.f32 %v3323_v27, %v3322_v57 }
 0x264   : > { %v3318_v22 = vrot.slane %v3317_v35, 1 }
 0x265   : > { %v3325_v10 = vrot.slane %v3324_v1, 2  ;;  %5581 = vmatmul.mubr.msk.f32.vlgmr.msra.gmra.mrb[38].mxu1 %vm3511_vm13, %v7471_v2 }
 0x266   : > { %v5833_v40 = vpop.eup %5832  ;;  %v3319_v41 = vadd.f32 %v3318_v22, %v3317_v35  ;;  %3665 = vmatprep.mubr.f32.mxu1 %v9238_v43 }
 0x267   : > { %v3326_v31 = vadd.f32 %v3325_v10, %v3324_v1  ;;  %v3442_v49 = vmul.f32 %v5833_v40, %v7425_v56  ;;  %v3460_v38 = vmul.f32 %v5833_v40, %v7427_v50  ;;  %v3478_v21 = vmul.f32 %v5833_v40, %v7430_v36 }
 0x268   : > { %5834 = vrcp.f32 %v3319_v41  ;;  %v3496_v61 = vmul.f32 %v5833_v40, %v7438_v44 }
 0x269   : > { %v3327_v24 = vrot.slane %v3326_v31, 1  ;;  %v5669_v25 = vpack.c.bf16 %v3460_v38, %v3442_v49  ;;  %5582 = vmatmul.mubr.msk.f32.gmra.mrb[40].mxu1 %vm3511_vm13, %v7491_v11 }
 0x26a   : > { %v5673_v29 = vpack.c.bf16 %v3496_v61, %v3478_v21  ;;  %3813 = vmatprep.mubr.f32.mxu1 %v9238_v43 }
 0x26b   : > { %v3328_v34 = vadd.f32 %v3327_v24, %v3326_v31  ;;  %5670 = vmatprep.subr.bf16.mxu0 %v5669_v25 }
 0x26c   : > { %5672 = vmatpush1.bf16.msra.mxu0 %v5671_v51 }
 0x26d   : > { %5836 = vrcp.f32 %v3328_v34  ;;  %5674 = vmatprep.subr.bf16.mxu0 %v5673_v29 }
 0x270   : > { %5676 = vmatpush1.bf16.msra.mxu0 %v5675_v23 }
 0x272   : > { %v5835_v56 = vpop.eup %5834 }
 0x273   : > { %v3443_v50 = vmul.f32 %v5835_v56, %v7449_v7  ;;  %v3461_v36 = vmul.f32 %v5835_v56, %v7453_v53  ;;  %v3479_v44 = vmul.f32 %v5835_v56, %v7457_v17  ;;  %v3497_v55 = vmul.f32 %v5835_v56, %v7461_v33  ;;  %5583 = vmatmul.mubr.msk.f32.vlgmr.msra.gmra.mrb[38].mxu0 %vm3511_vm13, %v7471_v2 }
 0x274   : > { %3742 = vmatprep.mubr.f32.mxu0 %v9238_v43 }
 0x275   : > { %v5679_v54 = vpack.c.bf16 %v3461_v36, %v3443_v50  ;;  %v5683_v20 = vpack.c.bf16 %v3497_v55, %v3479_v44 }
 0x277   : > { %v5837_v46 = vpop.eup %5836  ;;  %5584 = vmatmul.mubr.msk.f32.gmra.mrb[40].mxu0 %vm3511_vm13, %v7491_v11 }
 0x278   : > { %v3444_v60 = vmul.f32 %v5837_v46, %v7464_v42  ;;  %v3462_v7 = vmul.f32 %v5837_v46, %v7475_v47  ;;  %v3480_v53 = vmul.f32 %v5837_v46, %v7478_v15  ;;  %v3498_v17 = vmul.f32 %v5837_v46, %v7482_v16  ;;  %3890 = vmatprep.mubr.f32.mxu0 %v9238_v43 }
 0x27a   : > { %v5677_v33 = vpack.c.bf16 %v3462_v7, %v3444_v60  ;;  %v5681_v45 = vpack.c.bf16 %v3498_v17, %v3480_v53 }
 0x27c   : > { %5678 = vmatprep.subr.bf16.mxu1 %v5677_v33 }
 0x27d   : > { %5680 = vmatpush1.bf16.msra.mxu1 %v5679_v54 }
 0x27e   : > { %5682 = vmatprep.subr.bf16.mxu1 %v5681_v45 }
 0x281   : > { %5684 = vmatpush1.bf16.msra.mxu1 %v5683_v20 }
 0x283   : > { %v2500_v62 = vpop.f32.mrb[14].mxu0  ;;  %v2589_v37 = vpop.f32.mrb[18].mxu1 }
 0x284   : > { %v2502_v28 = vpop.f32.mrb[15].mxu0  ;;  %v2591_v30 = vpop.f32.mrb[19].mxu1  ;;  %5585 = vmatmul.mubr.msk.f32.vlgmr.msra.gmra.mrb[42].mxu1 %vm3511_vm13, %v7471_v2  ;;  %v7529_v15 = vadd.f32 %v2500_v62, %v7201_v8  ;;  %v7532_v16 = vadd.f32 %v2589_v37, %v7201_v8 }
 0x285   : > { %3819 = vmatprep.mubr.f32.mxu1 %v9238_v43  ;;  %v7543_v2 = vadd.f32 %v2502_v28, %v7201_v8  ;;  %v7546_v32 = vadd.f32 %v2591_v30, %v7201_v8 }
 0x287   : > { %v2506_v42 = vpop.f32.mrb[16].mxu0  ;;  %v2595_v47 = vpop.f32.mrb[20].mxu1 }
 0x288   : > { %v7535_v19 = vadd.f32 %v2506_v42, %v7203_v63  ;;  %v7538_v58 = vadd.f32 %v2595_v47, %v7203_v63  ;;  %v2508_v26 = vpop.f32.mrb[17].mxu0  ;;  %v2597_v59 = vpop.f32.mrb[21].mxu1  ;;  %5586 = vmatmul.mubr.msk.f32.gmra.mrb[44].mxu1 %vm3511_vm13, %v7491_v11 }
 0x289   : > { %v7549_v12 = vadd.f32 %v2508_v26, %v7203_v63  ;;  %v7552_v9 = vadd.f32 %v2597_v59, %v7203_v63  ;;  %3967 = vmatprep.mubr.f32.mxu1 %v9238_v43 }
 0x28a   : > { %v2951_v57 = vmax.f32 %v7529_v15, %v7535_v19  ;;  %v2969_v11 = vmax.f32 %v7532_v16, %v7538_v58 }
 0x28b   : > { %v2960_v39 = vmax.f32 %v7543_v2, %v7549_v12  ;;  %v2978_v52 = vmax.f32 %v7546_v32, %v7552_v9  ;;  %v2512_v51 = vpop.f32.mrb[18].mxu0  ;;  %v2601_v27 = vpop.f32.mrb[22].mxu1 }
 0x28c   : > { %v7564_v23 = vadd.f32 %v2512_v51, %v7224_v0  ;;  %v7567_v35 = vadd.f32 %v2601_v27, %v7224_v0  ;;  %v2514_v1 = vpop.f32.mrb[19].mxu0  ;;  %v2603_v22 = vpop.f32.mrb[23].mxu1 }
 0x28d   : > { %v7570_v10 = vadd.f32 %v2514_v1, %v7224_v0  ;;  %v7573_v40 = vadd.f32 %v2603_v22, %v7224_v0 }
 0x28e   : > { %v2952_v41 = vmax.f32 %v2951_v57, %v7564_v23  ;;  %v2970_v31 = vmax.f32 %v2969_v11, %v7567_v35 }
 0x28f   : > { %v2961_v49 = vmax.f32 %v2960_v39, %v7570_v10  ;;  %v2979_v38 = vmax.f32 %v2978_v52, %v7573_v40  ;;  %v2518_v21 = vpop.f32.mrb[20].mxu0  ;;  %v2607_v61 = vpop.f32.mrb[24].mxu1 }
 0x290   : > { %v7580_v24 = vadd.f32 %v2518_v21, %v7229_v48  ;;  %v7583_v25 = vadd.f32 %v2607_v61, %v7229_v48  ;;  %v2520_v29 = vpop.f32.mrb[21].mxu0  ;;  %v2609_v34 = vpop.f32.mrb[25].mxu1 }
 0x291   : > { %v7586_v56 = vadd.f32 %v2520_v29, %v7229_v48  ;;  %v7589_v50 = vadd.f32 %v2609_v34, %v7229_v48 }
 0x292   : > { %v2953_v36 = vmax.f32 %v2952_v41, %v7580_v24  ;;  %v2971_v44 = vmax.f32 %v2970_v31, %v7583_v25 }
 0x293   : > { %v2962_v55 = vmax.f32 %v2961_v49, %v7586_v56  ;;  %v2980_v54 = vmax.f32 %v2979_v38, %v7589_v50  ;;  %v2678_v20 = vpop.f32.mrb[22].mxu0  ;;  %v2767_v46 = vpop.f32.mrb[26].mxu1 }
 0x294   : > { %v2954_v60 = vrot.slane %v2953_v36, 4  ;;  %v2972_v7 = vrot.slane %v2971_v44, 4  ;;  %v2680_v53 = vpop.f32.mrb[23].mxu0  ;;  %v2769_v17 = vpop.f32.mrb[27].mxu1  ;;  %v7596_v28 = vadd.f32 %v2678_v20, %v7201_v8  ;;  %v7599_v30 = vadd.f32 %v2767_v46, %v7201_v8 }
 0x295   : > { %v2963_v33 = vrot.slane %v2962_v55, 4  ;;  %v2981_v45 = vrot.slane %v2980_v54, 4  ;;  %v7602_v26 = vadd.f32 %v2680_v53, %v7201_v8  ;;  %v7605_v59 = vadd.f32 %v2769_v17, %v7201_v8 }
 0x296   : > { %v2955_v62 = vmax.f32 %v2953_v36, %v2954_v60  ;;  %v2973_v37 = vmax.f32 %v2971_v44, %v2972_v7 }
 0x297   : > { %v2964_v42 = vmax.f32 %v2962_v55, %v2963_v33  ;;  %v2982_v47 = vmax.f32 %v2980_v54, %v2981_v45  ;;  %v2684_v57 = vpop.f32.mrb[24].mxu0  ;;  %v2773_v11 = vpop.f32.mrb[28].mxu1 }
 0x298   : > { %v2956_v39 = vrot.slane %v2955_v62, 2  ;;  %v2974_v52 = vrot.slane %v2973_v37, 2  ;;  %v7608_v51 = vadd.f32 %v2684_v57, %v7203_v63  ;;  %v7611_v27 = vadd.f32 %v2773_v11, %v7203_v63  ;;  %v2686_v1 = vpop.f32.mrb[25].mxu0  ;;  %v2775_v22 = vpop.f32.mrb[29].mxu1 }
 0x299   : > { %v2965_v41 = vrot.slane %v2964_v42, 2  ;;  %v2983_v31 = vrot.slane %v2982_v47, 2  ;;  %v7614_v49 = vadd.f32 %v2686_v1, %v7203_v63  ;;  %v7617_v38 = vadd.f32 %v2775_v22, %v7203_v63 }
 0x29a   : > { %v2957_v21 = vmax.f32 %v2955_v62, %v2956_v39  ;;  %v2975_v61 = vmax.f32 %v2973_v37, %v2974_v52  ;;  %v2987_v29 = vmax.f32 %v7596_v28, %v7608_v51  ;;  %v3005_v34 = vmax.f32 %v7599_v30, %v7611_v27 }
 0x29b   : > { %v2966_v36 = vmax.f32 %v2964_v42, %v2965_v41  ;;  %v2984_v44 = vmax.f32 %v2982_v47, %v2983_v31  ;;  %v2996_v55 = vmax.f32 %v7602_v26, %v7614_v49  ;;  %v3014_v54 = vmax.f32 %v7605_v59, %v7617_v38  ;;  %v2690_v20 = vpop.f32.mrb[26].mxu0  ;;  %v2779_v46 = vpop.f32.mrb[30].mxu1 }
 0x29c   : > { %v2958_v60 = vrot.slane %v2957_v21, 1  ;;  %v2976_v7 = vrot.slane %v2975_v61, 1  ;;  %v7628_v53 = vadd.f32 %v2690_v20, %v7224_v0  ;;  %v7631_v17 = vadd.f32 %v2779_v46, %v7224_v0  ;;  %v2692_v33 = vpop.f32.mrb[27].mxu0  ;;  %v2781_v45 = vpop.f32.mrb[31].mxu1 }
 0x29d   : > { %v2967_v62 = vrot.slane %v2966_v36, 1  ;;  %v2985_v37 = vrot.slane %v2984_v44, 1  ;;  %v7634_v42 = vadd.f32 %v2692_v33, %v7224_v0  ;;  %v7637_v47 = vadd.f32 %v2781_v45, %v7224_v0 }
 0x29e   : > { %v2959_v57 = vmax.f32 %v2957_v21, %v2958_v60  ;;  %v2977_v11 = vmax.f32 %v2975_v61, %v2976_v7  ;;  %v2988_v39 = vmax.f32 %v2987_v29, %v7628_v53  ;;  %v3006_v52 = vmax.f32 %v3005_v34, %v7631_v17 }
 0x29f   : > { %v2968_v1 = vmax.f32 %v2966_v36, %v2967_v62  ;;  %v2986_v22 = vmax.f32 %v2984_v44, %v2985_v37  ;;  %v2997_v41 = vmax.f32 %v2996_v55, %v7634_v42  ;;  %v3015_v31 = vmax.f32 %v3014_v54, %v7637_v47  ;;  %v2696_v20 = vpop.f32.mrb[28].mxu0  ;;  %v2785_v46 = vpop.f32.mrb[32].mxu1 }
 0x2a0   : > { %v3049_v33 = vsub.f32 %v7529_v15, %v2959_v57  ;;  %v3067_v18 = vsub.f32 %v7535_v19, %v2959_v57  ;;  %v3085_v45 = vsub.f32 %v7564_v23, %v2959_v57  ;;  %v3103_v21 = vsub.f32 %v7580_v24, %v2959_v57  ;;  %v2698_v61 = vpop.f32.mrb[29].mxu0  ;;  %v2787_v29 = vpop.f32.mrb[33].mxu1 }
 0x2a1   : > { %v3051_v34 = vsub.f32 %v7532_v16, %v2977_v11  ;;  %v3069_v36 = vsub.f32 %v7538_v58, %v2977_v11  ;;  %v3087_v44 = vsub.f32 %v7567_v35, %v2977_v11  ;;  %v3105_v55 = vsub.f32 %v7583_v25, %v2977_v11 }
 0x2a2   : > { %v3129_v54 = vmul.f32 1.442695, %v3049_v33  ;;  %v3165_v60 = vmul.f32 1.442695, %v3067_v18  ;;  %v3201_v7 = vmul.f32 1.442695, %v3085_v45  ;;  %v3050_v15 = vsub.f32 %v7543_v2, %v2968_v1 }
 0x2a3   : > { %v3237_v19 = vmul.f32 1.442695, %v3103_v21  ;;  %v3133_v62 = vmul.f32 1.442695, %v3051_v34  ;;  %v3169_v23 = vmul.f32 1.442695, %v3069_v36  ;;  %v3068_v24 = vsub.f32 %v7549_v12, %v2968_v1 }
 0x2a4   : > { %5838 = vpow2.f32 %v3129_v54  ;;  %v3205_v37 = vmul.f32 1.442695, %v3087_v44  ;;  %v3241_v57 = vmul.f32 1.442695, %v3105_v55  ;;  %v3086_v16 = vsub.f32 %v7570_v10, %v2968_v1  ;;  %v2856_v58 = vpop.f32.mrb[30].mxu0 }
 0x2a5   : > { %5840 = vpow2.f32 %v3165_v60  ;;  %v3104_v35 = vsub.f32 %v7586_v56, %v2968_v1  ;;  %v3131_v25 = vmul.f32 1.442695, %v3050_v15  ;;  %v3167_v11 = vmul.f32 1.442695, %v3068_v24  ;;  %v2858_v18 = vpop.f32.mrb[31].mxu0 }
 0x2a6   : > { %5842 = vpow2.f32 %v3201_v7  ;;  %v3203_v33 = vmul.f32 1.442695, %v3086_v16  ;;  %v3052_v2 = vsub.f32 %v7546_v32, %v2986_v22  ;;  %v3070_v45 = vsub.f32 %v7552_v9, %v2986_v22 }
 0x2a7   : > { %5844 = vpow2.f32 %v3237_v19  ;;  %v3239_v12 = vmul.f32 1.442695, %v3104_v35  ;;  %v3088_v21 = vsub.f32 %v7573_v40, %v2986_v22  ;;  %v3106_v34 = vsub.f32 %v7589_v50, %v2986_v22  ;;  %v2862_v10 = vpop.f32.mrb[32].mxu0 }
 0x2a8   : > { %5846 = vpow2.f32 %v3133_v62  ;;  %v3135_v36 = vmul.f32 1.442695, %v3052_v2  ;;  %v3171_v44 = vmul.f32 1.442695, %v3070_v45  ;;  %v7660_v56 = vadd.f32 %v2696_v20, %v7229_v48  ;;  %v2864_v1 = vpop.f32.mrb[33].mxu0 }
 0x2a9   : > { %5848 = vpow2.f32 %v3169_v23  ;;  %v3207_v55 = vmul.f32 1.442695, %v3088_v21  ;;  %v3243_v54 = vmul.f32 1.442695, %v3106_v34  ;;  %v7663_v32 = vadd.f32 %v2785_v46, %v7229_v48 }
 0x2aa   : > { %5850 = vpow2.f32 %v3205_v37  ;;  %v2989_v9 = vmax.f32 %v2988_v39, %v7660_v56  ;;  %v7667_v40 = vadd.f32 %v2698_v61, %v7229_v48  ;;  %v7670_v50 = vadd.f32 %v2787_v29, %v7229_v48 }
 0x2ab   : > { %5852 = vpow2.f32 %v3241_v57  ;;  %v3007_v22 = vmax.f32 %v3006_v52, %v7663_v32  ;;  %v7674_v20 = vadd.f32 %v2856_v58, %v7201_v8  ;;  %v7677_v60 = vadd.f32 %v2858_v18, %v7201_v8  ;;  %v2868_v46 = vpop.f32.mrb[34].mxu0 }
 0x2ac   : > { %5854 = vpow2.f32 %v3131_v25  ;;  %v2990_v7 = vrot.slane %v2989_v9, 4  ;;  %v2998_v39 = vmax.f32 %v2997_v41, %v7667_v40  ;;  %v3016_v61 = vmax.f32 %v3015_v31, %v7670_v50  ;;  %v2870_v15 = vpop.f32.mrb[35].mxu0 }
 0x2ad   : > { %5856 = vpow2.f32 %v3167_v11  ;;  %v3008_v29 = vrot.slane %v3007_v22, 4  ;;  %v7682_v19 = vadd.f32 %v2862_v10, %v7203_v63  ;;  %v7685_v52 = vadd.f32 %v2864_v1, %v7203_v63 }
 0x2ae   : > { %v7687_v62 = vpop.eup %5838  ;;  %5858 = vpow2.f32 %v3203_v33  ;;  %v2991_v8 = vmax.f32 %v2989_v9, %v2990_v7  ;;  %v2999_v23 = vrot.slane %v2998_v39, 4  ;;  %v3017_v24 = vrot.slane %v3016_v61, 4 }
 0x2af   : > { %v7689_v37 = vpop.eup %5840  ;;  %5860 = vpow2.f32 %v3239_v12  ;;  %v3009_v41 = vmax.f32 %v3007_v22, %v3008_v29  ;;  %v3023_v31 = vmax.f32 %v7674_v20, %v7682_v19  ;;  %v3032_v57 = vmax.f32 %v7677_v60, %v7685_v52  ;;  %v2874_v16 = vpop.f32.mrb[36].mxu0 }
 0x2b0   : > { %v7695_v58 = vpop.eup %5842  ;;  %v3329_v63 = vadd.f32 %v7689_v37, %v7687_v62  ;;  %5862 = vpow2.f32 %v3135_v36  ;;  %v2992_v35 = vrot.slane %v2991_v8, 2  ;;  %v3000_v25 = vmax.f32 %v2998_v39, %v2999_v23  ;;  %v7699_v11 = vpop.f32.mrb[37].mxu0 }
 0x2b1   : > { %v7701_v18 = vpop.eup %5844  ;;  %5864 = vpow2.f32 %v3171_v44  ;;  %v3010_v33 = vrot.slane %v3009_v41, 2  ;;  %v3018_v2 = vmax.f32 %v3016_v61, %v3017_v24  ;;  %v7704_v45 = vadd.f32 %v2868_v46, %v7224_v0 }
 0x2b2   : > { %v7706_v12 = vpop.eup %5846  ;;  %v3330_v21 = vadd.f32 %v7695_v58, %v3329_v63  ;;  %v2993_v34 = vmax.f32 %v2991_v8, %v2992_v35  ;;  %v3001_v10 = vrot.slane %v3000_v25, 2  ;;  %5866 = vpow2.f32 %v3207_v55 }
 0x2b3   : > { %v7709_v1 = vpop.eup %5848  ;;  %v3011_v36 = vmax.f32 %v3009_v41, %v3010_v33  ;;  %v3019_v9 = vrot.slane %v3018_v2, 2  ;;  %v3024_v22 = vmax.f32 %v3023_v31, %v7704_v45  ;;  %5868 = vpow2.f32 %v3243_v54 }
 0x2b4   : > { %v7712_v7 = vpop.eup %5850  ;;  %v3331_v44 = vadd.f32 %v7701_v18, %v3330_v21  ;;  %v3347_v46 = vadd.f32 %v7709_v1, %v7706_v12  ;;  %v2994_v39 = vrot.slane %v2993_v34, 1  ;;  %v3002_v61 = vmax.f32 %v3000_v25, %v3001_v10 }
 0x2b5   : > { %v7717_v29 = vpop.eup %5852  ;;  %v3012_v8 = vrot.slane %v3011_v36, 1  ;;  %v7720_v23 = vadd.f32 %v2870_v15, %v7224_v0  ;;  %v7723_v55 = vadd.f32 %v2874_v16, %v7229_v48  ;;  %v3020_v35 = vmax.f32 %v3018_v2, %v3019_v9 }
 0x2b6   : > { %v7725_v24 = vpop.eup %5854  ;;  %v3332_v41 = vrot.slane %v3331_v44, 4  ;;  %v3348_v31 = vadd.f32 %v7712_v7, %v3347_v46  ;;  %v2995_v63 = vmax.f32 %v2993_v34, %v2994_v39  ;;  %v3003_v21 = vrot.slane %v3002_v61, 1 }
 0x2b7   : > { %9239 = vst [vmem:[#allocation15_spill] sm:$0xff] %v7720_v23  ;;  %v7728_v33 = vpop.eup %5856  ;;  %v3013_v25 = vmax.f32 %v3011_v36, %v3012_v8  ;;  %v7731_v54 = vmax.f32 %v3032_v57, %v7720_v23  ;;  %v7734_v0 = vmax.f32 %v3024_v22, %v7723_v55 }
 0x2b8   : > { %v7736_v15 = vpop.eup %5858  ;;  %v3333_v16 = vadd.f32 %v3332_v41, %v3331_v44  ;;  %v3349_v10 = vadd.f32 %v7717_v29, %v3348_v31  ;;  %v3338_v46 = vadd.f32 %v7728_v33, %v7725_v24  ;;  %v3053_v2 = vsub.f32 %v7596_v28, %v2995_v63 }
 0x2b9   : > { %9240 = vst [vmem:[#allocation16_spill] sm:$0xff] %v7736_v15  ;;  %v7742_v34 = vpop.eup %5860  ;;  %v3071_v36 = vsub.f32 %v7608_v51, %v2995_v63  ;;  %v3089_v57 = vsub.f32 %v7628_v53, %v2995_v63  ;;  %v3107_v9 = vsub.f32 %v7660_v56, %v2995_v63  ;;  %v3055_v22 = vsub.f32 %v7599_v30, %v3013_v25 }
 0x2ba   : > { %9241 = vst [vmem:[#allocation17_spill] sm:$0xff] %v7742_v34  ;;  %v7748_v39 = vpop.eup %5862  ;;  %v3334_v44 = vrot.slane %v3333_v16, 2  ;;  %v3350_v8 = vrot.slane %v3349_v10, 4  ;;  %v3339_v41 = vadd.f32 %v7736_v15, %v3338_v46  ;;  %v3137_v31 = vmul.f32 1.442695, %v3053_v2 }
 0x2bb   : > { %v7751_v13 = vpop.eup %5864  ;;  %v3173_v28 = vmul.f32 1.442695, %v3071_v36  ;;  %v3209_v14 = vmul.f32 1.442695, %v3089_v57  ;;  %v3073_v5 = vsub.f32 %v7611_v27, %v3013_v25  ;;  %v3021_v51 = vrot.slane %v3020_v35, 1 }
 0x2bc   : > { %v3335_v3 = vadd.f32 %v3334_v44, %v3333_v16  ;;  %v3351_v53 = vadd.f32 %v3350_v8, %v3349_v10  ;;  %v3340_v56 = vadd.f32 %v7742_v34, %v3339_v41  ;;  %v3356_v30 = vadd.f32 %v7751_v13, %v7748_v39  ;;  %v7757_v63 = vpop.eup %5866 }
 0x2bd   : > { %5870 = vpow2.f32 %v3137_v31  ;;  %v3245_v6 = vmul.f32 1.442695, %v3107_v9  ;;  %v3091_v46 = vsub.f32 %v7631_v17, %v3013_v25  ;;  %v3109_v2 = vsub.f32 %v7663_v32, %v3013_v25  ;;  %v7762_v16 = vpop.eup %5868 }
 0x2be   : > { %v3336_v36 = vrot.slane %v3335_v3, 1  ;;  %v3352_v57 = vrot.slane %v3351_v53, 2  ;;  %v3341_v4 = vrot.slane %v3340_v56, 4  ;;  %v3357_v27 = vadd.f32 %v7757_v63, %v3356_v30 }
 0x2bf   : > { %5872 = vpow2.f32 %v3173_v28  ;;  %v3141_v10 = vmul.f32 1.442695, %v3055_v22  ;;  %v3177_v44 = vmul.f32 1.442695, %v3073_v5  ;;  %v3213_v8 = vmul.f32 1.442695, %v3091_v46 }
 0x2c0   : > { %v3337_v41 = vadd.f32 %v3336_v36, %v3335_v3  ;;  %v3353_v43 = vadd.f32 %v3352_v57, %v3351_v53  ;;  %v3342_v34 = vadd.f32 %v3341_v4, %v3340_v56  ;;  %v3358_v9 = vadd.f32 %v7762_v16, %v3357_v27 }
 0x2c1   : > { %5874 = vpow2.f32 %v3209_v14  ;;  %v3249_v17 = vmul.f32 1.442695, %v3109_v2  ;;  %v3004_v31 = vmax.f32 %v3002_v61, %v3003_v21  ;;  %v3022_v32 = vmax.f32 %v3020_v35, %v3021_v51 }
 0x2c2   : > { %5876 = vrcp.f32 %v3337_v41  ;;  %v3354_v25 = vrot.slane %v3353_v43, 1  ;;  %v3343_v15 = vrot.slane %v3342_v34, 2  ;;  %v3359_v23 = vrot.slane %v3358_v9, 4 }
 0x2c3   : > { %5878 = vpow2.f32 %v3245_v6  ;;  %v3054_v30 = vsub.f32 %v7602_v26, %v3004_v31  ;;  %v3072_v22 = vsub.f32 %v7614_v49, %v3004_v31  ;;  %v3090_v5 = vsub.f32 %v7634_v42, %v3004_v31 }
 0x2c4   : > { %v3355_v3 = vadd.f32 %v3354_v25, %v3353_v43  ;;  %v3344_v28 = vadd.f32 %v3343_v15, %v3342_v34  ;;  %v3360_v4 = vadd.f32 %v3359_v23, %v3358_v9  ;;  %5880 = vpow2.f32 %v3141_v10 }
 0x2c5   : > { %5882 = vpow2.f32 %v3177_v44  ;;  %v3108_v14 = vsub.f32 %v7667_v40, %v3004_v31  ;;  %v3139_v61 = vmul.f32 1.442695, %v3054_v30  ;;  %v3026_v35 = vrot.slane %v7734_v0, 4 }
 0x2c6   : > { %5884 = vrcp.f32 %v3355_v3  ;;  %v3345_v21 = vrot.slane %v3344_v28, 1  ;;  %v3361_v51 = vrot.slane %v3360_v4, 2  ;;  %v3175_v6 = vmul.f32 1.442695, %v3072_v22 }
 0x2c7   : > { %v7770_v53 = vpop.eup %5870  ;;  %5886 = vpow2.f32 %v3213_v8  ;;  %v3211_v26 = vmul.f32 1.442695, %v3090_v5  ;;  %v3056_v49 = vsub.f32 %v7605_v59, %v3022_v32  ;;  %v3074_v43 = vsub.f32 %v7617_v38, %v3022_v32 }
 0x2c8   : > { %v3346_v42 = vadd.f32 %v3345_v21, %v3344_v28  ;;  %v3362_v23 = vadd.f32 %v3361_v51, %v3360_v4  ;;  %5888 = vpow2.f32 %v3249_v17  ;;  %v3092_v40 = vsub.f32 %v7637_v47, %v3022_v32 }
 0x2c9   : > { %v7775_v15 = vpop.eup %5872  ;;  %5890 = vpow2.f32 %v3139_v61  ;;  %v3247_v34 = vmul.f32 1.442695, %v3108_v14  ;;  %v3110_v56 = vsub.f32 %v7670_v50, %v3022_v32  ;;  %v3143_v46 = vmul.f32 1.442695, %v3056_v49 }
 0x2ca   : > { %5892 = vrcp.f32 %v3346_v42  ;;  %v3363_v2 = vrot.slane %v3362_v23, 1  ;;  %v3365_v36 = vadd.f32 %v7775_v15, %v7770_v53  ;;  %v3179_v59 = vmul.f32 1.442695, %v3074_v43 }
 0x2cb   : > { %v7780_v57 = vpop.eup %5874  ;;  %5894 = vpow2.f32 %v3175_v6  ;;  %v3215_v38 = vmul.f32 1.442695, %v3092_v40  ;;  %v3027_v27 = vmax.f32 %v7734_v0, %v3026_v35  ;;  %v7785_v47 = vadd.f32 %v7699_v11, %v7229_v48 }
 0x2cc   : > { %v5877_v10 = vpop.eup %5876  ;;  %v3364_v44 = vadd.f32 %v3363_v2, %v3362_v23  ;;  %v3366_v50 = vadd.f32 %v7780_v57, %v3365_v36  ;;  %5896 = vpow2.f32 %v3211_v26  ;;  %v3251_v8 = vmul.f32 1.442695, %v3110_v56 }
 0x2cd   : > { %v7788_v41 = vpop.eup %5878  ;;  %5898 = vpow2.f32 %v3247_v34  ;;  %v3028_v9 = vrot.slane %v3027_v27, 2  ;;  %v3034_v17 = vmax.f32 %v7731_v54, %v7785_v47  ;;  %v7793_v31 = vmul.f32 %v5877_v10, %v7687_v62 }
 0x2ce   : > { %v7795_v0 = vpop.eup %5880  ;;  %5900 = vrcp.f32 %v3364_v44  ;;  %v3367_v48 = vadd.f32 %v7788_v41, %v3366_v50  ;;  %v7799_v11 = vmul.f32 %v5877_v10, %v7689_v37  ;;  %v7802_v32 = vmul.f32 %v5877_v10, %v7695_v58 }
 0x2cf   : > { %v7804_v25 = vpop.eup %5882  ;;  %5902 = vpow2.f32 %v3143_v46  ;;  %v3029_v30 = vmax.f32 %v3027_v27, %v3028_v9  ;;  %v3035_v22 = vrot.slane %v3034_v17, 4  ;;  %v7807_v54 = vmul.f32 %v5877_v10, %v7701_v18 }
 0x2d0   : > { %v5885_v62 = vpop.eup %5884  ;;  %v3368_v5 = vrot.slane %v3367_v48, 4  ;;  %v3383_v3 = vadd.f32 %v7804_v25, %v7795_v0  ;;  %5904 = vpow2.f32 %v3179_v59  ;;  %v5687_v37 = vpack.c.bf16 %v7799_v11, %v7793_v31 }
 0x2d1   : > { %v7813_v28 = vpop.eup %5886  ;;  %5906 = vpow2.f32 %v3215_v38  ;;  %v3030_v58 = vrot.slane %v3029_v30, 1  ;;  %v3036_v4 = vmax.f32 %v3034_v17, %v3035_v22  ;;  %v7816_v14 = vmul.f32 %v5885_v62, %v7706_v12 }
 0x2d2   : > { %v7818_v61 = vpop.eup %5888  ;;  %v3369_v18 = vadd.f32 %v3368_v5, %v3367_v48  ;;  %v3384_v35 = vadd.f32 %v7813_v28, %v3383_v3  ;;  %5908 = vpow2.f32 %v3251_v8  ;;  %v7822_v21 = vmul.f32 %v5885_v62, %v7709_v1 }
 0x2d3   : > { %v7824_v51 = vpop.eup %5890  ;;  %v3031_v6 = vmax.f32 %v3029_v30, %v3030_v58  ;;  %v3037_v26 = vrot.slane %v3036_v4, 2  ;;  %v5691_v49 = vpack.c.bf16 %v7807_v54, %v7802_v32  ;;  %v7829_v43 = vmul.f32 %v5885_v62, %v7712_v7  ;;  %v7911_v32 = vld [vmem:[%s9167_s4] sm:$0xff] }
 0x2d4   : > { %v7831_v12 = vpop.eup %5892  ;;  %v3370_v42 = vrot.slane %v3369_v18, 2  ;;  %v3385_v23 = vadd.f32 %v7818_v61, %v3384_v35  ;;  %v5695_v40 = vpack.c.bf16 %v7822_v21, %v7816_v14  ;;  %v7837_v1 = vmul.f32 %v5885_v62, %v7717_v29 }
 0x2d5   : > { %v7839_v34 = vpop.eup %5894  ;;  %v3057_v56 = vsub.f32 %v7674_v20, %v3031_v6  ;;  %v3075_v46 = vsub.f32 %v7682_v19, %v3031_v6  ;;  %v3093_v7 = vsub.f32 %v7704_v45, %v3031_v6  ;;  %v3111_v2 = vsub.f32 %v7723_v55, %v3031_v6 }
 0x2d6   : > { %v7845_v36 = vpop.eup %5896  ;;  %v3371_v59 = vadd.f32 %v3370_v42, %v3369_v18  ;;  %v3386_v38 = vrot.slane %v3385_v23, 4  ;;  %v3374_v27 = vadd.f32 %v7839_v34, %v7824_v51  ;;  %v3038_v10 = vmax.f32 %v3036_v4, %v3037_v26 }
 0x2d7   : > { %v7849_v29 = vpop.eup %5898  ;;  %v3145_v44 = vmul.f32 1.442695, %v3057_v56  ;;  %v3181_v50 = vmul.f32 1.442695, %v3075_v46  ;;  %v3217_v8 = vmul.f32 1.442695, %v3093_v7  ;;  %v3446_v20 = vmul.f32 %v7831_v12, %v7725_v24 }
 0x2d8   : > { %v5901_v19 = vpop.eup %5900  ;;  %v3372_v45 = vrot.slane %v3371_v59, 1  ;;  %v3387_v9 = vadd.f32 %v3386_v38, %v3385_v23  ;;  %v3375_v55 = vadd.f32 %v7845_v36, %v3374_v27  ;;  %v3253_v17 = vmul.f32 1.442695, %v3111_v2 }
 0x2d9   : > { %v7854_v48 = vpop.eup %5902  ;;  %5910 = vpow2.f32 %v3145_v44  ;;  %v3039_v30 = vrot.slane %v3038_v10, 1  ;;  %v3464_v22 = vmul.f32 %v7831_v12, %v7728_v33  ;;  %v3448_v62 = vmul.f32 %v5901_v19, %v7748_v39 }
 0x2da   : > { %v7859_v5 = vpop.eup %5904  ;;  %v3373_v3 = vadd.f32 %v3372_v45, %v3371_v59  ;;  %v3388_v58 = vrot.slane %v3387_v9, 2  ;;  %v3376_v24 = vadd.f32 %v7849_v29, %v3375_v55  ;;  %5912 = vpow2.f32 %v3181_v50  ;;  %v9242_v59 = vld [vmem:[#allocation15_spill] sm:$0xff] }
 0x2db   : > { %v7862_v4 = vpop.eup %5906  ;;  %v3392_v18 = vadd.f32 %v7859_v5, %v7854_v48  ;;  %5914 = vpow2.f32 %v3217_v8  ;;  %v3040_v35 = vmax.f32 %v3038_v10, %v3039_v30  ;;  %v5685_v6 = vpack.c.bf16 %v3464_v22, %v3446_v20 }
 0x2dc   : > { %v7866_v26 = vpop.eup %5908  ;;  %5916 = vrcp.f32 %v3373_v3  ;;  %v3389_v33 = vadd.f32 %v3388_v58, %v3387_v9  ;;  %v3377_v39 = vrot.slane %v3376_v24, 4  ;;  %v3466_v42 = vmul.f32 %v5901_v19, %v7751_v13  ;;  %v9243_v9 = vld [vmem:[#allocation16_spill] sm:$0xff] }
 0x2dd   : > { %v3393_v23 = vadd.f32 %v7862_v4, %v3392_v18  ;;  %5918 = vpow2.f32 %v3253_v17  ;;  %v3058_v56 = vsub.f32 %v7677_v60, %v3040_v35  ;;  %v3076_v46 = vsub.f32 %v7685_v52, %v3040_v35  ;;  %5686 = vmatprep.subr.bf16.mxu0 %v5685_v6 }
 0x2de   : > { %v3390_v7 = vrot.slane %v3389_v33, 1  ;;  %v3378_v2 = vadd.f32 %v3377_v39, %v3376_v24  ;;  %v3094_v38 = vsub.f32 %v9242_v59, %v3040_v35  ;;  %v3112_v27 = vsub.f32 %v7785_v47, %v3040_v35  ;;  %5688 = vmatpush1.bf16.msra.mxu0 %v5687_v37  ;;  %v9244_v47 = vld [vmem:[#allocation17_spill] sm:$0xff]  ;;  %v7928_v59 = vld [vmem:[%s9167_s4 + $0x8] sm:$0x1] }
 0x2df   : > { %v3394_v13 = vadd.f32 %v7866_v26, %v3393_v23  ;;  %v3147_v10 = vmul.f32 1.442695, %v3058_v56  ;;  %v3183_v44 = vmul.f32 1.442695, %v3076_v46  ;;  %v5693_v50 = vpack.c.bf16 %v3466_v42, %v3448_v62 }
 0x2e0   : > { %v3391_v8 = vadd.f32 %v3390_v7, %v3389_v33  ;;  %v3379_v60 = vrot.slane %v3378_v2, 2  ;;  %v3219_v20 = vmul.f32 1.442695, %v3094_v38  ;;  %v3255_v52 = vmul.f32 1.442695, %v3112_v27 }
 0x2e1   : > { %v3395_v45 = vrot.slane %v3394_v13, 4  ;;  %5920 = vpow2.f32 %v3147_v10  ;;  %5694 = vmatprep.subr.bf16.mxu1 %v5693_v50  ;;  %v3482_v55 = vmul.f32 %v7831_v12, %v9243_v9  ;;  %v3500_v17 = vmul.f32 %v7831_v12, %v9244_v47 }
 0x2e2   : > { %5922 = vrcp.f32 %v3391_v8  ;;  %v3380_v31 = vadd.f32 %v3379_v60, %v3378_v2  ;;  %5696 = vmatpush1.bf16.msra.mxu1 %v5695_v40  ;;  %v3484_v11 = vmul.f32 %v5901_v19, %v7757_v63  ;;  %v3502_v37 = vmul.f32 %v5901_v19, %v7762_v16 }
 0x2e3   : > { %v7887_v30 = vpop.eup %5910  ;;  %v3396_v22 = vadd.f32 %v3395_v45, %v3394_v13  ;;  %5924 = vpow2.f32 %v3183_v44  ;;  %v5689_v62 = vpack.c.bf16 %v3500_v17, %v3482_v55  ;;  %v5699_v3 = vpack.c.bf16 %v7837_v1, %v7829_v43 }
 0x2e4   : > { %v7891_v58 = vpop.eup %5912  ;;  %v3381_v12 = vrot.slane %v3380_v31, 1  ;;  %v5697_v24 = vpack.c.bf16 %v3502_v37, %v3484_v11  ;;  %5926 = vpow2.f32 %v3219_v20 }
 0x2e5   : > { %v7893_v18 = vpop.eup %5914  ;;  %v3397_v14 = vrot.slane %v3396_v22, 2  ;;  %v3401_v63 = vadd.f32 %v7891_v58, %v7887_v30  ;;  %5690 = vmatprep.subr.bf16.mxu0 %v5689_v62  ;;  %5928 = vpow2.f32 %v3255_v52 }
 0x2e6   : > { %v5917_v16 = vpop.eup %5916  ;;  %v3382_v21 = vadd.f32 %v3381_v12, %v3380_v31  ;;  %5698 = vmatprep.subr.bf16.mxu1 %v5697_v24  ;;  %5692 = vmatpush1.bf16.msra.mxu0 %v5691_v49 }
 0x2e7   : > { %v7900_v43 = vpop.eup %5918  ;;  %v3398_v40 = vadd.f32 %v3397_v14, %v3396_v22  ;;  %v3402_v1 = vadd.f32 %v7893_v18, %v3401_v63  ;;  %5700 = vmatpush1.bf16.msra.mxu1 %v5699_v3  ;;  %v3449_v19 = vmul.f32 %v5917_v16, %v7770_v53  ;;  %v3467_v35 = vmul.f32 %v5917_v16, %v7775_v15 }
 0x2e8   : > { %5930 = vrcp.f32 %v3382_v21  ;;  %v3485_v6 = vmul.f32 %v5917_v16, %v7780_v57  ;;  %v3503_v33 = vmul.f32 %v5917_v16, %v7788_v41  ;;  %v9245_v15 = vmov 0.0  }
 0x2e9   : > { %v3399_v39 = vrot.slane %v3398_v40, 1  ;;  %v3403_v42 = vadd.f32 %v7900_v43, %v3402_v1  ;;  %5587 = vmatmul.mubr.msk.f32.vlgmr.msra.gmra.mrb[42].mxu0 %vm3511_vm13, %v7911_v32  ;;  %v5703_v54 = vpack.c.bf16 %v3467_v35, %v3449_v19 }
 0x2ea   : > { %5589 = vmatmul.mubr.msk.f32.vlgmr.msra.gmra.mrb[46].mxu1 %vm3511_vm13, %v7911_v32  ;;  %v5707_v53 = vpack.c.bf16 %v3503_v33, %v3485_v6  ;;  %3896 = vmatprep.mubr.f32.mxu0 %v9245_v15  ;;  %v7973_v6 = vld [vmem:[%s9164_s1] sm:$0xff]  ;;  %v9246_v33 = vld [vmem:[#allocation5_spill] sm:$0xff] }
 0x2eb   : > { %v7918_v57 = vpop.eup %5920  ;;  %v3400_v41 = vadd.f32 %v3399_v39, %v3398_v40  ;;  %v3404_v49 = vrot.slane %v3403_v42, 4  ;;  %3973 = vmatprep.mubr.f32.mxu1 %v9245_v15  ;;  %v4217_v39 = vrot.slane %v7973_v6, %v9246_v33 }
 0x2ec   : > { %v5923_v23 = vpop.eup %5922 }
 0x2ed   : > { %v7921_v56 = vpop.eup %5924  ;;  %5932 = vrcp.f32 %v3400_v41  ;;  %v3405_v46 = vadd.f32 %v3404_v49, %v3403_v42  ;;  %v3451_v7 = vmul.f32 %v5923_v23, %v7795_v0  ;;  %v3469_v2 = vmul.f32 %v5923_v23, %v7804_v25  ;;  %5588 = vmatmul.mubr.msk.f32.gmra.mrb[44].mxu0 %vm3511_vm13, %v7928_v59  ;;  %v9247_v42 = vld [vmem:[#allocation7_spill] sm:$0xff] }
 0x2ee   : > { %v3410_v38 = vadd.f32 %v7921_v56, %v7918_v57  ;;  %v3487_v27 = vmul.f32 %v5923_v23, %v7813_v28  ;;  %v3505_v13 = vmul.f32 %v5923_v23, %v7818_v61  ;;  %4044 = vmatprep.mubr.f32.mxu0 %v9245_v15  ;;  %5590 = vmatmul.mubr.msk.f32.gmra.mrb[48].mxu1 %vm3511_vm13, %v7928_v59  ;;  %v5927_v0 = vpop.eup %5926 }
 0x2ef   : > { %v3406_v25 = vrot.slane %v3405_v46, 2  ;;  %v5711_v10 = vpack.c.bf16 %v3469_v2, %v3451_v7  ;;  %4121 = vmatprep.mubr.f32.mxu1 %v9245_v15  ;;  %v5929_v44 = vpop.eup %5928 }
 0x2f0   : > { %v3411_v50 = vadd.f32 %v5927_v0, %v3410_v38  ;;  %v5715_v8 = vpack.c.bf16 %v3505_v13, %v3487_v27 }
 0x2f1   : > { %v3407_v60 = vadd.f32 %v3406_v25, %v3405_v46 }
 0x2f2   : > { %v5931_v20 = vpop.eup %5930  ;;  %v3412_v52 = vadd.f32 %v5929_v44, %v3411_v50 }
 0x2f3   : > { %v3408_v45 = vrot.slane %v3407_v60, 1  ;;  %v3450_v28 = vmul.f32 %v5931_v20, %v7824_v51  ;;  %v3468_v61 = vmul.f32 %v5931_v20, %v7839_v34  ;;  %v3486_v9 = vmul.f32 %v5931_v20, %v7845_v36 }
 0x2f4   : > { %v3413_v55 = vrot.slane %v3412_v52, 4  ;;  %v3504_v47 = vmul.f32 %v5931_v20, %v7849_v29 }
 0x2f5   : > { %v3409_v17 = vadd.f32 %v3408_v45, %v3407_v60  ;;  %v5701_v31 = vpack.c.bf16 %v3468_v61, %v3450_v28  ;;  %v9249_v45 = vld [vmem:[#allocation4_spill] sm:$0xff]  ;;  %v9250_v61 = vld [vmem:[#allocation6_spill] sm:$0xff] }
 0x2f6   : > { %v3414_v11 = vadd.f32 %v3413_v55, %v3412_v52  ;;  %v5705_v37 = vpack.c.bf16 %v3504_v47, %v3486_v9  ;;  %v4225_v28 = vrot.slane %v7973_v6, %v9249_v45  ;;  %v4229_v9 = vrot.slane %v7973_v6, %v9250_v61 }
 0x2f7   : > { %v5933_v22 = vpop.eup %5932  ;;  %5934 = vrcp.f32 %v3409_v17  ;;  %5702 = vmatprep.subr.bf16.mxu0 %v5701_v31 }
 0x2f8   : > { %v3415_v62 = vrot.slane %v3414_v11, 2  ;;  %v3452_v3 = vmul.f32 %v5933_v22, %v7854_v48  ;;  %v3470_v12 = vmul.f32 %v5933_v22, %v7859_v5  ;;  %5704 = vmatpush1.bf16.msra.mxu0 %v5703_v54  ;;  %v3488_v51 = vmul.f32 %v5933_v22, %v7862_v4 }
 0x2f9   : > { %5706 = vmatprep.subr.bf16.mxu0 %v5705_v37  ;;  %v3506_v34 = vmul.f32 %v5933_v22, %v7866_v26  ;;  %v4221_v54 = vrot.slane %v7973_v6, %v9247_v42 }
 0x2fa   : > { %v3416_v36 = vadd.f32 %v3415_v62, %v3414_v11  ;;  %v5709_v29 = vpack.c.bf16 %v3470_v12, %v3452_v3 }
 0x2fb   : > { %v5713_v24 = vpack.c.bf16 %v3506_v34, %v3488_v51 }
 0x2fc   : > { %v3417_v14 = vrot.slane %v3416_v36, 1  ;;  %5710 = vmatprep.subr.bf16.mxu1 %v5709_v29  ;;  %5708 = vmatpush1.bf16.msra.mxu0 %v5707_v53 }
 0x2fd   : > { %5712 = vmatpush1.bf16.msra.mxu1 %v5711_v10 }
 0x2fe   : > { %v3418_v63 = vadd.f32 %v3417_v14, %v3416_v36  ;;  %5714 = vmatprep.subr.bf16.mxu1 %v5713_v24 }
 0x2ff   : > { %5591 = vmatmul.mubr.msk.f32.vlgmr.msra.gmra.mrb[46].mxu0 %vm3511_vm13, %v7911_v32 }
 0x300   : > { %5936 = vrcp.f32 %v3418_v63  ;;  %4050 = vmatprep.mubr.f32.mxu0 %v9245_v15 }
 0x301   : > { %v5935_v48 = vpop.eup %5934  ;;  %5716 = vmatpush1.bf16.msra.mxu1 %v5715_v8 }
 0x302   : > { %v3453_v5 = vmul.f32 %v5935_v48, %v7887_v30  ;;  %v3471_v4 = vmul.f32 %v5935_v48, %v7891_v58  ;;  %v3489_v26 = vmul.f32 %v5935_v48, %v7893_v18  ;;  %v3507_v16 = vmul.f32 %v5935_v48, %v7900_v43 }
 0x303   : > { %5592 = vmatmul.mubr.msk.f32.gmra.mrb[48].mxu0 %vm3511_vm13, %v7928_v59 }
 0x304   : > { %v5719_v21 = vpack.c.bf16 %v3471_v4, %v3453_v5  ;;  %v5723_v40 = vpack.c.bf16 %v3507_v16, %v3489_v26  ;;  %5593 = vmatmul.mubr.msk.f32.vlgmr.msra.gmra.mrb[50].mxu1 %vm3511_vm13, %v7911_v32  ;;  %4198 = vmatprep.mubr.f32.mxu0 %v9245_v15 }
 0x305   : > { %4127 = vmatprep.mubr.f32.mxu1 %v9245_v15 }
 0x308   : > { %5594 = vmatmul.mubr.msk.f32.gmra.mrb[52].mxu1 %vm3511_vm13, %v7928_v59 }
 0x30a   : > { %v5937_v30 = vpop.eup %5936 }
 0x30b   : > { %v3454_v58 = vmul.f32 %v5937_v30, %v7918_v57  ;;  %v3472_v18 = vmul.f32 %v5937_v30, %v7921_v56  ;;  %v3490_v43 = vmul.f32 %v5937_v30, %v5927_v0  ;;  %v3508_v1 = vmul.f32 %v5937_v30, %v5929_v44 }
 0x30d   : > { %v5717_v19 = vpack.c.bf16 %v3472_v18, %v3454_v58  ;;  %v5721_v35 = vpack.c.bf16 %v3508_v1, %v3490_v43  ;;  %v9254_v1 = vld [vmem:[#allocation8_spill] sm:$0xff] }
 0x30f   : > { %5718 = vmatprep.subr.bf16.mxu0 %v5717_v19  ;;  %v4237_v19 = vrot.slane %v7973_v6, %v9254_v1 }
 0x310   : > { %5720 = vmatpush1.bf16.msra.mxu0 %v5719_v21  ;;  %v9253_v21 = vld [vmem:[#allocation9_spill] sm:$0xff] }
 0x311   : > { %5722 = vmatprep.subr.bf16.mxu0 %v5721_v35 }
 0x314   : > { %5724 = vmatpush1.bf16.msra.mxu0 %v5723_v40  ;;  %v4233_v40 = vrot.slane %v7973_v6, %v9253_v21 }
 0x317   : > { %5595 = vmatmul.mubr.msk.f32.vlgmr.msra.gmra.mrb[50].mxu0 %vm3511_vm13, %v7911_v32 }
 0x318   : > { %4204 = vmatprep.mubr.f32.mxu0 %v9245_v15 }
 0x31b   : > { %5596 = vmatmul.mubr.msk.f32.gmra.mrb[52].mxu0 %vm3511_vm13, %v7928_v59 }
 0x32f   : > { %v3584_v53 = vpop.f32.mrb[34].mxu1 }
 0x330   : > { %v7979_v57 = vmul.f32 %v4217_v39, %v3584_v53  ;;  %v3586_v32 = vpop.f32.mrb[35].mxu1 }
 0x331   : > { %v7981_v41 = vmul.f32 %v4221_v54, %v3586_v32 }
 0x332   : > { %9248 = vst [vmem:[#allocation15_spill] sm:$0xff] %v7979_v57  ;;  %v4376_v15 = vrot.slane %v7979_v57, 1  ;;  %v4485_v46 = vrot.slane %v7979_v57, 2  ;;  %v4594_v38 = vrot.slane %v7979_v57, 3  ;;  %v4703_v25 = vrot.slane %v7979_v57, 4 }
 0x333   : > { %v4377_v49 = vrot.slane %v7981_v41, 1  ;;  %v3590_v23 = vpop.f32.mrb[36].mxu1  ;;  %v4486_v7 = vrot.slane %v7981_v41, 2  ;;  %v4595_v27 = vrot.slane %v7981_v41, 3  ;;  %v4704_v10 = vrot.slane %v7981_v41, 4 }
 0x334   : > { %4412 = vrot.lane.b32.xlu1 %v4376_v15, %s6032_s16  ;;  %v3592_v56 = vpop.f32.mrb[37].mxu1  ;;  %v4812_v44 = vrot.slane %v7979_v57, 5  ;;  %v4813_v50 = vrot.slane %v7981_v41, 5  ;;  %v4921_v8 = vrot.slane %v7979_v57, 6  ;;  %v4922_v20 = vrot.slane %v7981_v41, 6 }
 0x335   : > { %4414 = vrot.lane.b32.xlu0 %v4377_v49, %s6032_s16  ;;  %v5030_v55 = vrot.slane %v7979_v57, 7  ;;  %v5031_v17 = vrot.slane %v7981_v41, 7  ;;  %v4322_v22 = vmul.f32 %v4217_v39, %v3590_v23  ;;  %v4323_v62 = vmul.f32 %v4221_v54, %v3592_v56 }
 0x338   : > { %4521 = vrot.lane.b32.xlu1 %v4485_v46, %s6033_s17  ;;  %v3661_v2 = vpop.f32.mrb[38].mxu1 }
 0x339   : > { %4523 = vrot.lane.b32.xlu0 %v4486_v7, %s6033_s17  ;;  %v3663_v59 = vpop.f32.mrb[39].mxu1  ;;  %v8022_v11 = vmul.f32 %v4225_v28, %v3661_v2 }
 0x33a   : > { %v8025_v37 = vmul.f32 %v4229_v9, %v3663_v59 }
 0x33b   : > { %9251 = vst [vmem:[#allocation16_spill] sm:$0xff] %v8022_v11  ;;  %v4378_v3 = vrot.slane %v8022_v11, 1  ;;  %v4487_v51 = vrot.slane %v8022_v11, 2  ;;  %v4596_v24 = vrot.slane %v8022_v11, 3  ;;  %v4705_v5 = vrot.slane %v8022_v11, 4 }
 0x33c   : > { %4630 = vrot.lane.b32.xlu1 %v4594_v38, %s6034_s18  ;;  %v7994_v13 = vpop.f32.mrb[40].mxu1  ;;  %9252 = vst [vmem:[#allocation17_spill] sm:$0xff] %v8025_v37  ;;  %v4379_v12 = vrot.slane %v8025_v37, 1  ;;  %v4488_v34 = vrot.slane %v8025_v37, 2  ;;  %v4597_v14 = vrot.slane %v8025_v37, 3  ;;  %v4706_v4 = vrot.slane %v8025_v37, 4 }
 0x33d   : > { %4632 = vrot.lane.b32.xlu0 %v4595_v27, %s6034_s18  ;;  %v7997_v0 = vpop.f32.mrb[41].mxu1  ;;  %v4814_v26 = vrot.slane %v8022_v11, 5  ;;  %v4815_v16 = vrot.slane %v8025_v37, 5  ;;  %v4923_v30 = vrot.slane %v8022_v11, 6  ;;  %v5033_v58 = vrot.slane %v8025_v37, 7  ;;  %v9255_v27 = vld [vmem:[#allocation11_spill] sm:$0xff] }
 0x33e   : > { %v4325_v18 = vmul.f32 %v4229_v9, %v7997_v0  ;;  %v5032_v35 = vrot.slane %v8022_v11, 7  ;;  %v4924_v53 = vrot.slane %v8025_v37, 6  ;;  %v4324_v15 = vmul.f32 %v4225_v28, %v7994_v13  ;;  %v9280_v11 = vld [vmem:[#allocation12_spill] sm:$0xff] }
 0x33f   : > { %v4241_v13 = vrot.slane %v7973_v6, %v9255_v27  ;;  %vm4448_vm14 = vcmp.lt.s32.totalorder %v9280_v11, 1  ;;  %vm4557_vm15 = vcmp.lt.s32.totalorder %v9280_v11, 2  ;;  %vm4666_vm0 = vcmp.lt.s32.totalorder %v9280_v11, 16 }
 0x340   : > { %4739 = vrot.lane.b32.xlu1 %v4703_v25, %s6035_s19  ;;  %vm4775_vm1 = vcmp.lt.s32.totalorder %v9280_v11, 17  ;;  %vm4884_vm2 = vcmp.lt.s32.totalorder %v9280_v11, 18  ;;  %vm4993_vm3 = vcmp.lt.s32.totalorder %v9280_v11, 32  ;;  %vm5102_vm4 = vcmp.lt.s32.totalorder %v9280_v11, 33 }
 0x341   : > { %4741 = vrot.lane.b32.xlu0 %v4704_v10, %s6035_s19  ;;  %vm5175_vm5 = vcmp.lt.s32.totalorder %v9280_v11, 34 }
 0x344   : > { %4848 = vrot.lane.b32.xlu1 %v4812_v44, %s6036_s20 }
 0x345   : > { %4850 = vrot.lane.b32.xlu0 %v4813_v50, %s6036_s20  ;;  %v9256_v50 = vld [vmem:[#allocation10_spill] sm:$0xff] }
 0x346   : > { %v3738_v60 = vpop.f32.mrb[38].mxu0 }
 0x347   : > { %v3740_v52 = vpop.f32.mrb[39].mxu0  ;;  %v8062_v43 = vmul.f32 %v4233_v40, %v3738_v60 }
 0x348   : > { %4957 = vrot.lane.b32.xlu1 %v4921_v8, %s6037_s21  ;;  %v8069_v39 = vmul.f32 %v4237_v19, %v3740_v52  ;;  %v4245_v8 = vrot.slane %v7973_v6, %v9256_v50 }
 0x349   : > { %4959 = vrot.lane.b32.xlu0 %v4922_v20, %s6037_s21  ;;  %v4925_v54 = vrot.slane %v8062_v43, 6  ;;  %v4380_v49 = vrot.slane %v8062_v43, 1  ;;  %v4489_v56 = vrot.slane %v8062_v43, 2  ;;  %v4598_v7 = vrot.slane %v8062_v43, 3 }
 0x34a   : > { %v8016_v47 = vpop.f32.mrb[40].mxu0  ;;  %v4381_v32 = vrot.slane %v8069_v39, 1  ;;  %v4490_v23 = vrot.slane %v8069_v39, 2  ;;  %v4599_v46 = vrot.slane %v8069_v39, 3  ;;  %v4708_v2 = vrot.slane %v8069_v39, 4 }
 0x34b   : > { %v8019_v31 = vpop.f32.mrb[41].mxu0  ;;  %v4707_v59 = vrot.slane %v8062_v43, 4  ;;  %v4817_v38 = vrot.slane %v8069_v39, 5  ;;  %v4816_v0 = vrot.slane %v8062_v43, 5  ;;  %v5035_v25 = vrot.slane %v8069_v39, 7 }
 0x34c   : > { %5066 = vrot.lane.b32.xlu1 %v5030_v55, %s6038_s22  ;;  %v4327_v10 = vmul.f32 %v4237_v19, %v8019_v31  ;;  %v5034_v60 = vrot.slane %v8062_v43, 7  ;;  %v4926_v28 = vrot.slane %v8069_v39, 6  ;;  %v4326_v6 = vmul.f32 %v4233_v40, %v8016_v47  ;;  %v8169_v19 = vld [vmem:[%s9164_s1 + $0x8] sm:$0xff] }
 0x34d   : > { %5068 = vrot.lane.b32.xlu0 %v5031_v17, %s6038_s22 }
 0x350   : > { %5139 = vrot.lane.b32.xlu1 %v4322_v22, %s6039_s25 }
 0x351   : > { %5141 = vrot.lane.b32.xlu0 %v4323_v62, %s6039_s25 }
 0x354   : > { %4416 = vrot.lane.b32.xlu1 %v4378_v3, %s6032_s16 }
 0x355   : > { %4418 = vrot.lane.b32.xlu0 %v4379_v12, %s6032_s16  ;;  %v8133_v12 = vpop.permute.xlu0 %5215 }
 0x357   : > { %v3815_v36 = vpop.f32.mrb[42].mxu1 }
 0x358   : > { %4525 = vrot.lane.b32.xlu1 %v4487_v51, %s6033_s17  ;;  %v8036_v29 = vpop.f32.mrb[43].mxu1  ;;  %v8102_v44 = vmul.f32 %v4241_v13, %v3815_v36 }
 0x359   : > { %4527 = vrot.lane.b32.xlu0 %v4488_v34, %s6033_s17  ;;  %v8110_v20 = vmul.f32 %v4245_v8, %v8036_v29 }
 0x35a   : > { %v4927_v52 = vrot.slane %v8102_v44, 6  ;;  %v4382_v55 = vrot.slane %v8102_v44, 1  ;;  %v4491_v31 = vrot.slane %v8102_v44, 2  ;;  %v4600_v47 = vrot.slane %v8102_v44, 3 }
 0x35b   : > { %v8041_v63 = vpop.f32.mrb[44].mxu1  ;;  %v4383_v9 = vrot.slane %v8110_v20, 1  ;;  %v4492_v17 = vrot.slane %v8110_v20, 2  ;;  %v4601_v22 = vrot.slane %v8110_v20, 3  ;;  %v4710_v62 = vrot.slane %v8110_v20, 4 }
 0x35c   : > { %4634 = vrot.lane.b32.xlu1 %v4596_v24, %s6034_s18  ;;  %v8044_v48 = vpop.f32.mrb[45].mxu1  ;;  %v4709_v3 = vrot.slane %v8102_v44, 4  ;;  %v4819_v51 = vrot.slane %v8110_v20, 5  ;;  %v4818_v36 = vrot.slane %v8102_v44, 5  ;;  %v5037_v24 = vrot.slane %v8110_v20, 7 }
 0x35d   : > { %4636 = vrot.lane.b32.xlu0 %v4597_v14, %s6034_s18  ;;  %v4329_v14 = vmul.f32 %v4245_v8, %v8044_v48  ;;  %v4928_v40 = vrot.slane %v8110_v20, 6  ;;  %v4328_v48 = vmul.f32 %v4241_v13, %v8041_v63 }
 0x360   : > { %4743 = vrot.lane.b32.xlu1 %v4705_v5, %s6035_s19 }
 0x361   : > { %4745 = vrot.lane.b32.xlu0 %v4706_v4, %s6035_s19  ;;  %v5036_v4 = vrot.slane %v8102_v44, 7 }
 0x364   : > { %4852 = vrot.lane.b32.xlu1 %v4814_v26, %s6036_s20 }
 0x365   : > { %4854 = vrot.lane.b32.xlu0 %v4815_v16, %s6036_s20 }
 0x368   : > { %4961 = vrot.lane.b32.xlu1 %v4923_v30, %s6037_s21 }
 0x369   : > { %5072 = vrot.lane.b32.xlu0 %v5033_v58, %s6038_s22 }
 0x36c   : > { %5070 = vrot.lane.b32.xlu1 %v5032_v35, %s6038_s22 }
 0x36d   : > { %5145 = vrot.lane.b32.xlu0 %v4325_v18, %s6039_s25 }
 0x370   : > { %4963 = vrot.lane.b32.xlu1 %v4924_v53, %s6037_s21  ;;  %v8177_v53 = vrot.slane %v8169_v19, %v9246_v33 }
 0x371   : > { %4965 = vrot.lane.b32.xlu0 %v4925_v54, %s6037_s21 }
 0x374   : > { %5143 = vrot.lane.b32.xlu1 %v4324_v15, %s6039_s25 }
 0x375   : > { %4422 = vrot.lane.b32.xlu0 %v4381_v32, %s6032_s16  ;;  %v4253_v32 = vrot.slane %v8169_v19, %v9247_v42 }
 0x378   : > { %4420 = vrot.lane.b32.xlu1 %v4380_v49, %s6032_s16 }
 0x379   : > { %4531 = vrot.lane.b32.xlu0 %v4490_v23, %s6033_s17 }
 0x37c   : > { %4529 = vrot.lane.b32.xlu1 %v4489_v56, %s6033_s17 }
 0x37d   : > { %4640 = vrot.lane.b32.xlu0 %v4599_v46, %s6034_s18 }
 0x380   : > { %4638 = vrot.lane.b32.xlu1 %v4598_v7, %s6034_s18 }
 0x381   : > { %4749 = vrot.lane.b32.xlu0 %v4708_v2, %s6035_s19 }
 0x384   : > { %4747 = vrot.lane.b32.xlu1 %v4707_v59, %s6035_s19 }
 0x385   : > { %4858 = vrot.lane.b32.xlu0 %v4817_v38, %s6036_s20 }
 0x388   : > { %4856 = vrot.lane.b32.xlu1 %v4816_v0, %s6036_s20 }
 0x389   : > { %5076 = vrot.lane.b32.xlu0 %v5035_v25, %s6038_s22 }
 0x38c   : > { %5074 = vrot.lane.b32.xlu1 %v5034_v60, %s6038_s22 }
 0x38d   : > { %5149 = vrot.lane.b32.xlu0 %v4327_v10, %s6039_s25 }
 0x390   : > { %4967 = vrot.lane.b32.xlu1 %v4926_v28, %s6037_s21 }
 0x391   : > { %4969 = vrot.lane.b32.xlu0 %v4927_v52, %s6037_s21 }
 0x394   : > { %5147 = vrot.lane.b32.xlu1 %v4326_v6, %s6039_s25 }
 0x395   : > { %4426 = vrot.lane.b32.xlu0 %v4383_v9, %s6032_s16 }
 0x398   : > { %4424 = vrot.lane.b32.xlu1 %v4382_v55, %s6032_s16 }
 0x399   : > { %4535 = vrot.lane.b32.xlu0 %v4492_v17, %s6033_s17 }
 0x39c   : > { %4533 = vrot.lane.b32.xlu1 %v4491_v31, %s6033_s17 }
 0x39d   : > { %4644 = vrot.lane.b32.xlu0 %v4601_v22, %s6034_s18 }
 0x3a0   : > { %4642 = vrot.lane.b32.xlu1 %v4600_v47, %s6034_s18 }
 0x3a1   : > { %4753 = vrot.lane.b32.xlu0 %v4710_v62, %s6035_s19 }
 0x3a4   : > { %4751 = vrot.lane.b32.xlu1 %v4709_v3, %s6035_s19 }
 0x3a5   : > { %4862 = vrot.lane.b32.xlu0 %v4819_v51, %s6036_s20 }
 0x3a6   : > { %v8138_v34 = vpop.permute.xlu1 %4412 }
 0x3a7   : > { %v8141_v29 = vpop.permute.xlu0 %4414 }
 0x3a8   : > { %4860 = vrot.lane.b32.xlu1 %v4818_v36, %s6036_s20 }
 0x3a9   : > { %5080 = vrot.lane.b32.xlu0 %v5037_v24, %s6038_s22 }
 0x3aa   : > { %v8147_v5 = vpop.permute.xlu1 %4521 }
 0x3ab   : > { %v8150_v26 = vpop.permute.xlu0 %4523 }
 0x3ac   : > { %5078 = vrot.lane.b32.xlu1 %v5036_v4, %s6038_s22 }
 0x3ad   : > { %5153 = vrot.lane.b32.xlu0 %v4329_v14, %s6039_s25 }
 0x3ae   : > { %v8154_v16 = vpop.permute.xlu1 %4630 }
 0x3af   : > { %9257 = vst [vmem:[#allocation5_spill] sm:$0xff] %v8154_v16  ;;  %v8157_v30 = vpop.permute.xlu0 %4632 }
 0x3b0   : > { %9258 = vst [vmem:[#allocation7_spill] sm:$0xff] %v8157_v30  ;;  %4971 = vrot.lane.b32.xlu1 %v4928_v40, %s6037_s21 }
 0x3b2   : > { %v8161_v58 = vpop.permute.xlu1 %4739 }
 0x3b3   : > { %9259 = vst [vmem:[#allocation4_spill] sm:$0xff] %v8161_v58  ;;  %v8163_v18 = vpop.permute.xlu0 %4741 }
 0x3b4   : > { %9260 = vst [vmem:[#allocation6_spill] sm:$0xff] %v8163_v18  ;;  %5151 = vrot.lane.b32.xlu1 %v4328_v48, %s6039_s25 }
 0x3b6   : > { %v8171_v35 = vpop.permute.xlu1 %4848 }
 0x3b7   : > { %9261 = vst [vmem:[#allocation9_spill] sm:$0xff] %v8171_v35  ;;  %v8173_v54 = vpop.permute.xlu0 %4850 }
 0x3b8   : > { %9262 = vst [vmem:[#allocation8_spill] sm:$0xff] %v8173_v54 }
 0x3ba   : > { %v8179_v63 = vpop.permute.xlu1 %4957 }
 0x3bb   : > { %9263 = vst [vmem:[#allocation11_spill] sm:$0xff] %v8179_v63  ;;  %v8183_v15 = vpop.permute.xlu0 %4959 }
 0x3bc   : > { %9264 = vst [vmem:[#allocation10_spill] sm:$0xff] %v8183_v15  ;;  %v3892_v49 = vpop.f32.mrb[42].mxu0 }
 0x3bd   : > { %v8186_v23 = vmul.f32 %v8177_v53, %v3892_v49  ;;  %v3894_v56 = vpop.f32.mrb[43].mxu0  ;;  %v3969_v46 = vpop.f32.mrb[46].mxu1 }
 0x3be   : > { %v8188_v7 = vpop.permute.xlu1 %5066  ;;  %v8190_v2 = vpop.f32.mrb[47].mxu1  ;;  %v8192_v59 = vmul.f32 %v4253_v32, %v3894_v56 }
 0x3bf   : > { %9265 = vst [vmem:[#allocation18_spill] sm:$0xff] %v8188_v7  ;;  %v4929_v38 = vrot.slane %v8186_v23, 6  ;;  %v4384_v13 = vrot.slane %v8186_v23, 1  ;;  %v8196_v0 = vpop.permute.xlu0 %5068  ;;  %v4493_v9 = vrot.slane %v8186_v23, 2  ;;  %v4602_v31 = vrot.slane %v8186_v23, 3 }
 0x3c0   : > { %9266 = vst [vmem:[#allocation19_spill] sm:$0xff] %v8196_v0  ;;  %v3898_v25 = vpop.f32.mrb[44].mxu0  ;;  %v4385_v28 = vrot.slane %v8192_v59, 1  ;;  %v4494_v17 = vrot.slane %v8192_v59, 2  ;;  %v4603_v62 = vrot.slane %v8192_v59, 3  ;;  %v4711_v3 = vrot.slane %v8186_v23, 4 }
 0x3c1   : > { %4973 = vrot.lane.b32.xlu0 %v4929_v38, %s6037_s21  ;;  %4428 = vrot.lane.b32.xlu1 %v4384_v13, %s6032_s16  ;;  %v3900_v10 = vpop.f32.mrb[45].mxu0  ;;  %v8200_v8 = vpop.f32.mrb[48].mxu1  ;;  %v4712_v24 = vrot.slane %v8192_v59, 4  ;;  %v4820_v14 = vrot.slane %v8186_v23, 5  ;;  %v4821_v49 = vrot.slane %v8192_v59, 5  ;;  %v5038_v56 = vrot.slane %v8186_v23, 7 }
 0x3c2   : > { %v8202_v60 = vpop.permute.xlu1 %5139  ;;  %v8204_v52 = vpop.f32.mrb[49].mxu1 }
 0x3c3   : > { %9267 = vst [vmem:[#allocation20_spill] sm:$0xff] %v8202_v60  ;;  %v8208_v6 = vpop.permute.xlu0 %5141  ;;  %v4330_v60 = vmul.f32 %v8177_v53, %v3898_v25 }
 0x3c4   : > { %9268 = vst [vmem:[#allocation21_spill] sm:$0xff] %v8208_v6  ;;  %v4261_v6 = vrot.slane %v8169_v19, %v9250_v61 }
 0x3c5   : > { %4430 = vrot.lane.b32.xlu0 %v4385_v28, %s6032_s16  ;;  %4537 = vrot.lane.b32.xlu1 %v4493_v9, %s6033_s17  ;;  %v8250_v28 = vrot.slane %v8169_v19, %v9249_v45 }
 0x3c6   : > { %v8212_v55 = vpop.permute.xlu1 %4416 }
 0x3c7   : > { %v8216_v22 = vpop.permute.xlu0 %4418  ;;  %v8267_v45 = vmul.f32 %v8250_v28, %v3969_v46 }
 0x3c9   : > { %4539 = vrot.lane.b32.xlu0 %v4494_v17, %s6033_s17  ;;  %4646 = vrot.lane.b32.xlu1 %v4602_v31, %s6034_s18  ;;  %v5039_v31 = vrot.slane %v8192_v59, 7  ;;  %v4386_v53 = vrot.slane %v8267_v45, 1  ;;  %v5040_v58 = vrot.slane %v8267_v45, 7 }
 0x3ca   : > { %v8220_v47 = vpop.permute.xlu1 %4525 }
 0x3cb   : > { %9269 = vst [vmem:[#allocation22_spill] sm:$0xff] %v8220_v47  ;;  %v8224_v51 = vpop.permute.xlu0 %4527 }
 0x3cc   : > { %9270 = vst [vmem:[#allocation23_spill] sm:$0xff] %v8224_v51 }
 0x3cd   : > { %4648 = vrot.lane.b32.xlu0 %v4603_v62, %s6034_s18  ;;  %4755 = vrot.lane.b32.xlu1 %v4711_v3, %s6035_s19  ;;  %v4930_v62 = vrot.slane %v8192_v59, 6 }
 0x3ce   : > { %v8228_v36 = vpop.permute.xlu1 %4634 }
 0x3cf   : > { %9271 = vst [vmem:[#allocation24_spill] sm:$0xff] %v8228_v36  ;;  %v8232_v4 = vpop.permute.xlu0 %4636 }
 0x3d0   : > { %9272 = vst [vmem:[#allocation25_spill] sm:$0xff] %v8232_v4 }
 0x3d1   : > { %4757 = vrot.lane.b32.xlu0 %v4712_v24, %s6035_s19  ;;  %4864 = vrot.lane.b32.xlu1 %v4820_v14, %s6036_s20 }
 0x3d2   : > { %v8236_v40 = vpop.permute.xlu1 %4743  ;;  %v8238_v48 = vpop.f32.mrb[46].mxu0 }
 0x3d3   : > { %9273 = vst [vmem:[#allocation26_spill] sm:$0xff] %v8236_v40  ;;  %v8242_v38 = vpop.permute.xlu0 %4745  ;;  %v8244_v13 = vpop.f32.mrb[47].mxu0 }
 0x3d5   : > { %4866 = vrot.lane.b32.xlu0 %v4821_v49, %s6036_s20  ;;  %5082 = vrot.lane.b32.xlu1 %v5038_v56, %s6038_s22  ;;  %v4331_v49 = vmul.f32 %v4253_v32, %v3900_v10  ;;  %v4931_v32 = vrot.slane %v8267_v45, 6  ;;  %v8288_v10 = vmul.f32 %v4261_v6, %v8190_v2 }
 0x3d6   : > { %v8252_v9 = vpop.permute.xlu1 %4852  ;;  %v8254_v17 = vpop.f32.mrb[48].mxu0 }
 0x3d7   : > { %9274 = vst [vmem:[#allocation27_spill] sm:$0xff] %v8252_v9  ;;  %v8258_v3 = vpop.permute.xlu0 %4854  ;;  %v8260_v24 = vpop.f32.mrb[49].mxu0  ;;  %v4605_v63 = vrot.slane %v8288_v10, 3  ;;  %v4823_v36 = vrot.slane %v8288_v10, 5 }
 0x3d8   : > { %v8262_v14 = vpop.f32.mrb[50].mxu1 }
 0x3d9   : > { %5084 = vrot.lane.b32.xlu0 %v5039_v31, %s6038_s22  ;;  %4975 = vrot.lane.b32.xlu1 %v4930_v62, %s6037_s21  ;;  %v8269_v56 = vpop.f32.mrb[51].mxu1  ;;  %v4387_v62 = vrot.slane %v8288_v10, 1 }
 0x3da   : > { %v8271_v57 = vpop.permute.xlu1 %4961 }
 0x3db   : > { %9275 = vst [vmem:[#allocation28_spill] sm:$0xff] %v8271_v57  ;;  %v8276_v7 = vpop.permute.xlu0 %5072  ;;  %v8278_v0 = vpop.f32.mrb[52].mxu1 }
 0x3dc   : > { %9276 = vst [vmem:[#allocation29_spill] sm:$0xff] %v8276_v7  ;;  %v8280_v31 = vpop.f32.mrb[53].mxu1 }
 0x3dd   : > { %5157 = vrot.lane.b32.xlu0 %v4331_v49, %s6039_s25  ;;  %5155 = vrot.lane.b32.xlu1 %v4330_v60, %s6039_s25  ;;  %v4495_v60 = vrot.slane %v8267_v45, 2 }
 0x3de   : > { %v8285_v46 = vpop.permute.xlu1 %5070 }
 0x3df   : > { %9277 = vst [vmem:[#allocation30_spill] sm:$0xff] %v8285_v46  ;;  %v8291_v61 = vpop.permute.xlu0 %5145  ;;  %v4496_v46 = vrot.slane %v8288_v10, 2 }
 0x3e0   : > { %9278 = vst [vmem:[#allocation31_spill] sm:$0xff] %v8291_v61 }
 0x3e1   : > { %4977 = vrot.lane.b32.xlu0 %v4931_v32, %s6037_s21  ;;  %4432 = vrot.lane.b32.xlu1 %v4386_v53, %s6032_s16  ;;  %v4604_v32 = vrot.slane %v8267_v45, 3 }
 0x3e2   : > { %v8295_v25 = vpop.permute.xlu1 %4963 }
 0x3e3   : > { %v8299_v49 = vpop.permute.xlu0 %4965 }
 0x3e5   : > { %4434 = vrot.lane.b32.xlu0 %v4387_v62, %s6032_s16  ;;  %4541 = vrot.lane.b32.xlu1 %v4495_v60, %s6033_s17  ;;  %v4713_v62 = vrot.slane %v8267_v45, 4 }
 0x3e6   : > { %v8303_v2 = vpop.permute.xlu1 %5143 }
 0x3e7   : > { %9279 = vst [vmem:[#allocation32_spill] sm:$0xff] %v8303_v2  ;;  %v8307_v57 = vpop.permute.xlu0 %4422 }
 0x3e9   : > { %4543 = vrot.lane.b32.xlu0 %v4496_v46, %s6033_s17  ;;  %4650 = vrot.lane.b32.xlu1 %v4604_v32, %s6034_s18  ;;  %v4714_v46 = vrot.slane %v8288_v10, 4  ;;  %v4822_v32 = vrot.slane %v8267_v45, 5 }
 0x3ea   : > { %v4421_v53 = vpop.permute.xlu1 %4420  ;;  %v8311_v9 = vpop.f32.mrb[50].mxu0 }
 0x3eb   : > { %v8315_v60 = vpop.permute.xlu0 %4531  ;;  %v8317_v2 = vpop.f32.mrb[51].mxu0  ;;  %v4461_v16 = vsel %vm4448_vm14, %v4421_v53, %v8307_v57 }
 0x3ed   : > { %4652 = vrot.lane.b32.xlu0 %v4605_v63, %s6034_s18  ;;  %4759 = vrot.lane.b32.xlu1 %v4713_v62, %s6035_s19  ;;  %v4462_v62 = vsel %vm4448_vm14, %v8216_v22, %v4421_v53 }
 0x3ee   : > { %v4530_v15 = vpop.permute.xlu1 %4529  ;;  %v8325_v35 = vpop.f32.mrb[52].mxu0  ;;  %v4471_v37 = vadd.f32 %v4462_v62, %v8062_v43  ;;  %v4333_v43 = vmul.f32 %v4261_v6, %v8204_v52 }
 0x3ef   : > { %v8323_v40 = vpop.permute.xlu0 %4640  ;;  %v8327_v54 = vpop.f32.mrb[53].mxu0  ;;  %v4570_v62 = vsel %vm4557_vm15, %v4530_v15, %v8315_v60 }
 0x3f1   : > { %4761 = vrot.lane.b32.xlu0 %v4714_v46, %s6035_s19  ;;  %4868 = vrot.lane.b32.xlu1 %v4822_v32, %s6036_s20  ;;  %v4571_v46 = vsel %vm4557_vm15, %v8224_v51, %v4530_v15  ;;  %v8347_v32 = vrot.slane %v8169_v19, %v9253_v21  ;;  %v4332_v15 = vmul.f32 %v8250_v28, %v8200_v8 }
 0x3f2   : > { %v4639_v63 = vpop.permute.xlu1 %4638  ;;  %v4580_v21 = vadd.f32 %v4571_v46, %v4471_v37  ;;  %v4472_v37 = vadd.f32 %v4461_v16, %v8069_v39 }
 0x3f3   : > { %v8337_v18 = vpop.permute.xlu0 %4749  ;;  %v4680_v51 = vsel %vm4666_vm0, %v8232_v4, %v4639_v63  ;;  %v8370_v53 = vmul.f32 %v8347_v32, %v8238_v48  ;;  %v4679_v46 = vsel %vm4666_vm0, %v4639_v63, %v8323_v40  ;;  %v8384_v48 = vrot.slane %v8169_v19, %v9254_v1 }
 0x3f4   : > { %v4689_v52 = vadd.f32 %v4680_v51, %v4580_v21  ;;  %v4581_v39 = vadd.f32 %v4570_v62, %v4472_v37  ;;  %v5007_v37 = vsel %vm4993_vm3, %v8295_v25, %v8299_v49 }
 0x3f5   : > { %4870 = vrot.lane.b32.xlu0 %v4823_v36, %s6036_s20  ;;  %5086 = vrot.lane.b32.xlu1 %v5040_v58, %s6038_s22  ;;  %v5041_v36 = vrot.slane %v8288_v10, 7  ;;  %v4932_v58 = vrot.slane %v8288_v10, 6  ;;  %v4933_v51 = vrot.slane %v8370_v53, 6  ;;  %v8399_v21 = vmul.f32 %v8384_v48, %v8244_v13 }
 0x3f6   : > { %v4748_v47 = vpop.permute.xlu1 %4747  ;;  %v4690_v1 = vadd.f32 %v4679_v46, %v4581_v39  ;;  %v4388_v62 = vrot.slane %v8370_v53, 1  ;;  %v4497_v46 = vrot.slane %v8370_v53, 2 }
 0x3f7   : > { %v8359_v30 = vpop.permute.xlu0 %4858  ;;  %v4789_v4 = vsel %vm4775_vm1, %v8242_v38, %v4748_v47  ;;  %v4788_v8 = vsel %vm4775_vm1, %v4748_v47, %v8337_v18 }
 0x3f8   : > { %v4798_v16 = vadd.f32 %v4789_v4, %v4689_v52  ;;  %v4799_v47 = vadd.f32 %v4788_v8, %v4690_v1 }
 0x3f9   : > { %5088 = vrot.lane.b32.xlu0 %v5041_v36, %s6038_s22  ;;  %4979 = vrot.lane.b32.xlu1 %v4932_v58, %s6037_s21 }
 0x3fa   : > { %v4857_v6 = vpop.permute.xlu1 %4856 }
 0x3fb   : > { %v4898_v36 = vsel %vm4884_vm2, %v8258_v3, %v4857_v6  ;;  %v8389_v58 = vpop.permute.xlu0 %5076  ;;  %v4897_v4 = vsel %vm4884_vm2, %v4857_v6, %v8359_v30  ;;  %v4389_v6 = vrot.slane %v8399_v21, 1 }
 0x3fc   : > { %v4907_v28 = vadd.f32 %v4898_v36, %v4798_v16  ;;  %v4908_v13 = vadd.f32 %v4897_v4, %v4799_v47  ;;  %v4498_v4 = vrot.slane %v8399_v21, 2 }
 0x3fd   : > { %5161 = vrot.lane.b32.xlu0 %v4333_v43, %s6039_s25  ;;  %5159 = vrot.lane.b32.xlu1 %v4332_v15, %s6039_s25 }
 0x3fe   : > { %v5075_v63 = vpop.permute.xlu1 %5074  ;;  %v5016_v52 = vadd.f32 %v5007_v37, %v4907_v28 }
 0x3ff   : > { %v8405_v43 = vpop.permute.xlu0 %5149  ;;  %v5116_v36 = vsel %vm5102_vm4, %v8276_v7, %v5075_v63  ;;  %v4824_v7 = vrot.slane %v8370_v53, 5 }
 0x400   : > { %v5125_v1 = vadd.f32 %v5116_v36, %v5016_v52 }
 0x401   : > { %4981 = vrot.lane.b32.xlu0 %v4933_v51, %s6037_s21  ;;  %4436 = vrot.lane.b32.xlu1 %v4388_v62, %s6032_s16  ;;  %v5115_v51 = vsel %vm5102_vm4, %v5075_v63, %v8389_v58  ;;  %v8446_v63 = vrot.slane %v8133_v12, %v9246_v33 }
 0x402   : > { %v8415_v15 = vpop.permute.xlu1 %4967 }
 0x403   : > { %v5006_v39 = vsel %vm4993_vm3, %v8299_v49, %v8415_v15  ;;  %v8426_v16 = vpop.permute.xlu0 %4969  ;;  %v4606_v49 = vrot.slane %v8370_v53, 3 }
 0x404   : > { %v5017_v8 = vadd.f32 %v5006_v39, %v4908_v13 }
 0x405   : > { %4438 = vrot.lane.b32.xlu0 %v4389_v6, %s6032_s16  ;;  %4545 = vrot.lane.b32.xlu1 %v4497_v46, %s6033_s17 }
 0x406   : > { %v5148_v28 = vpop.permute.xlu1 %5147  ;;  %v5126_v62 = vadd.f32 %v5115_v51, %v5017_v8  ;;  %v4607_v8 = vrot.slane %v8399_v21, 3  ;;  %v4715_v51 = vrot.slane %v8370_v53, 4 }
 0x407   : > { %v5188_v47 = vsel %vm5175_vm5, %v5148_v28, %v8405_v43  ;;  %v5189_v37 = vsel %vm5175_vm5, %v8291_v61, %v5148_v28  ;;  %v8442_v13 = vpop.permute.xlu0 %4426  ;;  %v4716_v61 = vrot.slane %v8399_v21, 4 }
 0x408   : > { %v5198_v52 = vadd.f32 %v5189_v37, %v5125_v1  ;;  %v5199_v6 = vadd.f32 %v5188_v47, %v5126_v62 }
 0x409   : > { %4547 = vrot.lane.b32.xlu0 %v4498_v4, %s6033_s17  ;;  %4654 = vrot.lane.b32.xlu1 %v4606_v49, %s6034_s18 }
 0x40a   : > { %v5226_v46 = vadd.f32 %v8446_v63, %v5198_v52  ;;  %v5227_v36 = vadd.f32 %v8446_v63, %v5199_v6  ;;  %v4425_v39 = vpop.permute.xlu1 %4424 }
 0x40b   : > { %v4459_v12 = vsel %vm4448_vm14, %v4425_v39, %v8442_v13  ;;  %v4460_v1 = vsel %vm4448_vm14, %v8307_v57, %v4425_v39  ;;  %v8460_v28 = vpop.permute.xlu0 %4535 }
 0x40c   : > { %v5244_v62 = vsub.f32 0.0, %v5226_v46  ;;  %v5245_v4 = vsub.f32 0.0, %v5227_v36  ;;  %v4473_v37 = vadd.f32 %v4460_v1, %v8102_v44  ;;  %v4474_v52 = vadd.f32 %v4459_v12, %v8110_v20 }
 0x40d   : > { %4656 = vrot.lane.b32.xlu0 %v4607_v8, %s6034_s18  ;;  %4763 = vrot.lane.b32.xlu1 %v4715_v51, %s6035_s19  ;;  %v4825_v8 = vrot.slane %v8399_v21, 5  ;;  %v5042_v51 = vrot.slane %v8370_v53, 7 }
 0x40e   : > { %v5266_v49 = vmul.f32 1.442695, %v5244_v62  ;;  %v5268_v47 = vmul.f32 1.442695, %v5245_v4  ;;  %v4534_v6 = vpop.permute.xlu1 %4533 }
 0x40f   : > { %v4568_v57 = vsel %vm4557_vm15, %v4534_v6, %v8460_v28  ;;  %v4569_v46 = vsel %vm4557_vm15, %v8315_v60, %v4534_v6  ;;  %v8474_v36 = vpop.permute.xlu0 %4644 }
 0x410   : > { %5938 = vpow2.f32 %v5266_v49  ;;  %v4582_v39 = vadd.f32 %v4569_v46, %v4473_v37  ;;  %v4583_v44 = vadd.f32 %v4568_v57, %v4474_v52  ;;  %v5043_v49 = vrot.slane %v8399_v21, 7 }
 0x411   : > { %5940 = vpow2.f32 %v5268_v47  ;;  %4765 = vrot.lane.b32.xlu0 %v4716_v61, %s6035_s19  ;;  %4872 = vrot.lane.b32.xlu1 %v4824_v7, %s6036_s20  ;;  %v8492_v7 = vrot.slane %v8169_v19, %v9255_v27  ;;  %v4934_v47 = vrot.slane %v8399_v21, 6  ;;  %v4335_v27 = vmul.f32 %v8384_v48, %v8260_v24 }
 0x412   : > { %v4643_v20 = vpop.permute.xlu1 %4642 }
 0x413   : > { %v4677_v12 = vsel %vm4666_vm0, %v4643_v20, %v8474_v36  ;;  %v4678_v60 = vsel %vm4666_vm0, %v8323_v40, %v4643_v20  ;;  %v8486_v1 = vpop.permute.xlu0 %4753  ;;  %v8510_v46 = vmul.f32 %v8492_v7, %v8262_v14 }
 0x414   : > { %v4691_v62 = vadd.f32 %v4678_v60, %v4582_v39  ;;  %v4692_v4 = vadd.f32 %v4677_v12, %v4583_v44  ;;  %v8514_v44 = vrot.slane %v8169_v19, %v9256_v50  ;;  %v5005_v50 = vsel %vm4993_vm3, %v8415_v15, %v8426_v16 }
 0x415   : > { %4874 = vrot.lane.b32.xlu0 %v4825_v8, %s6036_s20  ;;  %5090 = vrot.lane.b32.xlu1 %v5042_v51, %s6038_s22  ;;  %v4334_v51 = vmul.f32 %v8347_v32, %v8254_v17  ;;  %v4935_v19 = vrot.slane %v8510_v46, 6 }
 0x416   : > { %v4752_v61 = vpop.permute.xlu1 %4751 }
 0x417   : > { %v4786_v40 = vsel %vm4775_vm1, %v4752_v61, %v8486_v1  ;;  %v4787_v37 = vsel %vm4775_vm1, %v8337_v18, %v4752_v61  ;;  %v8502_v57 = vpop.permute.xlu0 %4862 }
 0x418   : > { %v4800_v52 = vadd.f32 %v4787_v37, %v4691_v62  ;;  %v4801_v6 = vadd.f32 %v4786_v40, %v4692_v4  ;;  %v8535_v62 = vmul.f32 %v8514_v44, %v8269_v56  ;;  %v4390_v4 = vrot.slane %v8510_v46, 1 }
 0x419   : > { %5092 = vrot.lane.b32.xlu0 %v5043_v49, %s6038_s22  ;;  %4983 = vrot.lane.b32.xlu1 %v4934_v47, %s6037_s21  ;;  %v4499_v56 = vrot.slane %v8510_v46, 2 }
 0x41a   : > { %v5939_v39 = vpop.eup %5938  ;;  %v4861_v18 = vpop.permute.xlu1 %4860  ;;  %v4391_v40 = vrot.slane %v8535_v62, 1 }
 0x41b   : > { %v5941_v20 = vpop.eup %5940  ;;  %v5298_v8 = vadd.f32 1.0, %v5939_v39  ;;  %v4895_v24 = vsel %vm4884_vm2, %v4861_v18, %v8502_v57  ;;  %v4896_v14 = vsel %vm4884_vm2, %v8359_v30, %v4861_v18  ;;  %v8531_v17 = vpop.permute.xlu0 %5080  ;;  %v4500_v18 = vrot.slane %v8535_v62, 2 }
 0x41c   : > { %v5299_v48 = vadd.f32 1.0, %v5941_v20  ;;  %v4909_v12 = vadd.f32 %v4896_v14, %v4800_v52  ;;  %v4910_v60 = vadd.f32 %v4895_v24, %v4801_v6  ;;  %v4608_v20 = vrot.slane %v8510_v46, 3 }
 0x41d   : > { %5942 = vrcp.f32 %v5298_v8  ;;  %5165 = vrot.lane.b32.xlu0 %v4335_v27, %s6039_s25  ;;  %5163 = vrot.lane.b32.xlu1 %v4334_v51, %s6039_s25 }
 0x41e   : > { %5944 = vrcp.f32 %v5299_v48  ;;  %v5018_v32 = vadd.f32 %v5005_v50, %v4909_v12  ;;  %v5079_v30 = vpop.permute.xlu1 %5078  ;;  %v4609_v50 = vrot.slane %v8535_v62, 3 }
 0x41f   : > { %v5113_v15 = vsel %vm5102_vm4, %v5079_v30, %v8531_v17  ;;  %v5114_v61 = vsel %vm5102_vm4, %v8389_v58, %v5079_v30  ;;  %v8553_v58 = vpop.permute.xlu0 %5153 }
 0x420   : > { %v5127_v49 = vadd.f32 %v5114_v61, %v5018_v32  ;;  %v4718_v61 = vrot.slane %v8535_v62, 4 }
 0x421   : > { %4985 = vrot.lane.b32.xlu0 %v4935_v19, %s6037_s21  ;;  %4440 = vrot.lane.b32.xlu1 %v4390_v4, %s6032_s16  ;;  %v4717_v19 = vrot.slane %v8510_v46, 4 }
 0x422   : > { %v4972_v47 = vpop.permute.xlu1 %4971 }
 0x423   : > { %v5004_v37 = vsel %vm4993_vm3, %v8426_v16, %v4972_v47 }
 0x424   : > { %v5019_v52 = vadd.f32 %v5004_v37, %v4910_v60 }
 0x425   : > { %4442 = vrot.lane.b32.xlu0 %v4391_v40, %s6032_s16  ;;  %4549 = vrot.lane.b32.xlu1 %v4499_v56, %s6033_s17 }
 0x426   : > { %v5128_v6 = vadd.f32 %v5113_v15, %v5019_v52  ;;  %v5152_v27 = vpop.permute.xlu1 %5151  ;;  %v254_v15 = vld [vmem:[%s9164_s1 + $0x10] sm:$0x3]  ;;  %v4827_v52 = vrot.slane %v8535_v62, 5 }
 0x427   : > { %v8555_v39 = vpop.eup %5942  ;;  %v5186_v8 = vsel %vm5175_vm5, %v5152_v27, %v8553_v58  ;;  %v5187_v16 = vsel %vm5175_vm5, %v8405_v43, %v5152_v27  ;;  %v8585_v40 = vrot.slane %v254_v15, %v9246_v33 }
 0x428   : > { %v8565_v51 = vpop.eup %5944  ;;  %v5200_v24 = vadd.f32 %v5187_v16, %v5127_v49  ;;  %v5201_v14 = vadd.f32 %v5186_v8, %v5128_v6  ;;  %v4826_v49 = vrot.slane %v8510_v46, 5  ;;  %v5044_v6 = vrot.slane %v8510_v46, 7 }
 0x429   : > { %v5350_v48 = vcombine.low %v8555_v39, %v8565_v51  ;;  %4551 = vrot.lane.b32.xlu0 %v4500_v18, %s6033_s17  ;;  %4658 = vrot.lane.b32.xlu1 %v4608_v20, %s6034_s18  ;;  %v8601_v33 = vmul.f32 %v8585_v40, %v8311_v9 }
 0x42a   : > { %v5228_v12 = vadd.f32 %v8446_v63, %v5200_v24  ;;  %v5229_v60 = vadd.f32 %v8446_v63, %v5201_v14  ;;  %v5045_v24 = vrot.slane %v8535_v62, 7  ;;  %v8609_v14 = vrot.slane %v254_v15, %v9247_v42 }
 0x42c   : > { %v5246_v43 = vsub.f32 0.0, %v5228_v12  ;;  %v5247_v32 = vsub.f32 0.0, %v5229_v60  ;;  %v4937_v60 = vrot.slane %v8601_v33, 6 }
 0x42d   : > { %4660 = vrot.lane.b32.xlu0 %v4609_v50, %s6034_s18  ;;  %4767 = vrot.lane.b32.xlu1 %v4717_v19, %s6035_s19 }
 0x42e   : > { %v5270_v30 = vmul.f32 1.442695, %v5246_v43  ;;  %v5272_v4 = vmul.f32 1.442695, %v5247_v32 }
 0x430   : > { %5946 = vpow2.f32 %v5270_v30 }
 0x431   : > { %5948 = vpow2.f32 %v5272_v4  ;;  %4769 = vrot.lane.b32.xlu0 %v4718_v61, %s6035_s19  ;;  %4876 = vrot.lane.b32.xlu1 %v4826_v49, %s6036_s20 }
 0x433   : > { %v8587_v56 = vpop.permute.xlu0 %4973  ;;  %v4429_v37 = vpop.permute.xlu1 %4428 }
 0x434   : > { %v5003_v27 = vsel %vm4993_vm3, %v4972_v47, %v8587_v56  ;;  %v4458_v18 = vsel %vm4448_vm14, %v8442_v13, %v4429_v37  ;;  %v4936_v47 = vrot.slane %v8535_v62, 6 }
 0x435   : > { %4878 = vrot.lane.b32.xlu0 %v4827_v52, %s6036_s20  ;;  %5094 = vrot.lane.b32.xlu1 %v5044_v6, %s6038_s22  ;;  %v4475_v20 = vadd.f32 %v4458_v18, %v8186_v23  ;;  %v4336_v23 = vmul.f32 %v8492_v7, %v8278_v0 }
 0x437   : > { %v8604_v8 = vpop.permute.xlu0 %4430  ;;  %v4538_v16 = vpop.permute.xlu1 %4537 }
 0x438   : > { %v4457_v13 = vsel %vm4448_vm14, %v4429_v37, %v8604_v8  ;;  %v4567_v9 = vsel %vm4557_vm15, %v8460_v28, %v4538_v16  ;;  %v8627_v28 = vmul.f32 %v8609_v14, %v8317_v2  ;;  %v4392_v37 = vrot.slane %v8601_v33, 1 }
 0x439   : > { %v4584_v12 = vadd.f32 %v4567_v9, %v4475_v20  ;;  %5096 = vrot.lane.b32.xlu0 %v5045_v24, %s6038_s22  ;;  %4987 = vrot.lane.b32.xlu1 %v4936_v47, %s6037_s21  ;;  %v4476_v43 = vadd.f32 %v4457_v13, %v8192_v59  ;;  %v4501_v47 = vrot.slane %v8601_v33, 2 }
 0x43a   : > { %v5947_v42 = vpop.eup %5946  ;;  %v4393_v49 = vrot.slane %v8627_v28, 1  ;;  %v4502_v24 = vrot.slane %v8627_v28, 2 }
 0x43b   : > { %v5949_v50 = vpop.eup %5948  ;;  %v5300_v19 = vadd.f32 1.0, %v5947_v42  ;;  %v8623_v32 = vpop.permute.xlu0 %4539 }
 0x43c   : > { %v4647_v30 = vpop.permute.xlu1 %4646  ;;  %v5301_v4 = vadd.f32 1.0, %v5949_v50  ;;  %v4566_v15 = vsel %vm4557_vm15, %v4538_v16, %v8623_v32 }
 0x43d   : > { %v4676_v0 = vsel %vm4666_vm0, %v8474_v36, %v4647_v30  ;;  %5950 = vrcp.f32 %v5300_v19  ;;  %v4585_v7 = vadd.f32 %v4566_v15, %v4476_v43  ;;  %4989 = vrot.lane.b32.xlu0 %v4937_v60, %s6037_s21  ;;  %5167 = vrot.lane.b32.xlu1 %v4336_v23, %s6039_s25  ;;  %v4611_v19 = vrot.slane %v8627_v28, 3 }
 0x43e   : > { %v4693_v61 = vadd.f32 %v4676_v0, %v4584_v12  ;;  %5952 = vrcp.f32 %v5301_v4  ;;  %v4610_v43 = vrot.slane %v8601_v33, 3 }
 0x43f   : > { %v8637_v59 = vpop.permute.xlu0 %4648 }
 0x440   : > { %v4756_v2 = vpop.permute.xlu1 %4755  ;;  %v4675_v52 = vsel %vm4666_vm0, %v4647_v30, %v8637_v59 }
 0x441   : > { %v4785_v36 = vsel %vm4775_vm1, %v8486_v1, %v4756_v2  ;;  %v4694_v6 = vadd.f32 %v4675_v52, %v4585_v7  ;;  %4446 = vrot.lane.b32.xlu0 %v4393_v49, %s6032_s16  ;;  %4444 = vrot.lane.b32.xlu1 %v4392_v37, %s6032_s16  ;;  %v4719_v52 = vrot.slane %v8601_v33, 4 }
 0x442   : > { %v4802_v18 = vadd.f32 %v4785_v36, %v4693_v61 }
 0x443   : > { %v8649_v20 = vpop.permute.xlu0 %4757 }
 0x444   : > { %v4865_v16 = vpop.permute.xlu1 %4864  ;;  %v4784_v13 = vsel %vm4775_vm1, %v4756_v2, %v8649_v20 }
 0x445   : > { %v4894_v1 = vsel %vm4884_vm2, %v8502_v57, %v4865_v16  ;;  %v4803_v9 = vadd.f32 %v4784_v13, %v4694_v6  ;;  %4555 = vrot.lane.b32.xlu0 %v4502_v24, %s6033_s17  ;;  %4553 = vrot.lane.b32.xlu1 %v4501_v47, %s6033_s17  ;;  %v4829_v24 = vrot.slane %v8627_v28, 5  ;;  %v4828_v47 = vrot.slane %v8601_v33, 5 }
 0x446   : > { %v4911_v12 = vadd.f32 %v4894_v1, %v4802_v18 }
 0x447   : > { %v5951_v23 = vpop.eup %5950  ;;  %v8661_v60 = vpop.permute.xlu0 %4866 }
 0x448   : > { %v5083_v42 = vpop.permute.xlu1 %5082  ;;  %v5020_v50 = vadd.f32 %v5003_v27, %v4911_v12  ;;  %v5953_v30 = vpop.eup %5952  ;;  %v4893_v57 = vsel %vm4884_vm2, %v4865_v16, %v8661_v60  ;;  %v9281_v27 = vld [vmem:[#allocation13_spill] sm:$0xff] }
 0x449   : > { %v5112_v4 = vsel %vm5102_vm4, %v8531_v17, %v5083_v42  ;;  %v5351_v15 = vcombine.low %v5951_v23, %v5953_v30  ;;  %v4912_v0 = vadd.f32 %v4893_v57, %v4803_v9  ;;  %4664 = vrot.lane.b32.xlu0 %v4611_v19, %s6034_s18  ;;  %4662 = vrot.lane.b32.xlu1 %v4610_v43, %s6034_s18  ;;  %v4720_v17 = vrot.slane %v8627_v28, 4 }
 0x44a   : > { %v5129_v7 = vadd.f32 %v5112_v4, %v5020_v50  ;;  %v8677_v61 = vrot.slane %v5350_v48, %v9281_v27  ;;  %v4938_v19 = vrot.slane %v8627_v28, 6  ;;  %v5047_v43 = vrot.slane %v8627_v28, 7 }
 0x44b   : > { %v8680_v2 = vrot.slane %v5351_v15, %v9281_v27  ;;  %v8682_v49 = vpop.permute.xlu0 %5084  ;;  %v4339_v15 = vmul.f32 %v8609_v14, %v8327_v54 }
 0x44c   : > { %v4976_v37 = vpop.permute.xlu1 %4975  ;;  %v5111_v36 = vsel %vm5102_vm4, %v5083_v42, %v8682_v49 }
 0x44d   : > { %v5002_v39 = vsel %vm4993_vm3, %v8587_v56, %v4976_v37  ;;  %4773 = vrot.lane.b32.xlu0 %v4720_v17, %s6035_s19  ;;  %4771 = vrot.lane.b32.xlu1 %v4719_v52, %s6035_s19 }
 0x44e   : > { %v5021_v48 = vadd.f32 %v5002_v39, %v4912_v0  ;;  %v4337_v0 = vmul.f32 %v8514_v44, %v8280_v31 }
 0x44f   : > { %v8696_v6 = vpop.permute.xlu0 %5157 }
 0x450   : > { %v5156_v18 = vpop.permute.xlu1 %5155  ;;  %v5130_v16 = vadd.f32 %v5111_v36, %v5021_v48  ;;  %v5046_v48 = vrot.slane %v8601_v33, 7 }
 0x451   : > { %v5184_v56 = vsel %vm5175_vm5, %v5156_v18, %v8696_v6  ;;  %v5185_v13 = vsel %vm5175_vm5, %v8553_v58, %v5156_v18  ;;  %4882 = vrot.lane.b32.xlu0 %v4829_v24, %s6036_s20  ;;  %4880 = vrot.lane.b32.xlu1 %v4828_v47, %s6036_s20 }
 0x452   : > { %v5202_v1 = vadd.f32 %v5185_v13, %v5129_v7  ;;  %v5203_v9 = vadd.f32 %v5184_v56, %v5130_v16 }
 0x453   : > { %v8710_v42 = vpop.permute.xlu0 %4977 }
 0x454   : > { %v5230_v12 = vadd.f32 %v8446_v63, %v5202_v1  ;;  %v5231_v23 = vadd.f32 %v8446_v63, %v5203_v9  ;;  %v4433_v50 = vpop.permute.xlu1 %4432  ;;  %v5001_v58 = vsel %vm4993_vm3, %v4976_v37, %v8710_v42 }
 0x455   : > { %v4456_v30 = vsel %vm4448_vm14, %v8604_v8, %v4433_v50  ;;  %4991 = vrot.lane.b32.xlu0 %v4938_v19, %s6037_s21  ;;  %5100 = vrot.lane.b32.xlu1 %v5047_v43, %s6038_s22 }
 0x456   : > { %v5248_v57 = vsub.f32 0.0, %v5230_v12  ;;  %v5249_v4 = vsub.f32 0.0, %v5231_v23  ;;  %v4477_v37 = vadd.f32 %v4456_v30, %v8267_v45  ;;  %v4338_v45 = vmul.f32 %v8585_v40, %v8325_v35 }
 0x457   : > { %v8727_v52 = vpop.permute.xlu0 %4434 }
 0x458   : > { %v5274_v7 = vmul.f32 1.442695, %v5248_v57  ;;  %v5276_v17 = vmul.f32 1.442695, %v5249_v4  ;;  %v4542_v36 = vpop.permute.xlu1 %4541  ;;  %v4455_v8 = vsel %vm4448_vm14, %v4433_v50, %v8727_v52 }
 0x459   : > { %v4565_v39 = vsel %vm4557_vm15, %v8623_v32, %v4542_v36  ;;  %5169 = vrot.lane.b32.xlu0 %v4337_v0, %s6039_s25  ;;  %5173 = vrot.lane.b32.xlu1 %v4339_v15, %s6039_s25  ;;  %v4478_v31 = vadd.f32 %v4455_v8, %v8288_v10 }
 0x45a   : > { %5954 = vpow2.f32 %v5274_v7  ;;  %v4586_v54 = vadd.f32 %v4565_v39, %v4477_v37 }
 0x45b   : > { %5956 = vpow2.f32 %v5276_v17  ;;  %v8740_v44 = vpop.permute.xlu0 %4543 }
 0x45c   : > { %v4651_v14 = vpop.permute.xlu1 %4650  ;;  %v4564_v32 = vsel %vm4557_vm15, %v4542_v36, %v8740_v44 }
 0x45d   : > { %v4674_v18 = vsel %vm4666_vm0, %v8637_v59, %v4651_v14  ;;  %v4587_v16 = vadd.f32 %v4564_v32, %v4478_v31  ;;  %5098 = vrot.lane.b32.xlu0 %v5046_v48, %s6038_s22  ;;  %5171 = vrot.lane.b32.xlu1 %v4338_v45, %s6039_s25 }
 0x45e   : > { %v4695_v24 = vadd.f32 %v4674_v18, %v4586_v54 }
 0x45f   : > { %v8751_v35 = vpop.permute.xlu0 %4652 }
 0x460   : > { %v4760_v10 = vpop.permute.xlu1 %4759  ;;  %v4673_v40 = vsel %vm4666_vm0, %v4651_v14, %v8751_v35 }
 0x461   : > { %v4783_v47 = vsel %vm4775_vm1, %v8649_v20, %v4760_v10  ;;  %v4696_v56 = vadd.f32 %v4673_v40, %v4587_v16 }
 0x462   : > { %v4804_v13 = vadd.f32 %v4783_v47, %v4695_v24 }
 0x463   : > { %v4762_v1 = vpop.permute.xlu0 %4761 }
 0x464   : > { %v5955_v59 = vpop.eup %5954  ;;  %v4869_v9 = vpop.permute.xlu1 %4868  ;;  %v4782_v50 = vsel %vm4775_vm1, %v4760_v10, %v4762_v1 }
 0x465   : > { %v5957_v12 = vpop.eup %5956  ;;  %v5302_v23 = vadd.f32 1.0, %v5955_v59  ;;  %v4892_v19 = vsel %vm4884_vm2, %v8661_v60, %v4869_v9  ;;  %v4805_v30 = vadd.f32 %v4782_v50, %v4696_v56 }
 0x466   : > { %v5303_v43 = vadd.f32 1.0, %v5957_v12  ;;  %v4913_v57 = vadd.f32 %v4892_v19, %v4804_v13 }
 0x467   : > { %5958 = vrcp.f32 %v5302_v23  ;;  %v4871_v20 = vpop.permute.xlu0 %4870 }
 0x468   : > { %5960 = vrcp.f32 %v5303_v43  ;;  %v5022_v4 = vadd.f32 %v5001_v58, %v4913_v57  ;;  %v5087_v15 = vpop.permute.xlu1 %5086  ;;  %v4891_v0 = vsel %vm4884_vm2, %v4869_v9, %v4871_v20 }
 0x469   : > { %v5110_v7 = vsel %vm5102_vm4, %v8682_v49, %v5087_v15  ;;  %v4914_v17 = vadd.f32 %v4891_v0, %v4805_v30 }
 0x46a   : > { %v5131_v37 = vadd.f32 %v5110_v7, %v5022_v4 }
 0x46b   : > { %v8769_v36 = vpop.permute.xlu0 %5088 }
 0x46c   : > { %v4980_v60 = vpop.permute.xlu1 %4979  ;;  %v5109_v8 = vsel %vm5102_vm4, %v5087_v15, %v8769_v36 }
 0x46d   : > { %v5000_v58 = vsel %vm4993_vm3, %v8710_v42, %v4980_v60 }
 0x46e   : > { %v5023_v39 = vadd.f32 %v5000_v58, %v4914_v17 }
 0x46f   : > { %v8777_v54 = vpop.permute.xlu0 %5161 }
 0x470   : > { %v5132_v45 = vadd.f32 %v5109_v8, %v5023_v39  ;;  %v5160_v31 = vpop.permute.xlu1 %5159 }
 0x471   : > { %v8779_v14 = vpop.eup %5958  ;;  %v5182_v49 = vsel %vm5175_vm5, %v5160_v31, %v8777_v54  ;;  %v5183_v48 = vsel %vm5175_vm5, %v8696_v6, %v5160_v31 }
 0x472   : > { %v8787_v32 = vpop.eup %5960  ;;  %v5204_v18 = vadd.f32 %v5183_v48, %v5131_v37  ;;  %v5205_v16 = vadd.f32 %v5182_v49, %v5132_v45 }
 0x473   : > { %v5397_v42 = vcombine.low %v8779_v14, %v8787_v32  ;;  %v4982_v40 = vpop.permute.xlu0 %4981 }
 0x474   : > { %v5232_v24 = vadd.f32 %v8446_v63, %v5204_v18  ;;  %v5233_v10 = vadd.f32 %v8446_v63, %v5205_v16  ;;  %v4437_v47 = vpop.permute.xlu1 %4436  ;;  %v4999_v56 = vsel %vm4993_vm3, %v4980_v60, %v4982_v40 }
 0x475   : > { %v4454_v6 = vsel %vm4448_vm14, %v8727_v52, %v4437_v47 }
 0x476   : > { %v5250_v13 = vsub.f32 0.0, %v5232_v24  ;;  %v5251_v59 = vsub.f32 0.0, %v5233_v10  ;;  %v4479_v23 = vadd.f32 %v4454_v6, %v8370_v53 }
 0x477   : > { %v4439_v50 = vpop.permute.xlu0 %4438 }
 0x478   : > { %v5278_v9 = vmul.f32 1.442695, %v5250_v13  ;;  %v5280_v12 = vmul.f32 1.442695, %v5251_v59  ;;  %v4546_v19 = vpop.permute.xlu1 %4545  ;;  %v4453_v43 = vsel %vm4448_vm14, %v4437_v47, %v4439_v50 }
 0x479   : > { %v4563_v30 = vsel %vm4557_vm15, %v8740_v44, %v4546_v19  ;;  %v4480_v52 = vadd.f32 %v4453_v43, %v8399_v21 }
 0x47a   : > { %5962 = vpow2.f32 %v5278_v9  ;;  %v4588_v57 = vadd.f32 %v4563_v30, %v4479_v23 }
 0x47b   : > { %5964 = vpow2.f32 %v5280_v12  ;;  %v4548_v4 = vpop.permute.xlu0 %4547 }
 0x47c   : > { %v4655_v15 = vpop.permute.xlu1 %4654  ;;  %v4562_v0 = vsel %vm4557_vm15, %v4546_v19, %v4548_v4 }
 0x47d   : > { %v4672_v53 = vsel %vm4666_vm0, %v8751_v35, %v4655_v15  ;;  %v4589_v7 = vadd.f32 %v4562_v0, %v4480_v52 }
 0x47e   : > { %v4697_v17 = vadd.f32 %v4672_v53, %v4588_v57 }
 0x47f   : > { %v4657_v37 = vpop.permute.xlu0 %4656 }
 0x480   : > { %v4764_v60 = vpop.permute.xlu1 %4763  ;;  %v4671_v44 = vsel %vm4666_vm0, %v4655_v15, %v4657_v37 }
 0x481   : > { %v4781_v8 = vsel %vm4775_vm1, %v4762_v1, %v4764_v60  ;;  %v4698_v21 = vadd.f32 %v4671_v44, %v4589_v7 }
 0x482   : > { %v4806_v58 = vadd.f32 %v4781_v8, %v4697_v17 }
 0x483   : > { %v4766_v45 = vpop.permute.xlu0 %4765 }
 0x484   : > { %v5963_v39 = vpop.eup %5962  ;;  %v4873_v31 = vpop.permute.xlu1 %4872  ;;  %v4780_v35 = vsel %vm4775_vm1, %v4764_v60, %v4766_v45 }
 0x485   : > { %v5965_v49 = vpop.eup %5964  ;;  %v5304_v48 = vadd.f32 1.0, %v5963_v39  ;;  %v4890_v18 = vsel %vm4884_vm2, %v4871_v20, %v4873_v31  ;;  %v4807_v24 = vadd.f32 %v4780_v35, %v4698_v21 }
 0x486   : > { %v5305_v16 = vadd.f32 1.0, %v5965_v49  ;;  %v4915_v10 = vadd.f32 %v4890_v18, %v4806_v58  ;;  %v8854_v58 = vrot.slane %v5397_v42, %v9281_v27 }
 0x487   : > { %5966 = vrcp.f32 %v5304_v48  ;;  %v8818_v47 = vpop.permute.xlu0 %4874 }
 0x488   : > { %5968 = vrcp.f32 %v5305_v16  ;;  %v5091_v1 = vpop.permute.xlu1 %5090  ;;  %v5024_v6 = vadd.f32 %v4999_v56, %v4915_v10  ;;  %v4889_v13 = vsel %vm4884_vm2, %v4873_v31, %v8818_v47 }
 0x489   : > { %v5108_v59 = vsel %vm5102_vm4, %v8769_v36, %v5091_v1  ;;  %v4916_v9 = vadd.f32 %v4889_v13, %v4807_v24 }
 0x48a   : > { %v5133_v12 = vadd.f32 %v5108_v59, %v5024_v6 }
 0x48b   : > { %v8826_v20 = vpop.permute.xlu0 %5092 }
 0x48c   : > { %v8828_v23 = vpop.permute.xlu1 %4983  ;;  %v5107_v56 = vsel %vm5102_vm4, %v5091_v1, %v8826_v20 }
 0x48d   : > { %v4998_v19 = vsel %vm4993_vm3, %v4982_v40, %v8828_v23 }
 0x48e   : > { %v5025_v43 = vadd.f32 %v4998_v19, %v4916_v9  ;;  %v4465_v9 = vsel %vm4448_vm14, %v8138_v34, %v8141_v29 }
 0x48f   : > { %v8836_v30 = vpop.permute.xlu0 %5165 }
 0x490   : > { %v5164_v57 = vpop.permute.xlu1 %5163  ;;  %v5134_v52 = vadd.f32 %v5107_v56, %v5025_v43  ;;  %v4574_v56 = vsel %vm4557_vm15, %v8147_v5, %v8150_v26 }
 0x491   : > { %v5967_v36 = vpop.eup %5966  ;;  %v5180_v15 = vsel %vm5175_vm5, %v5164_v57, %v8836_v30  ;;  %v5181_v0 = vsel %vm5175_vm5, %v8777_v54, %v5164_v57 }
 0x492   : > { %v5969_v53 = vpop.eup %5968  ;;  %v5206_v40 = vadd.f32 %v5181_v0, %v5133_v12  ;;  %v5207_v7 = vadd.f32 %v5180_v15, %v5134_v52  ;;  %v4468_v52 = vadd.f32 %v4465_v9, %v7981_v41  ;;  %v9282_v15 = vld [vmem:[#allocation7_spill] sm:$0xff]  ;;  %v9283_v0 = vld [vmem:[#allocation5_spill] sm:$0xff]  ;;  %v9292_v9 = vld [vmem:[#allocation8_spill] sm:$0xff] }
 0x493   : > { %v5398_v17 = vcombine.low %v5967_v36, %v5969_v53  ;;  %v8846_v8 = vpop.permute.xlu0 %4985  ;;  %v4683_v53 = vsel %vm4666_vm0, %v9283_v0, %v9282_v15 }
 0x494   : > { %v5234_v60 = vadd.f32 %v8446_v63, %v5206_v40  ;;  %v5235_v44 = vadd.f32 %v8446_v63, %v5207_v7  ;;  %v8848_v21 = vpop.permute.xlu1 %4440  ;;  %v4464_v40 = vsel %vm4448_vm14, %v8141_v29, %v8212_v55  ;;  %v9284_v7 = vld [vmem:[#allocation23_spill] sm:$0xff] }
 0x495   : > { %v8857_v54 = vrot.slane %v5398_v17, %v9281_v27  ;;  %v4452_v39 = vsel %vm4448_vm14, %v4439_v50, %v8848_v21  ;;  %v9285_v17 = vld [vmem:[#allocation22_spill] sm:$0xff] }
 0x496   : > { %v5252_v31 = vsub.f32 0.0, %v5234_v60  ;;  %v5253_v49 = vsub.f32 0.0, %v5235_v44  ;;  %v4481_v16 = vadd.f32 %v4452_v39, %v8510_v46  ;;  %v4572_v60 = vsel %vm4557_vm15, %v9285_v17, %v9284_v7  ;;  %v9286_v44 = vld [vmem:[#allocation17_spill] sm:$0xff]  ;;  %v9295_v7 = vld [vmem:[#allocation10_spill] sm:$0xff] }
 0x497   : > { %v5429_v48 = vcombine.low %v8854_v58, %v8857_v54  ;;  %v8865_v24 = vpop.permute.xlu0 %4442  ;;  %v4573_v29 = vsel %vm4557_vm15, %v8150_v26, %v9285_v17  ;;  %v9294_v26 = vld [vmem:[#allocation26_spill] sm:$0xff]  ;;  %v9296_v17 = vld [vmem:[#allocation11_spill] sm:$0xff] }
 0x498   : > { %v5282_v35 = vmul.f32 1.442695, %v5252_v31  ;;  %v5284_v18 = vmul.f32 1.442695, %v5253_v49  ;;  %v8867_v14 = vpop.permute.xlu1 %4549  ;;  %v9287_v49 = vld [vmem:[#allocation6_spill] sm:$0xff] }
 0x499   : > { %v4561_v32 = vsel %vm4557_vm15, %v4548_v4, %v8867_v14 }
 0x49a   : > { %5970 = vpow2.f32 %v5282_v35  ;;  %v4590_v42 = vadd.f32 %v4561_v32, %v4481_v16  ;;  %v9288_v35 = vld [vmem:[#allocation4_spill] sm:$0xff] }
 0x49b   : > { %5972 = vpow2.f32 %v5284_v18  ;;  %v8872_v50 = vpop.permute.xlu0 %4551  ;;  %v4792_v18 = vsel %vm4775_vm1, %v9288_v35, %v9287_v49  ;;  %v9290_v16 = vld [vmem:[#allocation24_spill] sm:$0xff] }
 0x49c   : > { %v8874_v10 = vpop.permute.xlu1 %4658 }
 0x49d   : > { %v4670_v1 = vsel %vm4666_vm0, %v4657_v37, %v8874_v10 }
 0x49e   : > { %v4699_v46 = vadd.f32 %v4670_v1, %v4590_v42  ;;  %v9291_v1 = vld [vmem:[#allocation16_spill] sm:$0xff] }
 0x49f   : > { %v8879_v6 = vpop.permute.xlu0 %4660 }
 0x4a0   : > { %v8881_v13 = vpop.permute.xlu1 %4767 }
 0x4a1   : > { %v4779_v4 = vsel %vm4775_vm1, %v4766_v45, %v8881_v13  ;;  %v4463_v45 = vsel %vm4448_vm14, %v8212_v55, %v8216_v22  ;;  %v4577_v22 = vadd.f32 %v4574_v56, %v4468_v52  ;;  %v9289_v55 = vld [vmem:[#allocation25_spill] sm:$0xff]  ;;  %v4682_v56 = vsel %vm4666_vm0, %v9282_v15, %v9290_v16 }
 0x4a2   : > { %v8886_v59 = vadd.f32 %v4779_v4, %v4699_v46  ;;  %v4470_v41 = vadd.f32 %v4463_v45, %v9286_v44  ;;  %v4681_v32 = vsel %vm4666_vm0, %v9290_v16, %v9289_v55  ;;  %v4469_v46 = vadd.f32 %v4464_v40, %v9291_v1  ;;  %v9299_v55 = vld [vmem:[#allocation18_spill] sm:$0xff] }
 0x4a3   : > { %v8892_v19 = vpop.permute.xlu0 %4769  ;;  %v4686_v42 = vadd.f32 %v4683_v53, %v4577_v22  ;;  %v4790_v45 = vsel %vm4775_vm1, %v9294_v26, %v8242_v38  ;;  %v4791_v15 = vsel %vm4775_vm1, %v9287_v49, %v9294_v26  ;;  %v9297_v22 = vld [vmem:[#allocation27_spill] sm:$0xff]  ;;  %v9300_v49 = vld [vmem:[#allocation28_spill] sm:$0xff]  ;;  %v9301_v26 = vld [vmem:[#allocation21_spill] sm:$0xff] }
 0x4a4   : > { %v5971_v12 = vpop.eup %5970  ;;  %v8894_v37 = vpop.permute.xlu1 %4876  ;;  %v4579_v4 = vadd.f32 %v4572_v60, %v4470_v41  ;;  %v4578_v52 = vadd.f32 %v4573_v29, %v4469_v46  ;;  %v5010_v60 = vsel %vm4993_vm3, %v9296_v17, %v9295_v7  ;;  %v4899_v38 = vsel %vm4884_vm2, %v9297_v22, %v8258_v3  ;;  %v9298_v29 = vld [vmem:[#allocation19_spill] sm:$0xff] }
 0x4a5   : > { %v5973_v43 = vpop.eup %5972  ;;  %v5306_v57 = vadd.f32 1.0, %v5971_v12  ;;  %v9293_v12 = vld [vmem:[#allocation9_spill] sm:$0xff]  ;;  %v5119_v16 = vsel %vm5102_vm4, %v9299_v55, %v9298_v29 }
 0x4a6   : > { %v5307_v36 = vadd.f32 1.0, %v5973_v43  ;;  %v4901_v43 = vsel %vm4884_vm2, %v9293_v12, %v9292_v9  ;;  %v4687_v41 = vadd.f32 %v4682_v56, %v4578_v52 }
 0x4a7   : > { %5974 = vrcp.f32 %v5306_v57  ;;  %v8918_v39 = vpop.permute.xlu0 %4878  ;;  %v4795_v57 = vadd.f32 %v4792_v18, %v4686_v42  ;;  %v5008_v42 = vsel %vm4993_vm3, %v9300_v49, %v8295_v25 }
 0x4a8   : > { %5976 = vrcp.f32 %v5307_v36  ;;  %v8920_v31 = vpop.permute.xlu1 %5094  ;;  %v4688_v36 = vadd.f32 %v4681_v32, %v4579_v4  ;;  %v4900_v32 = vsel %vm4884_vm2, %v9292_v9, %v9297_v22  ;;  %v4796_v3 = vadd.f32 %v4791_v15, %v4687_v41  ;;  %v9303_v22 = vld [vmem:[#allocation30_spill] sm:$0xff] }
 0x4a9   : > { %v4904_v44 = vadd.f32 %v4901_v43, %v4795_v57  ;;  %v5009_v9 = vsel %vm4993_vm3, %v9295_v7, %v9300_v49  ;;  %v4888_v15 = vsel %vm4884_vm2, %v8818_v47, %v8894_v37 }
 0x4aa   : > { %v4797_v18 = vadd.f32 %v4790_v45, %v4688_v36  ;;  %v9302_v45 = vld [vmem:[#allocation20_spill] sm:$0xff]  ;;  %v4905_v36 = vadd.f32 %v4900_v32, %v4796_v3 }
 0x4ab   : > { %v8947_v53 = vpop.permute.xlu0 %5096  ;;  %v5013_v1 = vadd.f32 %v5010_v60, %v4904_v44  ;;  %v5192_v57 = vsel %vm5175_vm5, %v9302_v45, %v9301_v26 }
 0x4ac   : > { %v8949_v40 = vpop.permute.xlu1 %4987  ;;  %v4906_v46 = vadd.f32 %v4899_v38, %v4797_v18  ;;  %v5118_v38 = vsel %vm5102_vm4, %v9298_v29, %v9303_v22  ;;  %v5014_v7 = vadd.f32 %v5009_v9, %v4905_v36  ;;  %v4997_v36 = vsel %vm4993_vm3, %v8828_v23, %v8846_v8 }
 0x4ad   : > { %v5122_v52 = vadd.f32 %v5119_v16, %v5013_v1  ;;  %v9304_v16 = vld [vmem:[#allocation29_spill] sm:$0xff]  ;;  %v4917_v1 = vadd.f32 %v4888_v15, %v8886_v59  ;;  %v5106_v59 = vsel %vm5102_vm4, %v8826_v20, %v8920_v31  ;;  %v4560_v20 = vsel %vm4557_vm15, %v8867_v14, %v8872_v50 }
 0x4ae   : > { %v5015_v60 = vadd.f32 %v5008_v42, %v4906_v46  ;;  %v5117_v32 = vsel %vm5102_vm4, %v9303_v22, %v9304_v16  ;;  %v9305_v42 = vld [vmem:[#allocation32_spill] sm:$0xff]  ;;  %v5123_v29 = vadd.f32 %v5118_v38, %v5014_v7  ;;  %v9306_v46 = vld [vmem:[#allocation31_spill] sm:$0xff] }
 0x4af   : > { %v8975_v4 = vpop.permute.xlu0 %4989  ;;  %v5195_v41 = vadd.f32 %v5192_v57, %v5122_v52  ;;  %v5191_v47 = vsel %vm5175_vm5, %v9301_v26, %v9305_v42  ;;  %v5190_v57 = vsel %vm5175_vm5, %v9305_v42, %v9306_v46  ;;  %v5026_v26 = vadd.f32 %v4997_v36, %v4917_v1 }
 0x4b0   : > { %v8977_v43 = vpop.permute.xlu1 %5167  ;;  %v5124_v3 = vadd.f32 %v5117_v32, %v5015_v60  ;;  %v5196_v52 = vadd.f32 %v5191_v47, %v5123_v29  ;;  %v4451_v60 = vsel %vm4448_vm14, %v8848_v21, %v8865_v24 }
 0x4b1   : > { %v8979_v56 = vpop.eup %5974  ;;  %v5223_v9 = vadd.f32 %v8446_v63, %v5195_v41  ;;  %v5179_v23 = vsel %vm5175_vm5, %v8836_v30, %v8977_v43  ;;  %v5135_v32 = vadd.f32 %v5106_v59, %v5026_v26  ;;  %v4482_v47 = vadd.f32 %v4451_v60, %v8535_v62 }
 0x4b2   : > { %v8989_v25 = vpop.eup %5976  ;;  %v5197_v51 = vadd.f32 %v5190_v57, %v5124_v3  ;;  %v5224_v38 = vadd.f32 %v8446_v63, %v5196_v52  ;;  %v4669_v30 = vsel %vm4666_vm0, %v8874_v10, %v8879_v6  ;;  %v9307_v57 = vld [vmem:[#allocation15_spill] sm:$0xff]  ;;  %v4778_v62 = vsel %vm4775_vm1, %v8881_v13, %v8892_v19 }
 0x4b3   : > { %v5399_v44 = vcombine.low %v8979_v56, %v8989_v25  ;;  %v4447_v18 = vpop.permute.xlu0 %4446  ;;  %v5241_v15 = vsub.f32 0.0, %v5223_v9  ;;  %v5208_v1 = vadd.f32 %v5179_v23, %v5135_v32  ;;  %v4591_v46 = vadd.f32 %v4560_v20, %v4482_v47 }
 0x4b4   : > { %v4445_v49 = vpop.permute.xlu1 %4444  ;;  %v4466_v21 = vsel %vm4448_vm14, %v4447_v18, %v8138_v34  ;;  %v5225_v42 = vadd.f32 %v8446_v63, %v5197_v51  ;;  %v5242_v3 = vsub.f32 0.0, %v5224_v38  ;;  %v4887_v59 = vsel %vm4884_vm2, %v8894_v37, %v8918_v39 }
 0x4b5   : > { %v5260_v14 = vmul.f32 1.442695, %v5241_v15  ;;  %v4467_v9 = vadd.f32 %v4466_v21, %v9307_v57  ;;  %v4449_v51 = vsel %vm4448_vm14, %v4445_v49, %v4447_v18  ;;  %v4450_v10 = vsel %vm4448_vm14, %v8865_v24, %v4445_v49 }
 0x4b6   : > { %v5243_v36 = vsub.f32 0.0, %v5225_v42  ;;  %v4700_v26 = vadd.f32 %v4669_v30, %v4591_v46  ;;  %v5236_v13 = vadd.f32 %v8446_v63, %v5208_v1  ;;  %v4483_v15 = vadd.f32 %v4450_v10, %v8601_v33 }
 0x4b7   : > { %v4556_v22 = vpop.permute.xlu0 %4555  ;;  %v4484_v38 = vadd.f32 %v4449_v51, %v8627_v28  ;;  %v5262_v42 = vmul.f32 1.442695, %v5242_v3  ;;  %5978 = vpow2.f32 %v5260_v14  ;;  %v5105_v51 = vsel %vm5102_vm4, %v8920_v31, %v8947_v53 }
 0x4b8   : > { %v4554_v16 = vpop.permute.xlu1 %4553  ;;  %v4575_v29 = vsel %vm4557_vm15, %v4556_v22, %v8147_v5  ;;  %v4809_v49 = vadd.f32 %v4778_v62, %v4700_v26  ;;  %v5254_v47 = vsub.f32 0.0, %v5236_v13  ;;  %v9308_v56 = vcombine.low %v8677_v61, %v8680_v2 }
 0x4b9   : > { %v4576_v60 = vadd.f32 %v4575_v29, %v4467_v9  ;;  %v4558_v18 = vsel %vm4557_vm15, %v4554_v16, %v4556_v22  ;;  %v4559_v24 = vsel %vm4557_vm15, %v8872_v50, %v4554_v16  ;;  %v4996_v22 = vsel %vm4993_vm3, %v8846_v8, %v8949_v40 }
 0x4ba   : > { %v4918_v28 = vadd.f32 %v4887_v59, %v4809_v49  ;;  %v4592_v16 = vadd.f32 %v4559_v24, %v4483_v15  ;;  %v4593_v32 = vadd.f32 %v4558_v18, %v4484_v38  ;;  %v5264_v9 = vmul.f32 1.442695, %v5243_v36 }
 0x4bb   : > { %v4665_v41 = vpop.permute.xlu0 %4664  ;;  %v5286_v10 = vmul.f32 1.442695, %v5254_v47  ;;  %5980 = vpow2.f32 %v5262_v42  ;;  %v4995_v18 = vsel %vm4993_vm3, %v8949_v40, %v8975_v4  ;;  %v5395_v25 = vrot.slane %v9308_v56, %v9281_v27 }
 0x4bc   : > { %v4663_v7 = vpop.permute.xlu1 %4662  ;;  %v4684_v5 = vsel %vm4666_vm0, %v4665_v41, %v9283_v0  ;;  %v5027_v30 = vadd.f32 %v4996_v22, %v4918_v28  ;;  %5982 = vpow2.f32 %v5264_v9 }
 0x4bd   : > { %v4685_v37 = vadd.f32 %v4684_v5, %v4576_v60  ;;  %v4667_v50 = vsel %vm4666_vm0, %v4663_v7, %v4665_v41  ;;  %5984 = vpow2.f32 %v5286_v10 }
 0x4be   : > { %v5136_v59 = vadd.f32 %v5105_v51, %v5027_v30 }
 0x4bf   : > { %v4774_v34 = vpop.permute.xlu0 %4773 }
 0x4c0   : > { %v4772_v52 = vpop.permute.xlu1 %4771  ;;  %v4793_v0 = vsel %vm4775_vm1, %v4774_v34, %v9288_v35  ;;  %v4668_v35 = vsel %vm4666_vm0, %v8879_v6, %v4663_v7  ;;  %v4702_v6 = vadd.f32 %v4667_v50, %v4593_v32 }
 0x4c1   : > { %v4794_v21 = vadd.f32 %v4793_v0, %v4685_v37  ;;  %v4776_v8 = vsel %vm4775_vm1, %v4772_v52, %v4774_v34  ;;  %v4777_v41 = vsel %vm4775_vm1, %v8892_v19, %v4772_v52  ;;  %v4701_v1 = vadd.f32 %v4668_v35, %v4592_v16  ;;  %v5979_v32 = vpop.eup %5978 }
 0x4c2   : > { %v4811_v52 = vadd.f32 %v4776_v8, %v4702_v6 }
 0x4c3   : > { %v4883_v23 = vpop.permute.xlu0 %4882  ;;  %v4810_v34 = vadd.f32 %v4777_v41, %v4701_v1 }
 0x4c4   : > { %v4881_v20 = vpop.permute.xlu1 %4880  ;;  %v4902_v33 = vsel %vm4884_vm2, %v4883_v23, %v9293_v12 }
 0x4c5   : > { %v4903_v7 = vadd.f32 %v4902_v33, %v4794_v21  ;;  %v4885_v12 = vsel %vm4884_vm2, %v4881_v20, %v4883_v23  ;;  %v4886_v3 = vsel %vm4884_vm2, %v8918_v39, %v4881_v20  ;;  %v5981_v42 = vpop.eup %5980 }
 0x4c6   : > { %v4919_v39 = vadd.f32 %v4886_v3, %v4810_v34  ;;  %v4920_v5 = vadd.f32 %v4885_v12, %v4811_v52  ;;  %v5983_v47 = vpop.eup %5982  ;;  %v5296_v6 = vadd.f32 1.0, %v5981_v42 }
 0x4c7   : > { %v4992_v29 = vpop.permute.xlu0 %4991  ;;  %v5985_v41 = vpop.eup %5984 }
 0x4c8   : > { %v5101_v46 = vpop.permute.xlu1 %5100  ;;  %v5011_v57 = vsel %vm4993_vm3, %v4992_v29, %v9296_v17  ;;  %v5028_v15 = vadd.f32 %v4995_v18, %v4919_v39 }
 0x4c9   : > { %v5120_v19 = vsel %vm5102_vm4, %v5101_v46, %v9299_v55  ;;  %v5012_v62 = vadd.f32 %v5011_v57, %v4903_v7  ;;  %v4994_v55 = vsel %vm4993_vm3, %v8975_v4, %v4992_v29  ;;  %v5297_v7 = vadd.f32 1.0, %v5983_v47 }
 0x4ca   : > { %v5029_v24 = vadd.f32 %v4994_v55, %v4920_v5  ;;  %v5295_v29 = vadd.f32 1.0, %v5979_v32  ;;  %v5421_v55 = vrot.slane %v5399_v44, %v9281_v27 }
 0x4cb   : > { %v5121_v26 = vadd.f32 %v5120_v19, %v5012_v62  ;;  %v5170_v17 = vpop.permute.xlu0 %5169 }
 0x4cc   : > { %v5174_v60 = vpop.permute.xlu1 %5173  ;;  %v5178_v14 = vsel %vm5175_vm5, %v8977_v43, %v5170_v17 }
 0x4cd   : > { %v5193_v31 = vsel %vm5175_vm5, %v5174_v60, %v9302_v45  ;;  %v5209_v36 = vadd.f32 %v5178_v14, %v5136_v59 }
 0x4ce   : > { %v5194_v13 = vadd.f32 %v5193_v31, %v5121_v26 }
 0x4cf   : > { %v5237_v0 = vadd.f32 %v8446_v63, %v5209_v36  ;;  %v5099_v43 = vpop.permute.xlu0 %5098 }
 0x4d0   : > { %v5222_v49 = vadd.f32 %v8446_v63, %v5194_v13  ;;  %v5172_v38 = vpop.permute.xlu1 %5171  ;;  %v5103_v45 = vsel %vm5102_vm4, %v5099_v43, %v5101_v46  ;;  %v5104_v37 = vsel %vm5102_vm4, %v8947_v53, %v5099_v43  ;;  %v5308_v46 = vadd.f32 1.0, %v5985_v41 }
 0x4d1   : > { %v5176_v23 = vsel %vm5175_vm5, %v5172_v38, %v5174_v60  ;;  %v5177_v40 = vsel %vm5175_vm5, %v5170_v17, %v5172_v38  ;;  %v5255_v4 = vsub.f32 0.0, %v5237_v0  ;;  %v5137_v22 = vadd.f32 %v5104_v37, %v5028_v15 }
 0x4d2   : > { %v5240_v20 = vsub.f32 0.0, %v5222_v49  ;;  %v5138_v50 = vadd.f32 %v5103_v45, %v5029_v24  ;;  %v5437_v49 = vrot.slane %v5429_v48, %v9281_v27 }
 0x4d3   : > { %v5288_v35 = vmul.f32 1.442695, %v5255_v4  ;;  %v5210_v28 = vadd.f32 %v5177_v40, %v5137_v22 }
 0x4d4   : > { %v5258_v33 = vmul.f32 1.442695, %v5240_v20  ;;  %v5211_v16 = vadd.f32 %v5176_v23, %v5138_v50 }
 0x4d5   : > { %5986 = vpow2.f32 %v5288_v35  ;;  %v5238_v21 = vadd.f32 %v8446_v63, %v5210_v28 }
 0x4d6   : > { %v5239_v53 = vadd.f32 %v8446_v63, %v5211_v16  ;;  %5988 = vpow2.f32 %v5258_v33 }
 0x4d7   : > { %v5256_v8 = vsub.f32 0.0, %v5238_v21 }
 0x4d8   : > { %v5257_v11 = vsub.f32 0.0, %v5239_v53 }
 0x4d9   : > { %v5290_v30 = vmul.f32 1.442695, %v5256_v8 }
 0x4da   : > { %v5292_v1 = vmul.f32 1.442695, %v5257_v11 }
 0x4db   : > { %5990 = vpow2.f32 %v5290_v30 }
 0x4dc   : > { %5992 = vpow2.f32 %v5292_v1 }
 0x4dd   : > { %5994 = vrcp.f32 %v5296_v6 }
 0x4de   : > { %5996 = vrcp.f32 %v5297_v7 }
 0x4df   : > { %v5987_v12 = vpop.eup %5986  ;;  %5998 = vrcp.f32 %v5295_v29 }
 0x4e0   : > { %v5989_v3 = vpop.eup %5988  ;;  %v5309_v63 = vadd.f32 1.0, %v5987_v12  ;;  %6000 = vrcp.f32 %v5308_v46 }
 0x4e1   : > { %v5294_v57 = vadd.f32 1.0, %v5989_v3 }
 0x4e2   : > { %6002 = vrcp.f32 %v5309_v63 }
 0x4e3   : > { %6004 = vrcp.f32 %v5294_v57 }
 0x4e5   : > { %v5991_v19 = vpop.eup %5990 }
 0x4e6   : > { %v5993_v9 = vpop.eup %5992  ;;  %v5310_v34 = vadd.f32 1.0, %v5991_v19 }
 0x4e7   : > { %v5311_v52 = vadd.f32 1.0, %v5993_v9  ;;  %v5995_v62 = vpop.eup %5994 }
 0x4e8   : > { %6006 = vrcp.f32 %v5310_v34  ;;  %v5997_v51 = vpop.eup %5996 }
 0x4e9   : > { %6008 = vrcp.f32 %v5311_v52  ;;  %v5999_v10 = vpop.eup %5998  ;;  %v5349_v26 = vcombine.low %v5995_v62, %v5997_v51 }
 0x4ea   : > { %v6001_v39 = vpop.eup %6000 }
 0x4eb   : > { %v5365_v31 = vrot.slane %v5349_v26, %v9281_v27 }
 0x4ec   : > { %v6003_v5 = vpop.eup %6002 }
 0x4ed   : > { %v6005_v59 = vpop.eup %6004  ;;  %v5400_v17 = vcombine.low %v6001_v39, %v6003_v5 }
 0x4ee   : > { %v5348_v60 = vcombine.low %v6005_v59, %v5999_v10 }
 0x4ef   : > { %v5428_v14 = vrot.slane %v5400_v17, %v9281_v27 }
 0x4f0   : > { %v5358_v36 = vrot.slane %v5348_v60, %v9281_v27 }
 0x4f1   : > { %v5430_v13 = vcombine.low %v5421_v55, %v5428_v14 }
 0x4f2   : > { %v6007_v18 = vpop.eup %6006  ;;  %v5380_v24 = vcombine.low %v5358_v36, %v5365_v31 }
 0x4f3   : > { %v6009_v0 = vpop.eup %6008  ;;  %v5444_v15 = vrot.slane %v5430_v13, %v9281_v27 }
 0x4f4   : > { %v5388_v44 = vrot.slane %v5380_v24, %v9281_v27  ;;  %v5446_v43 = vcombine.low %v6007_v18, %v6009_v0 }
 0x4f5   : > { %v5445_v38 = vcombine.low %v5437_v49, %v5444_v15 }
 0x4f6   : > { %v5396_v45 = vcombine.low %v5388_v44, %v5395_v25  ;;  %v5453_v58 = vrot.slane %v5446_v43, %v9281_v27 }
 0x4f7   : > { %5465 = vst [vmem:[%s248_s8 + $0x8] sm:$0xff] %v5445_v38 }
 0x4f8   : > { %5464 = vst [vmem:[%s248_s8] sm:$0xff] %v5396_v45  ;;  %v5460_v54 = vrot.slane %v5453_v58, %v9281_v27 }
 0x4fa   : > { %5466 = vst.msk [vmem:[%s248_s8 + $0x10] sm:$0x3] %vm6710_vm8, %v5460_v54 }
 0x4fb PF: > { %s18_s23 = sadd.s32 1, %s6018_s23  }
 0x4fc   : > { %p15_p4 = scmp.ge.s32.totalorder %s18_s23, 4  }
 0x4fe   :  { %17 = sbr.rel (!%p15_p4) target bundleno = 3 (0x3), region = 100 }

</bundles_post_ra>
